<compile_context>
chip_gen: v7x
topology: tpu7x:2x2x1
jax: 0.10.0
libtpu: 0.0.40
codegen_flags: <defaults>
</compile_context>

<pallas_src>
import functools

import jax
import jax.numpy as jnp
from jax.experimental import pallas as pl
from jax.experimental.pallas import tpu as pltpu

_EPS = 1e-12            # matches torch.nn.functional.normalize default eps
_EPS_SQ = _EPS * _EPS   # x / max(||x||, eps) == x * rsqrt(max(||x||^2, eps^2))


def _round_up(v, m):
    return (v + m - 1) // m * m


def _transvlad_kernel(x_ref, w_ref, cent_ref, cwn_ref, out_ref,
                      acc_ref, ssum_ref, *,
                      num_clusters, l_valid, l_tile, need_l_mask,
                      mxu_dtype, precision):
    """Grid = (batch blocks, L tiles); L is the reduction axis (last, arbitrary).

    x_ref    : (B, LT, C)   tile of padded point features
    w_ref    : (K+G, C)     1x1-conv weight (no bias; vladv2=False)
    cent_ref : (K, C)       cluster centroids
    cwn_ref  : (K, 1)       pre-L2-normalized cluster weights
    out_ref  : (B, K, C)    fully normalized VLAD descriptor (flattened outside)
    acc_ref  : (B, K, C)    f32 accumulator of sum_l soft[l,k] * x[l,c] / ||x[l]||
    ssum_ref : (B, K)       f32 accumulator of sum_l soft[l,k]
    """
    K = num_clusters
    l_idx = pl.program_id(1)
    n_l = pl.num_programs(1)

    @pl.when(l_idx == 0)
    def _():
        acc_ref[...] = jnp.zeros_like(acc_ref)
        ssum_ref[...] = jnp.zeros_like(ssum_ref)

    x = x_ref[...]                                     # (B, LT, C)
    B, LT, C = x.shape
    x_m = x.astype(mxu_dtype)                          # MXU operand (no-op if same dtype)
    x_f = x.astype(jnp.float32)                        # f32 view for the norm (no-op for f32)

    # ---- per-point inverse L2 norm, kept as a (B, LT, 1) scalar ----
    # The scale commutes with the 1x1-conv matmul, so xn is never materialized.
    sq = jnp.sum(x_f * x_f, axis=-1, keepdims=True)
    invn = jax.lax.rsqrt(jnp.maximum(sq, _EPS_SQ))     # (B, LT, 1)

    # ---- 1x1 conv (no bias) on raw x: soft-assignment logits over K+G ----
    w = w_ref[...].astype(mxu_dtype)                   # (KG, C)
    logits = jax.lax.dot_general(
        x_m.reshape(B * LT, C), w, (((1,), (1,)), ((), ())),
        preferred_element_type=jnp.float32, precision=precision)
    logits = logits.reshape(B, LT, -1) * invn          # rescale per row after matmul

    # ---- softmax over clusters + ghosts; keep only the first K columns ----
    m = jnp.max(logits, axis=-1, keepdims=True)
    e = jnp.exp(logits - m)
    denom = jnp.sum(e, axis=-1, keepdims=True)         # (B, LT, 1)
    inv_denom = pl.reciprocal(denom)                   # exact; denom is tiny
    soft_k = e[:, :, :K] * inv_denom                   # (B, LT, K)
    soft_scaled = soft_k * invn                        # carries the input L2 norm into acc

    def accumulate(sk, sk_scaled):
        acc_ref[...] += jnp.einsum('blk,blc->bkc',
                                   sk_scaled.astype(mxu_dtype), x_m,
                                   preferred_element_type=jnp.float32,
                                   precision=precision)
        ssum_ref[...] += jnp.sum(sk, axis=1)

    if need_l_mask:
        # Only the final L tile can contain rows introduced by padding L up to
        # a tile multiple; earlier tiles skip the iota/compare/select entirely.
        is_last = l_idx == n_l - 1

        @pl.when(jnp.logical_not(is_last))
        def _():
            accumulate(soft_k, soft_scaled)

        @pl.when(is_last)
        def _():
            row = (jax.lax.broadcasted_iota(jnp.int32, (1, LT, 1), 1)
                   + l_idx * l_tile)
            keep = row < l_valid
            accumulate(jnp.where(keep, soft_k, 0.0),
                       jnp.where(keep, soft_scaled, 0.0))
    else:
        accumulate(soft_k, soft_scaled)

    # ---- finalize on the last L tile ----
    @pl.when(l_idx == n_l - 1)
    def _():
        cent = cent_ref[...].astype(jnp.float32)                   # (K, C)
        agg = acc_ref[...] - cent[None] * ssum_ref[...][:, :, None]

        # intra-normalization (per cluster, over C)
        isq = jnp.sum(agg * agg, axis=-1, keepdims=True)
        vlad = agg * jax.lax.rsqrt(jnp.maximum(isq, _EPS_SQ))      # (B, K, C)

        # parametric normalization (weights pre-normalized in the wrapper)
        vlad = vlad * cwn_ref[...][None]                           # (1, K, 1)

        # global L2 normalization over the flattened K*C descriptor
        gsq = jnp.sum(jnp.sum(vlad * vlad, axis=2, keepdims=True),
                      axis=1, keepdims=True)                       # (B, 1, 1)
        vlad = vlad * jax.lax.rsqrt(jnp.maximum(gsq, _EPS_SQ))

        # single lane-dense store (C = last dim, no per-cluster extract loop)
        out_ref[...] = vlad.astype(out_ref.dtype)


def transvlad3d_forward(x, conv_weight, centroids, cluster_weights,
                        *, l_tile=None, b_tile=None):
    """x: (N, L, C); conv_weight: (K+G, C); centroids: (K, C); cluster_weights: (K,)."""
    N, L, C = x.shape
    KG = conv_weight.shape[0]
    K = centroids.shape[0]
    itemsize = jnp.dtype(x.dtype).itemsize

    # ---- L tiling (exact reduction split over points) ----
    if l_tile is None:
        # HBM-bound kernel: stream big tiles (512-1024+ hits the measured DMA
        # roofline plateau).  2048 rows x 128 ch f32 ~ 1 MiB per buffer.
        l_tile = min(_round_up(L, 8), 2048)
    l_tile = max(8, _round_up(l_tile, 8))
    l_pad = _round_up(L, l_tile)

    # ---- batch blocking ----
    if b_tile is None:
        # Keep the logits matmul M-dim (b_tile*l_tile) MXU-friendly and the
        # streamed tile multi-MiB, within a v7x-safe VMEM budget (f32 temps
        # counted per row: x cast + logits + soft_k + soft_scaled).
        row_bytes = 2 * C * itemsize + (C + KG + 2 * K) * 4
        target_rows = max(2048, min(8192, (24 * 2**20) // row_bytes))
        b_tile = max(1, target_rows // l_tile)
    b_tile = max(1, min(b_tile, N))
    if N >= 2:
        # Keep >= 2 steps on the parallel batch axis so v7x megacore shards the
        # work across both TensorCores (no effect on single-TC v5e/v6e).
        b_tile = min(b_tile, max(1, N // 2))
    n_pad = _round_up(N, b_tile)

    xp = x
    if n_pad != N or l_pad != L:
        xp = jnp.pad(x, ((0, n_pad - N), (0, l_pad - L), (0, 0)))

    # Hoist cluster-weight normalization out of the kernel (data independent).
    cw = cluster_weights.astype(jnp.float32)
    cwn = (cw / jnp.maximum(jnp.sqrt(jnp.sum(cw * cw)), _EPS)).reshape(K, 1)

    # Feed bf16 to the MXU only when the input is already bf16; keep f32 inputs
    # on the high-precision f32 MXU path so results match the f32 reference.
    # TODO(synk): optionally cast f32 inputs to bf16 for the two matmuls
    # (4-8x MXU speedup on v6e/v7x) once the accuracy budget allows it.
    mxu_dtype = jnp.bfloat16 if x.dtype == jnp.bfloat16 else jnp.float32
    precision = (jax.lax.Precision.HIGHEST if mxu_dtype == jnp.float32
                 else jax.lax.Precision.DEFAULT)

    grid = (n_pad // b_tile, l_pad // l_tile)

    # VMEM budget: double-buffered streamed tile + in-kernel f32 temporaries
    # + double-buffered output block + resident weights + accumulators.
    # Always set explicitly (v5e default scoped VMEM is only 16 MiB); cap at
    # 56 MiB to leave headroom under v7x's 64 MiB physical VMEM.
    rows = b_tile * l_tile
    est = (2 * rows * C * itemsize                  # streamed x tile (x2 buffers)
           + rows * (C + KG + 2 * K) * 4            # f32 temporaries
           + 2 * b_tile * K * C * itemsize          # output block (x2 buffers)
           + 2 * (KG + K) * C * 4 + 2 * K * 4       # weights / centroids / cwn
           + b_tile * K * (2 * C + 1) * 4)          # accumulators + finalize temp
    vmem_limit = int(min(56 * 2**20, max(est + (4 << 20), 32 * 2**20)))

    kernel = functools.partial(
        _transvlad_kernel, num_clusters=K, l_valid=L, l_tile=l_tile,
        need_l_mask=(l_pad != L), mxu_dtype=mxu_dtype, precision=precision)

    out = pl.pallas_call(
        kernel,
        out_shape=jax.ShapeDtypeStruct((n_pad, K, C), x.dtype),
        grid_spec=pltpu.PrefetchScalarGridSpec(
            num_scalar_prefetch=0,
            grid=grid,
            in_specs=[
                pl.BlockSpec((b_tile, l_tile, C), lambda b, l: (b, l, 0)),
                pl.BlockSpec((KG, C), lambda b, l: (0, 0)),
                pl.BlockSpec((K, C), lambda b, l: (0, 0)),
                pl.BlockSpec((K, 1), lambda b, l: (0, 0)),
            ],
            out_specs=pl.BlockSpec((b_tile, K, C), lambda b, l: (b, 0, 0)),
            scratch_shapes=[
                pltpu.VMEM((b_tile, K, C), jnp.float32),
                pltpu.VMEM((b_tile, K), jnp.float32),
            ],
        ),
        compiler_params=pltpu.CompilerParams(
            dimension_semantics=("parallel", "arbitrary"),
            vmem_limit_bytes=vmem_limit),
    )(xp, conv_weight, centroids, cwn)

    return out[:N].reshape(N, K * C)


def transvlad3d_reference(x, conv_weight, centroids, cluster_weights):
    """Pure-JAX reference mirroring the PyTorch forward semantics."""
    K = centroids.shape[0]
    hi = jax.lax.Precision.HIGHEST
    xn = x / jnp.maximum(jnp.linalg.norm(x, axis=-1, keepdims=True), _EPS)
    logits = jnp.einsum('nlc,gc->nlg', xn, conv_weight, precision=hi)
    soft = jax.nn.softmax(logits, axis=-1)[..., :K]
    agg = (jnp.einsum('nlk,nlc->nkc', soft, xn, precision=hi)
           - centroids[None] * jnp.sum(soft, axis=1)[..., None])
    vlad = agg / jnp.maximum(jnp.linalg.norm(agg, axis=-1, keepdims=True), _EPS)
    cwn = cluster_weights / jnp.maximum(jnp.linalg.norm(cluster_weights), _EPS)
    vlad = vlad * cwn[None, :, None]
    flat = vlad.reshape(x.shape[0], -1)
    return flat / jnp.maximum(jnp.linalg.norm(flat, axis=-1, keepdims=True), _EPS)


if __name__ == "__main__":
    # Small shapes consistent with the module (dim=128 is the module default,
    # num_ghost=9).  L=200 with l_tile=128 exercises the L-tiled accumulation,
    # the last-tile padding mask, and (b_tile=2) a multi-step batch axis.
    N, L, dim = 4, 200, 128
    num_clusters, num_ghost = 16, 9

    key = jax.random.PRNGKey(0)
    k_x, k_cent, k_w, k_cw = jax.random.split(key, 4)

    x = jax.random.normal(k_x, (N, L, dim), dtype=jnp.float32)
    # nn.Parameter(torch.rand(num_clusters, dim)) -> uniform [0, 1)
    centroids = jax.random.uniform(k_cent, (num_clusters, dim), dtype=jnp.float32)
    # nn.Conv2d(dim, K+G, 1, bias=False) weight, squeezed to (K+G, dim)
    conv_weight = 0.1 * jax.random.normal(
        k_w, (num_clusters + num_ghost, dim), dtype=jnp.float32)
    # param_norm cluster weights (init is ones; use generic positive values)
    cluster_weights = 0.5 + jax.random.uniform(
        k_cw, (num_clusters,), dtype=jnp.float32)

    out = transvlad3d_forward(x, conv_weight, centroids, cluster_weights,
                              l_tile=128)
    out = jax.block_until_ready(out)

    ref = transvlad3d_reference(x, conv_weight, centroids, cluster_weights)
    assert out.shape == (N, num_clusters * dim), out.shape
    err = float(jnp.max(jnp.abs(out - ref)))
    assert err < 5e-4, err
    print("KERNEL_OK")
</pallas_src>

<mosaic_0001>
module attributes {stable_mosaic.version = 11 : i64} {
  func.func @_transvlad_kernel(%arg0: i32, %arg1: i32, %arg2: memref<2x128x128xf32, #tpu.memory_space<vmem>>, %arg3: memref<25x128xf32, #tpu.memory_space<vmem>>, %arg4: memref<16x128xf32, #tpu.memory_space<vmem>>, %arg5: memref<16x1xf32, #tpu.memory_space<vmem>>, %arg6: memref<2x16x128xf32, #tpu.memory_space<vmem>>, %arg7: memref<2x16x128xf32, #tpu.memory_space<vmem>>, %arg8: memref<2x16xf32, #tpu.memory_space<vmem>>) attributes {dimension_semantics = [#tpu.dimension_semantics<parallel>, #tpu.dimension_semantics<arbitrary>], iteration_bounds = array<i64: 2, 2>, scalar_prefetch = 0 : i64, scratch_operands = 2 : i64, tpu.core_type = #tpu.core_type<tc>, window_params = [{transform_indices = @transform_0, window_bounds = array<i64: 2, 128, 128>}, {pipeline_mode = #tpu.pipeline_mode<synchronous>, transform_indices = @transform_1, window_bounds = array<i64: 25, 128>}, {pipeline_mode = #tpu.pipeline_mode<synchronous>, transform_indices = @transform_2, window_bounds = array<i64: 16, 128>}, {pipeline_mode = #tpu.pipeline_mode<synchronous>, transform_indices = @transform_3, window_bounds = array<i64: 16, 1>}, {transform_indices = @transform_4, window_bounds = array<i64: 2, 16, 128>}]} {
    %c0_i32 = arith.constant 0 : i32
    %0 = arith.cmpi eq, %arg1, %c0_i32 : i32
    %1 = arith.extui %0 : i1 to i32
    %c0_i32_0 = arith.constant 0 : i32
    %2 = arith.cmpi ne, %1, %c0_i32_0 : i32
    scf.if %2 {
      %cst_13 = arith.constant 0.000000e+00 : f32
      %38 = vector.broadcast %cst_13 : f32 to vector<2x16x128xf32>
      %c0_14 = arith.constant 0 : index
      %c0_15 = arith.constant 0 : index
      %c0_16 = arith.constant 0 : index
      %39 = vector.load %arg7[%c0_14, %c0_15, %c0_16] : memref<2x16x128xf32, #tpu.memory_space<vmem>>, vector<2x16x128xf32>
      tpu.vector_store %arg7[%c0_14, %c0_15, %c0_16], %38 {strides = array<i32>} : memref<2x16x128xf32, #tpu.memory_space<vmem>>, vector<2x16x128xf32>,
      %cst_17 = arith.constant 0.000000e+00 : f32
      %40 = vector.broadcast %cst_17 : f32 to vector<2x16xf32>
      %c0_18 = arith.constant 0 : index
      %c0_19 = arith.constant 0 : index
      %41 = vector.load %arg8[%c0_18, %c0_19] : memref<2x16xf32, #tpu.memory_space<vmem>>, vector<2x16xf32>
      tpu.vector_store %arg8[%c0_18, %c0_19], %40 {strides = array<i32>} : memref<2x16xf32, #tpu.memory_space<vmem>>, vector<2x16xf32>,
    } else {
    }
    %c0 = arith.constant 0 : index
    %c0_1 = arith.constant 0 : index
    %c0_2 = arith.constant 0 : index
    %3 = vector.load %arg2[%c0, %c0_1, %c0_2] : memref<2x128x128xf32, #tpu.memory_space<vmem>>, vector<2x128x128xf32>
    %4 = arith.mulf %3, %3 : vector<2x128x128xf32>
    %cst = arith.constant dense<0.000000e+00> : vector<2x128xf32>
    %5 = vector.multi_reduction <add>, %4, %cst [2] : vector<2x128x128xf32> to vector<2x128xf32>
    %6 = vector.shape_cast %5 : vector<2x128xf32> to vector<2x128x1xf32>
    %cst_3 = arith.constant 1.000000e-24 : f32
    %7 = vector.broadcast %cst_3 : f32 to vector<2x128x1xf32>
    %8 = arith.maximumf %6, %7 : vector<2x128x1xf32>
    %9 = math.rsqrt %8 : vector<2x128x1xf32>
    %c0_4 = arith.constant 0 : index
    %c0_5 = arith.constant 0 : index
    %10 = vector.load %arg3[%c0_4, %c0_5] : memref<25x128xf32, #tpu.memory_space<vmem>>, vector<25x128xf32>
    %11 = vector.shape_cast %3 : vector<2x128x128xf32> to vector<256x128xf32>
    %cst_6 = arith.constant dense<0.000000e+00> : vector<256x25xf32>
    %12 = tpu.matmul %11, %10, %cst_6 {dimension_numbers = #tpu.dot_dimension_numbers<[1], [1], [0], [0], [0, 0, 1, 0], [], []>, precision = #tpu.contract_precision<fp32>} : vector<256x128xf32>, vector<25x128xf32>, vector<256x25xf32> -> vector<256x25xf32>
    %13 = vector.shape_cast %12 : vector<256x25xf32> to vector<2x128x25xf32>
    %14 = vector.broadcast %9 : vector<2x128x1xf32> to vector<2x128x25xf32>
    %15 = arith.mulf %13, %14 : vector<2x128x25xf32>
    %cst_7 = arith.constant dense<0xFF800000> : vector<2x128xf32>
    %16 = vector.multi_reduction <maximumf>, %15, %cst_7 [2] : vector<2x128x25xf32> to vector<2x128xf32>
    %17 = vector.shape_cast %16 : vector<2x128xf32> to vector<2x128x1xf32>
    %18 = vector.broadcast %17 : vector<2x128x1xf32> to vector<2x128x25xf32>
    %19 = arith.subf %15, %18 : vector<2x128x25xf32>
    %20 = math.exp %19 : vector<2x128x25xf32>
    %cst_8 = arith.constant dense<0.000000e+00> : vector<2x128xf32>
    %21 = vector.multi_reduction <add>, %20, %cst_8 [2] : vector<2x128x25xf32> to vector<2x128xf32>
    %22 = vector.shape_cast %21 : vector<2x128xf32> to vector<2x128x1xf32>
    %23 = tpu.reciprocal %22 : vector<2x128x1xf32> -> vector<2x128x1xf32>
    %24 = vector.extract_strided_slice %20 {offsets = [0, 0, 0], sizes = [2, 128, 16], strides = [1, 1, 1]} : vector<2x128x25xf32> to vector<2x128x16xf32>
    %25 = vector.broadcast %23 : vector<2x128x1xf32> to vector<2x128x16xf32>
    %26 = arith.mulf %24, %25 : vector<2x128x16xf32>
    %27 = vector.broadcast %9 : vector<2x128x1xf32> to vector<2x128x16xf32>
    %28 = arith.mulf %26, %27 : vector<2x128x16xf32>
    %c1_i32 = arith.constant 1 : i32
    %29 = arith.cmpi eq, %arg1, %c1_i32 : i32
    %true = arith.constant true
    %30 = arith.xori %29, %true : i1
    %31 = arith.extui %30 : i1 to i32
    %c0_i32_9 = arith.constant 0 : i32
    %32 = arith.cmpi ne, %31, %c0_i32_9 : i32
    scf.if %32 {
      %c0_13 = arith.constant 0 : index
      %c0_14 = arith.constant 0 : index
      %c0_15 = arith.constant 0 : index
      %38 = vector.load %arg7[%c0_13, %c0_14, %c0_15] : memref<2x16x128xf32, #tpu.memory_space<vmem>>, vector<2x16x128xf32>
      "tpu.trace_start"() <{level = 10 : i32, message = "blk,blc->bkc"}> : () -> ()
      %cst_16 = arith.constant dense<0.000000e+00> : vector<2x16x128xf32>
      %39 = tpu.matmul %28, %3, %cst_16 {dimension_numbers = #tpu.dot_dimension_numbers<[1], [1], [2], [2], [0, 0, 0, 2, 1, 2], [0], [0]>, precision = #tpu.contract_precision<fp32>} : vector<2x128x16xf32>, vector<2x128x128xf32>, vector<2x16x128xf32> -> vector<2x16x128xf32>
      "tpu.trace_stop"() : () -> ()
      %40 = arith.addf %38, %39 : vector<2x16x128xf32>
      %c0_17 = arith.constant 0 : index
      %c0_18 = arith.constant 0 : index
      %c0_19 = arith.constant 0 : index
      %41 = vector.load %arg7[%c0_17, %c0_18, %c0_19] : memref<2x16x128xf32, #tpu.memory_space<vmem>>, vector<2x16x128xf32>
      tpu.vector_store %arg7[%c0_17, %c0_18, %c0_19], %40 {strides = array<i32>} : memref<2x16x128xf32, #tpu.memory_space<vmem>>, vector<2x16x128xf32>,
      %c0_20 = arith.constant 0 : index
      %c0_21 = arith.constant 0 : index
      %42 = vector.load %arg8[%c0_20, %c0_21] : memref<2x16xf32, #tpu.memory_space<vmem>>, vector<2x16xf32>
      %cst_22 = arith.constant dense<0.000000e+00> : vector<2x16xf32>
      %43 = vector.multi_reduction <add>, %26, %cst_22 [1] : vector<2x128x16xf32> to vector<2x16xf32>
      %44 = arith.addf %42, %43 : vector<2x16xf32>
      %c0_23 = arith.constant 0 : index
      %c0_24 = arith.constant 0 : index
      %45 = vector.load %arg8[%c0_23, %c0_24] : memref<2x16xf32, #tpu.memory_space<vmem>>, vector<2x16xf32>
      tpu.vector_store %arg8[%c0_23, %c0_24], %44 {strides = array<i32>} : memref<2x16xf32, #tpu.memory_space<vmem>>, vector<2x16xf32>,
    } else {
    }
    %33 = arith.extui %29 : i1 to i32
    %c0_i32_10 = arith.constant 0 : i32
    %34 = arith.cmpi ne, %33, %c0_i32_10 : i32
    scf.if %34 {
      %38 = tpu.iota {dimensions = array<i32: 1>} : vector<1x128x1xi32>
      %c128_i32 = arith.constant 128 : i32
      %39 = arith.muli %arg1, %c128_i32 : i32
      %40 = vector.broadcast %39 : i32 to vector<1x128x1xi32>
      %41 = arith.addi %38, %40 : vector<1x128x1xi32>
      %c200_i32 = arith.constant 200 : i32
      %42 = vector.broadcast %c200_i32 : i32 to vector<1x128x1xi32>
      %43 = arith.cmpi slt, %41, %42 : vector<1x128x1xi32>
      %cst_13 = arith.constant 0.000000e+00 : f32
      %44 = vector.shape_cast %43 : vector<1x128x1xi1> to vector<1x128x1xi1>
      %45 = vector.broadcast %44 : vector<1x128x1xi1> to vector<2x128x16xi1>
      %46 = vector.broadcast %cst_13 : f32 to vector<2x128x16xf32>
      %47 = arith.select %45, %26, %46 : vector<2x128x16xi1>, vector<2x128x16xf32>
      %cst_14 = arith.constant 0.000000e+00 : f32
      %48 = vector.shape_cast %43 : vector<1x128x1xi1> to vector<1x128x1xi1>
      %49 = vector.broadcast %48 : vector<1x128x1xi1> to vector<2x128x16xi1>
      %50 = vector.broadcast %cst_14 : f32 to vector<2x128x16xf32>
      %51 = arith.select %49, %28, %50 : vector<2x128x16xi1>, vector<2x128x16xf32>
      %c0_15 = arith.constant 0 : index
      %c0_16 = arith.constant 0 : index
      %c0_17 = arith.constant 0 : index
      %52 = vector.load %arg7[%c0_15, %c0_16, %c0_17] : memref<2x16x128xf32, #tpu.memory_space<vmem>>, vector<2x16x128xf32>
      "tpu.trace_start"() <{level = 10 : i32, message = "blk,blc->bkc"}> : () -> ()
      %cst_18 = arith.constant dense<0.000000e+00> : vector<2x16x128xf32>
      %53 = tpu.matmul %51, %3, %cst_18 {dimension_numbers = #tpu.dot_dimension_numbers<[1], [1], [2], [2], [0, 0, 0, 2, 1, 2], [0], [0]>, precision = #tpu.contract_precision<fp32>} : vector<2x128x16xf32>, vector<2x128x128xf32>, vector<2x16x128xf32> -> vector<2x16x128xf32>
      "tpu.trace_stop"() : () -> ()
      %54 = arith.addf %52, %53 : vector<2x16x128xf32>
      %c0_19 = arith.constant 0 : index
      %c0_20 = arith.constant 0 : index
      %c0_21 = arith.constant 0 : index
      %55 = vector.load %arg7[%c0_19, %c0_20, %c0_21] : memref<2x16x128xf32, #tpu.memory_space<vmem>>, vector<2x16x128xf32>
      tpu.vector_store %arg7[%c0_19, %c0_20, %c0_21], %54 {strides = array<i32>} : memref<2x16x128xf32, #tpu.memory_space<vmem>>, vector<2x16x128xf32>,
      %c0_22 = arith.constant 0 : index
      %c0_23 = arith.constant 0 : index
      %56 = vector.load %arg8[%c0_22, %c0_23] : memref<2x16xf32, #tpu.memory_space<vmem>>, vector<2x16xf32>
      %cst_24 = arith.constant dense<0.000000e+00> : vector<2x16xf32>
      %57 = vector.multi_reduction <add>, %47, %cst_24 [1] : vector<2x128x16xf32> to vector<2x16xf32>
      %58 = arith.addf %56, %57 : vector<2x16xf32>
      %c0_25 = arith.constant 0 : index
      %c0_26 = arith.constant 0 : index
      %59 = vector.load %arg8[%c0_25, %c0_26] : memref<2x16xf32, #tpu.memory_space<vmem>>, vector<2x16xf32>
      tpu.vector_store %arg8[%c0_25, %c0_26], %58 {strides = array<i32>} : memref<2x16xf32, #tpu.memory_space<vmem>>, vector<2x16xf32>,
    } else {
    }
    %c1_i32_11 = arith.constant 1 : i32
    %35 = arith.cmpi eq, %arg1, %c1_i32_11 : i32
    %36 = arith.extui %35 : i1 to i32
    %c0_i32_12 = arith.constant 0 : i32
    %37 = arith.cmpi ne, %36, %c0_i32_12 : i32
    scf.if %37 {
      %c0_13 = arith.constant 0 : index
      %c0_14 = arith.constant 0 : index
      %38 = vector.load %arg4[%c0_13, %c0_14] : memref<16x128xf32, #tpu.memory_space<vmem>>, vector<16x128xf32>
      %c0_15 = arith.constant 0 : index
      %c0_16 = arith.constant 0 : index
      %c0_17 = arith.constant 0 : index
      %39 = vector.load %arg7[%c0_15, %c0_16, %c0_17] : memref<2x16x128xf32, #tpu.memory_space<vmem>>, vector<2x16x128xf32>
      %40 = vector.shape_cast %38 : vector<16x128xf32> to vector<1x16x128xf32>
      %c0_18 = arith.constant 0 : index
      %c0_19 = arith.constant 0 : index
      %41 = vector.load %arg8[%c0_18, %c0_19] : memref<2x16xf32, #tpu.memory_space<vmem>>, vector<2x16xf32>
      %42 = vector.shape_cast %41 : vector<2x16xf32> to vector<2x16x1xf32>
      %43 = vector.broadcast %40 : vector<1x16x128xf32> to vector<2x16x128xf32>
      %44 = vector.broadcast %42 : vector<2x16x1xf32> to vector<2x16x128xf32>
      %45 = arith.mulf %43, %44 : vector<2x16x128xf32>
      %46 = arith.subf %39, %45 : vector<2x16x128xf32>
      %47 = arith.mulf %46, %46 : vector<2x16x128xf32>
      %cst_20 = arith.constant dense<0.000000e+00> : vector<2x16xf32>
      %48 = vector.multi_reduction <add>, %47, %cst_20 [2] : vector<2x16x128xf32> to vector<2x16xf32>
      %49 = vector.shape_cast %48 : vector<2x16xf32> to vector<2x16x1xf32>
      %cst_21 = arith.constant 1.000000e-24 : f32
      %50 = vector.broadcast %cst_21 : f32 to vector<2x16x1xf32>
      %51 = arith.maximumf %49, %50 : vector<2x16x1xf32>
      %52 = math.rsqrt %51 : vector<2x16x1xf32>
      %53 = vector.broadcast %52 : vector<2x16x1xf32> to vector<2x16x128xf32>
      %54 = arith.mulf %46, %53 : vector<2x16x128xf32>
      %c0_22 = arith.constant 0 : index
      %c0_23 = arith.constant 0 : index
      %55 = vector.load %arg5[%c0_22, %c0_23] : memref<16x1xf32, #tpu.memory_space<vmem>>, vector<16x1xf32>
      %56 = vector.shape_cast %55 : vector<16x1xf32> to vector<1x16x1xf32>
      %57 = vector.broadcast %56 : vector<1x16x1xf32> to vector<2x16x128xf32>
      %58 = arith.mulf %54, %57 : vector<2x16x128xf32>
      %59 = arith.mulf %58, %58 : vector<2x16x128xf32>
      %cst_24 = arith.constant dense<0.000000e+00> : vector<2x16xf32>
      %60 = vector.multi_reduction <add>, %59, %cst_24 [2] : vector<2x16x128xf32> to vector<2x16xf32>
      %61 = vector.shape_cast %60 : vector<2x16xf32> to vector<2x16x1xf32>
      %cst_25 = arith.constant dense<0.000000e+00> : vector<2x1xf32>
      %62 = vector.multi_reduction <add>, %61, %cst_25 [1] : vector<2x16x1xf32> to vector<2x1xf32>
      %63 = vector.shape_cast %62 : vector<2x1xf32> to vector<2x1x1xf32>
      %cst_26 = arith.constant 1.000000e-24 : f32
      %64 = vector.broadcast %cst_26 : f32 to vector<2x1x1xf32>
      %65 = arith.maximumf %63, %64 : vector<2x1x1xf32>
      %66 = math.rsqrt %65 : vector<2x1x1xf32>
      %67 = vector.broadcast %66 : vector<2x1x1xf32> to vector<2x16x128xf32>
      %68 = arith.mulf %58, %67 : vector<2x16x128xf32>
      %c0_27 = arith.constant 0 : index
      %c0_28 = arith.constant 0 : index
      %c0_29 = arith.constant 0 : index
      %69 = vector.load %arg6[%c0_27, %c0_28, %c0_29] : memref<2x16x128xf32, #tpu.memory_space<vmem>>, vector<2x16x128xf32>
      tpu.vector_store %arg6[%c0_27, %c0_28, %c0_29], %68 {strides = array<i32>} : memref<2x16x128xf32, #tpu.memory_space<vmem>>, vector<2x16x128xf32>,
    } else {
    }
    return
  }
  func.func @transform_0(%arg0: i32, %arg1: i32) -> (i32, i32, i32) {
    %c0_i32 = arith.constant 0 : i32
    %c0_i32_0 = arith.constant 0 : i32
    return %arg0, %arg1, %c0_i32 : i32, i32, i32
  }
  func.func @transform_1(%arg0: i32, %arg1: i32) -> (i32, i32) {
    %c0_i32 = arith.constant 0 : i32
    %c0_i32_0 = arith.constant 0 : i32
    %c0_i32_1 = arith.constant 0 : i32
    return %c0_i32, %c0_i32_0 : i32, i32
  }
  func.func @transform_2(%arg0: i32, %arg1: i32) -> (i32, i32) {
    %c0_i32 = arith.constant 0 : i32
    %c0_i32_0 = arith.constant 0 : i32
    %c0_i32_1 = arith.constant 0 : i32
    return %c0_i32, %c0_i32_0 : i32, i32
  }
  func.func @transform_3(%arg0: i32, %arg1: i32) -> (i32, i32) {
    %c0_i32 = arith.constant 0 : i32
    %c0_i32_0 = arith.constant 0 : i32
    %c0_i32_1 = arith.constant 0 : i32
    return %c0_i32, %c0_i32_0 : i32, i32
  }
  func.func @transform_4(%arg0: i32, %arg1: i32) -> (i32, i32, i32) {
    %c0_i32 = arith.constant 0 : i32
    %c0_i32_0 = arith.constant 0 : i32
    %c0_i32_1 = arith.constant 0 : i32
    return %arg0, %c0_i32, %c0_i32_0 : i32, i32, i32
  }
}

</mosaic_0001>

<bundles_post_ra>
// kernel: tpu_custom_call.1
= control target key start
LH: loop header
LB: loop body
LE: loop exit
PB: predicated region body
PF: predicated region fallthrough
CT: control target
= control target key end

     0   :  { %s12293_s0 = inlined_call_operand.hbm [shape: f32[4,256,128], index: 0, kind: input, shape index: {}]   ;;  %s12294_s1 = inlined_call_operand.hbm [shape: f32[25,128], index: 1, kind: input, shape index: {}]   ;;  %s12295_s2 = inlined_call_operand.vmem [shape: f32[16,128], index: 2, kind: input, shape index: {}]   ;;  %s12296_s3 = inlined_call_operand.vmem [shape: f32[16,1], index: 3, kind: input, shape index: {}]   ;;  %s12297_s4 = inlined_call_operand.hbm [shape: f32[4,16,128], index: 4, kind: output, shape index: {}]  }
   0x1   :  { %12522 = sst [smem:[#allocation193_spill]] %s12294_s1 }
   0x2   :  { %9 = vsyncpa [#allocation5], 0 }
   0x3   :  { %11 = vsyncpa [#allocation5 + $0x1], 0 }
   0x4   :  { %12 = vsyncpa [#allocation8], 0 }
   0x5   :  { %13 = vsyncpa [#allocation6], 0 }
   0x6   :  { %15 = vsyncpa [#allocation6 + $0x1], 0  ;;  %s9552_s15 = smov 0   ;;  %s9554_s16 = smov 0  }
   0x7   :  { %s9556_s17 = smov 0   ;;  %s9558_s18 = smov 0  }
   0x8   :  { %s9560_s19 = smov 0   ;;  %s9562_s20 = smov 0  }
   0x9   :  { %s9564_s21 = smov 0   ;;  %s9566_s22 = smov 0  }
   0xa   :  { %s9568_s23 = smov 0   ;;  %s9570_s24 = smov 0  }
   0xb   :  { %s9572_s25 = smov 0  }
   0xc LB: > { %12523 = sst [smem:[#allocation16_spill]] %s9479_s17  ;;  %s6155_s26 = sadd.s32 4294967295, %s9511_s25   ;;  %s9511_s25 = sphi %s9572_s25, %s21_s25   ;;  %s9507_s24 = sphi %s9570_s24, %s13122_s24   ;;  %s9503_s23 = sphi %s9568_s23, %s13121_s23   ;;  %s9499_s22 = sphi %s9566_s22, %s13120_s22   ;;  %s9495_s21 = sphi %s9564_s21, %s13119_s21   ;;  %s9491_s20 = sphi %s9562_s20, %s13127_s20   ;;  %s9487_s19 = sphi %s9560_s19, %s13126_s19   ;;  %s9483_s18 = sphi %s9558_s18, %s13125_s18   ;;  %s9479_s17 = sphi %s9556_s17, %s13117_s17   ;;  %s9475_s16 = sphi %s9554_s16, %s13124_s16   ;;  %s9471_s15 = sphi %s9552_s15, %s13123_s15  }
   0xd   : > { %12524 = sst [smem:[#allocation17_spill]] %s9503_s23  ;;  %s6156_s27 = sadd.s32 4294967294, %s9511_s25  }
   0xe   : > { %12525 = sst [smem:[#allocation18_spill]] %s9507_s24  ;;  %s30_s28 = sadd.s32 1, %s9503_s23 }
   0xf   : > { %s33_s29 = sadd.s32 1, %s9507_s24  ;;  %p31_p0 = scmp.ge.s32.totalorder %s30_s28, 2 }
  0x10   : > { %s42_s30 = sadd.s32 1, %s9491_s20  ;;  %p49_p1 = scmp.ne.s32.totalorder %s9491_s20, %s9487_s19 }
  0x11   : > { %p50_p2 = scmp.eq.s32.totalorder %s9511_s25, 0  ;;  %s13129_s28 = smov (%p31_p0, %s30_s28), 0 }
  0x12   : > { %12526 = sst [smem:[#allocation19_spill]] %s13129_s28  ;;  %s13131_s29 = smov (!%p31_p0, %s33_s29), %s9507_s24 }
  0x13   : > { %s38_s5 = ssub.s32 %s9503_s23, %s13129_s28  ;;  %p9618_p3 = por %p50_p2, %p49_p1 }
  0x14   : > { %p35_p4 = scmp.ge.s32.totalorder %s13131_s29, 2  ;;  %p55_p5 = scmp.ne.s32.totalorder %s9487_s19, %s9483_s18 }
  0x15   : > { %s12527_s6 = scalar_select %p9618_p3, 1, 0 }
  0x16   : > { %p9623_p6 = scmp.eq.s32.totalorder %s6155_s26, 0  ;;  %s131_s8 = sadd.s32 1, %s9479_s17 }
  0x17   : > { %s13133_s29 = smov (%p35_p4, %s13131_s29), 0  ;;  %p141_p8 = scmp.ne.s32.totalorder %s9479_s17, %s9475_s16 }
  0x18   : > { %s12528_s7 = scalar_select %p9623_p6, 1, 0 }
  0x19   : > { %12529 = sst [smem:[#allocation20_spill]] %s13133_s29  ;;  %p9632_p7 = por %p9623_p6, %p55_p5 }
  0x1a   : > { %s37_s10 = ssub.s32 %s9507_s24, %s13133_s29  ;;  %p142_p9 = scmp.eq.s32.totalorder %s6155_s26, 3 }
  0x1b   : > { %s12530_s9 = scalar_select %p9632_p7, 1, 0 }
  0x1c   : > { %s39_s11 = sor.u32 %s38_s5, %s37_s10  ;;  %p129_p10 = scmp.eq.s32.totalorder %s37_s10, 0 }
  0x1d   : > { %p40_p11 = scmp.eq.s32.totalorder %s39_s11, 0  ;;  %p9640_p12 = por %p142_p9, %p141_p8 }
  0x1e   : > { %s9645_s13 = scalar_select %p129_p10, %s9479_s17, %s131_s8  }
  0x1f   : > { %s12531_s12 = scalar_select %p9640_p12, 1, 0 }
  0x20   : > { %12532 = sst [smem:[#allocation21_spill]] %s9645_s13  ;;  %p147_p13 = scmp.ne.s32.totalorder %s9475_s16, %s9471_s15 }
  0x21   : > { %s9648_s14 = scalar_select %p40_p11, %s9491_s20, %s42_s30  }
  0x22   : > { %p148_p0 = scmp.eq.s32.totalorder %s6156_s27, 3  ;;  %p6157_p1 = scmp.ge.s32.totalorder %s9511_s25, 1 }
  0x23   : > { %12533 = sst [smem:[#allocation22_spill]] %s9648_s14  ;;  %p155_p2 = scmp.lt.s32.totalorder %s9511_s25, 5 }
  0x24   : > { %p9654_p4 = por %p148_p0, %p147_p13  ;;  %s9513_s5 = smov [#allocation7]  }
  0x25   : > { %p9658_p5 = pnand %p6157_p1, %p155_p2  ;;  %s167_s10 = sshll.u32 %s9513_s5, 4  ;;  %s168_s10 = int_to_ptr.vmem [resolvable:$true] %s167_s10 }
  0x26   : > { %s12534_s18 = scalar_select %p9654_p4, 1, 0 }
  0x27   : > { %s12535_s26 = scalar_select %p9658_p5, 1, 0 }
  0x28   : > { %p9039_p8 = pneg %p9658_p5  ;;  %s12537_s1 = sld [smem:[#allocation193_spill]] }
  0x2a   : > { %p9666_p9 = pnand %p9039_p8, %p9623_p6 }
  0x2c   : > { %p9359_p11 = pneg %p9666_p9 }
  0x2e   : > { %s9357_s11 = scalar_lea.hbm %s12537_s1, 512 }
  0x2f   : > { %p9358_p10 = scmp.ne.s32.totalorder %s12537_s1, %s9357_s11  ;;  %p9364_p1 = scmp.lt.u32.totalorder %s9357_s11, %s12537_s1 }
  0x31   : > { %p9360_p13 = pnand %p9359_p11, %p9358_p10 }
  0x33   : > { %p9361_p0 = pneg %p9360_p13 }
  0x35   : > { %p9366_p2 = pnand %p9364_p1, %p9361_p0 }
  0x37   : > { %9369 = shalt.err (!%p9366_p2)
}
  0x38   : > { %s9370_s13 = scalar_lea.vmem %s168_s10, 512  ;;  %p9378_p6 = scmp.lt.s32.totalorder %s168_s10, %s168_s10 }
  0x39   : > { %p9371_p8 = scmp.ne.s32.totalorder %s168_s10, %s9370_s13  ;;  %p9379_p7 = scmp.lt.s32.totalorder %s9370_s13, %s9370_s13 }
  0x3b   : > { %p9373_p4 = pnand %p9371_p8, %p9359_p11  ;;  %p9380_p5 = por %p9379_p7, %p9378_p6 }
  0x3d   : > { %p9374_p12 = pneg %p9373_p4 }
  0x3f   : > { %p9381_p3 = pnand %p9380_p5, %p9374_p12 }
  0x41   : > { %9384 = shalt.err (!%p9381_p3)
}
  0x42   : > { %s9514_s28 = smov 128   ;;  %s9515_s29 = smov 8  }
  0x43   : > { %9042 = dma.hbm_to_vmem [thread:$0]  (!%p9666_p9), %s12537_s1, 512, %s168_s10, [#allocation8], %s9514_s28, %s9514_s28, %s9515_s29  }
  0x44   : > { %p6159_p10 = scmp.ge.s32.totalorder %s9511_s25, 4 }
  0x46   : > { %183 = sbr.rel (%p6159_p10) target bundleno = 94 (0x5e), region = 28 }
  0x4d   : > { %s187_s13 = sand.u32 1, %s9491_s20   ;;  %s6162_s14 = sshll.u32 %s9503_s23, 4 }
  0x4e   : > { %s6160_s11 = sshll.u32 %s187_s13, 8  ;;  %s6181_s5 = sshll.u32 %s9507_s24, 6 }
  0x4f   : > { %s198_s30 = sadd.s32 %s6181_s5, %s6162_s14  ;;  %s191_s17 = scalar_lea.vmem [#allocation4], %s6160_s11 }
  0x50   : > { %s213_s27 = sshll.u32 %s191_s17, 4  ;;  %s6164_s10 = sshll.u32 %s198_s30, 7  ;;  %s214_s27 = int_to_ptr.vmem [resolvable:$true] %s213_s27 }
  0x51   : > { %p12538_p3 = scmp.ne.s32.totalorder %s12527_s6, 0  ;;  %s9516_s29 = smov 4096  }
  0x52   : > { %s9517_s1 = smov 2048   ;;  %s9518_s23 = smov 16  }
  0x53   : > { %s9026_s28 = scalar_select %p12538_p3, [#allocation0], [#allocation12] }
  0x54   : > { %9027 = sst [smem:[#allocation11]] (%p12538_p3), %s9516_s29  ;;  %s9519_s14 = smov 128  }
  0x55   : > { %s205_s8 = sld [smem:[%s9026_s28]]   ;;  %s200_s5 = scalar_lea.hbm %s12293_s0, %s6164_s10 }
  0x56   : > { %9028 = sst [smem:[#allocation11 + $0x1]] (%p12538_p3), %s9517_s1  ;;  %s9520_s30 = smov 8  }
  0x57   : > { %9029 = sst [smem:[#allocation11 + $0x2]] (%p12538_p3), %s9518_s23  ;;  %s188_s24 = scalar_lea.sflag [#allocation5], %s187_s13 }
  0x58   : > { %9030 = sst [smem:[#allocation11 + $0x3]] (%p12538_p3), %s9519_s14  ;;  %s9521_s1 = smov [#allocation10]  }
  0x59   : > { %9031 = sst [smem:[#allocation11 + $0x4]] (%p12538_p3), %s9519_s14 }
  0x5a   : > { %9032 = sst [smem:[#allocation11 + $0x5]] (%p12538_p3), %s9520_s30 }
  0x5b   : > { %s6165_s28 = sshll.u32 %s205_s8, 26 }
  0x5c   : > { %s6166_s29 = sadd.s32 134217728, %s6165_s28 }
  0x5d   : > { %9033 = dma.general (%p12538_p3), %s200_s5, 4096, %s214_s27, %s188_s24, %s9521_s1, [#allocation11], %s6166_s29, 0  }
  0x5e PF: > { %p12539_p6 = scmp.ne.s32.totalorder %s12535_s26, 0 }
  0x60   : > { %238 = sbr.rel (%p12539_p6) target bundleno = 2257 (0x8d1), region = 36 }
  0x67   : > { %s240_s23 = sand.u32 1, %s9487_s19   ;;  %p12540_p7 = scmp.ne.s32.totalorder %s12530_s9, 0 }
  0x68   : > { %s6168_s17 = sshll.u32 %s240_s23, 8  ;;  %s241_s10 = scalar_lea.sflag [#allocation5], %s240_s23 }
  0x69   : > { %s9712_s11 = scalar_lea.vmem [#allocation4], %s6168_s17 }
  0x6a   : > { %9458 = dma.done.wait (%p12540_p7), %s241_s10, 4096  }
  0x6b   : > { %9460 = vsyncadd (%p12540_p7), %s241_s10, 4294963200  ;;  %p12541_p12 = scmp.ne.s32.totalorder %s12528_s7, 0 }
  0x6d   : > { %9462 = dma.done.wait (%p12541_p12), [#allocation8], 512  }
  0x6e   : > { %9464 = vsyncadd (%p12541_p12), [#allocation8], 4294966784  ;;  %s270_s24 = sand.u32 1, %s9475_s16   ;;  %p6171_p4 = scmp.ne.s32.totalorder %s9495_s21, 0 }
  0x6f   : > { %s6170_s6 = sshll.u32 %s270_s24, 5  ;;  %vm284_vm0 = vcmask (!%p6171_p4), 123904   ;;  %v9522_v0 = vmov (!%p6171_p4), 0.0  }
  0x70   : > { %s9725_s26 = scalar_lea.vmem [#allocation9], %s6170_s6  ;;  %279 = sbr.rel (%p6171_p4) target bundleno = 119 (0x77), region = 48  ;;  %280 = vst [vmem:[#allocation2] sm:$0xff] (!%p6171_p4), %v9522_v0  ;;  %281 = vst [vmem:[#allocation2 + $0x8] sm:$0xff] (!%p6171_p4), %v9522_v0 }
  0x71   : > { %282 = vst [vmem:[#allocation2 + $0x10] sm:$0xff] (!%p6171_p4), %v9522_v0  ;;  %283 = vst [vmem:[#allocation2 + $0x18] sm:$0xff] (!%p6171_p4), %v9522_v0 }
  0x72   : > { %285 = vst.msk [vmem:[#allocation3] sm:$0x3] (!%p6171_p4), %vm284_vm0, %v9522_v0 }
  0x77 PF: > { %v478_v1 = vld [vmem:[#allocation7] sm:$0xff]  ;;  %v479_v2 = vld [vmem:[#allocation7 + $0x8] sm:$0xff]  ;;  %v9728_v3 = vld [vmem:[#allocation7 + $0x10] sm:$0xff]  ;;  %vm2332_vm1 = vcmask 203776   ;;  %p6172_p5 = scmp.eq.s32.totalorder %s9495_s21, 1 }
  0x78   : > { %v483_v4 = vand.u32 4294901760, %v478_v1  ;;  %v486_v5 = vand.u32 4294901760, %v479_v2  ;;  %v9730_v6 = vld [vmem:[#allocation7 + $0x18] sm:$0x1]  ;;  %v12310_v7 = vand.u32 4294901760, %v9728_v3  ;;  %v9734_v8 = vld [vmem:[%s9712_s11] sm:$0xff] }
  0x79   : > { %v12309_v9 = vand.u32 4294901760, %v9730_v6  ;;  %v9738_v10 = vand.u32 4294901760, %v9734_v8  ;;  %v9741_v11 = vld [vmem:[%s9712_s11 + $0x8] sm:$0xff]  ;;  %v9744_v12 = vld [vmem:[%s9712_s11 + $0x10] sm:$0xff]  ;;  %v9747_v13 = vld [vmem:[%s9712_s11 + $0x18] sm:$0xff]  ;;  %vm4167_vm2 = vcmask (!%p6172_p5), 130048  }
  0x7a   : > { %v9749_v14 = vpack.c.bf16 %v486_v5, %v483_v4  ;;  %v9752_v15 = vand.u32 4294901760, %v9741_v11  ;;  %v9754_v16 = vsub.f32 %v478_v1, %v483_v4  ;;  %v9756_v17 = vsub.f32 %v479_v2, %v486_v5  ;;  %v9759_v18 = vld [vmem:[%s9712_s11 + $0x20] sm:$0xff]  ;;  %v9794_v28 = vld [vmem:[%s9712_s11 + $0x28] sm:$0xff]  ;;  %v9812_v34 = vld [vmem:[%s9712_s11 + $0x30] sm:$0xff] }
  0x7b   : > { %12542 = vst [vmem:[#allocation23_spill] sm:$0xff] %v9738_v10  ;;  %v9765_v19 = vpack.c.bf16 %v12309_v9, %v12310_v7  ;;  %v9769_v20 = vsub.f32 %v9734_v8, %v9738_v10  ;;  %v9772_v21 = vand.u32 4294901760, %v9744_v12  ;;  %v9775_v22 = vand.u32 4294901760, %v9747_v13  ;;  %v9821_v39 = vld [vmem:[%s9712_s11 + $0x38] sm:$0xff]  ;;  %v9836_v46 = vld [vmem:[%s9712_s11 + $0x40] sm:$0xff]  ;;  %v9843_v48 = vld [vmem:[%s9712_s11 + $0x48] sm:$0xff] }
  0x7c   : > { %12543 = vst [vmem:[#allocation24_spill] sm:$0xff] %v9752_v15  ;;  %8009 = vmatprep.subr.bf16.mxu1 %v9749_v14  ;;  %8033 = vmatprep.subr.bf16.mxu0 %v9749_v14  ;;  %v9781_v23 = vsub.f32 %v9741_v11, %v9752_v15  ;;  %v874_v24 = vand.u32 4294901760, %v9754_v16  ;;  %v881_v25 = vand.u32 4294901760, %v9756_v17  ;;  %v9791_v27 = vand.u32 4294901760, %v9759_v18  ;;  %v9867_v55 = vld [vmem:[%s9712_s11 + $0x50] sm:$0xff]  ;;  %v9879_v59 = vld [vmem:[%s9712_s11 + $0x58] sm:$0xff] }
  0x7d   : > { %12544 = vst [vmem:[#allocation25_spill] sm:$0xff] %v9769_v20  ;;  %12545 = vst [vmem:[#allocation26_spill] sm:$0xff] %v9772_v21  ;;  %8011 = vmatpush3.bf16.xpose.msra.mxu1 %v9749_v14  ;;  %8035 = vmatpush3.bf16.xpose.msra.mxu0 %v9749_v14  ;;  %v9788_v26 = vand.u32 4294901760, %v9769_v20  ;;  %v9802_v31 = vsub.f32 %v9744_v12, %v9772_v21  ;;  %v9809_v33 = vsub.f32 %v9747_v13, %v9775_v22  ;;  %v9901_v4 = vld [vmem:[%s9712_s11 + $0x60] sm:$0xff]  ;;  %v9939_v7 = vld [vmem:[%s9712_s11 + $0x70] sm:$0xff]  ;;  %vm4244_vm3 = vcmask (!%p6172_p5), 1041409  }
  0x7e   : > { %12546 = vst [vmem:[#allocation27_spill] sm:$0xff] %v9775_v22  ;;  %12547 = vst [vmem:[#allocation28_spill] sm:$0xff] %v9781_v23  ;;  %8013 = vmatprep.subr.bf16.mxu1 %v9765_v19  ;;  %8037 = vmatprep.subr.bf16.mxu0 %v9765_v19  ;;  %v875_v29 = vsub.f32 %v9754_v16, %v874_v24  ;;  %v882_v30 = vsub.f32 %v9756_v17, %v881_v25  ;;  %v9815_v35 = vand.u32 4294901760, %v9781_v23  ;;  %vm4248_vm4 = vcmask (!%p6172_p5), 123904  }
  0x7f   : > { %12548 = vst [vmem:[#allocation29_spill] sm:$0xff] %v9788_v26  ;;  %12549 = vst [vmem:[#allocation30_spill] sm:$0xff] %v9791_v27  ;;  %v554_v32 = vsub.f32 %v9769_v20, %v9788_v26  ;;  %7008 = vmatprep.mubr.f32.mxu0 %v9788_v26  ;;  %v9818_v38 = vand.u32 4294901760, %v9794_v28  ;;  %v9827_v41 = vsub.f32 %v9759_v18, %v9791_v27  ;;  %v9830_v44 = vand.u32 4294901760, %v9802_v31  ;;  %v10021_v20 = vld [vmem:[%s9712_s11 + $0x88] sm:$0xff] }
  0x80   : > { %12550 = vst [vmem:[#allocation31_spill] sm:$0xff] %v9802_v31  ;;  %12551 = vst [vmem:[#allocation32_spill] sm:$0xff] %v9809_v33  ;;  %v876_v36 = vand.u32 4294901760, %v875_v29  ;;  %v883_v37 = vand.u32 4294901760, %v882_v30  ;;  %v8040_v43 = vpack.c.bf16 %v881_v25, %v874_v24  ;;  %v9833_v45 = vand.u32 4294901760, %v9812_v34  ;;  %v9916_v30 = vld [vmem:[%s9712_s11 + $0x68] sm:$0xff] }
  0x81   : > { %12552 = vst [vmem:[#allocation33_spill] sm:$0xff] %v9815_v35  ;;  %12553 = vst [vmem:[#allocation34_spill] sm:$0xff] %v9818_v38  ;;  %v9823_v40 = vand.u32 4294901760, %v554_v32  ;;  %v9840_v47 = vand.u32 4294901760, %v9821_v39  ;;  %v564_v49 = vsub.f32 %v9781_v23, %v9815_v35  ;;  %v9848_v50 = vand.u32 4294901760, %v9809_v33 }
  0x82   : > { %12555 = vst [vmem:[#allocation36_spill] sm:$0xff] %v9827_v41  ;;  %v8016_v42 = vpack.c.bf16 %v883_v37, %v876_v36  ;;  %12556 = vst [vmem:[#allocation37_spill] sm:$0xff] %v9830_v44  ;;  %v9852_v51 = vsub.f32 %v9794_v28, %v9818_v38  ;;  %v9857_v52 = vand.u32 4294901760, %v9827_v41  ;;  %v9861_v53 = vsub.f32 %v9812_v34, %v9833_v45 }
  0x83   : > { %12554 = vst [vmem:[#allocation35_spill] sm:$0xff] %v9823_v40  ;;  %12557 = vst [vmem:[#allocation38_spill] sm:$0xff] %v9833_v45  ;;  %6840 = vmatprep.mubr.f32.mxu1 %v9823_v40  ;;  %v9864_v54 = vand.u32 4294901760, %v9836_v46  ;;  %v574_v56 = vsub.f32 %v9802_v31, %v9830_v44  ;;  %v9872_v57 = vand.u32 4294901760, %v9843_v48  ;;  %v9876_v58 = vsub.f32 %v9821_v39, %v9840_v47 }
  0x84   : > { %12558 = vst [vmem:[#allocation39_spill] sm:$0xff] %v9840_v47  ;;  %12559 = vst [vmem:[#allocation40_spill] sm:$0xff] %v9848_v50  ;;  %v9881_v60 = vand.u32 4294901760, %v564_v49  ;;  %v584_v61 = vsub.f32 %v9809_v33, %v9848_v50  ;;  %v9886_v62 = vand.u32 4294901760, %v9852_v51  ;;  %v9889_v63 = vand.u32 4294901760, %v9867_v55 }
  0x85   : > { %12560 = vst [vmem:[#allocation41_spill] sm:$0xff] %v9852_v51  ;;  %8015 = vmatpush3.bf16.xpose.msra.mxu1 %v9765_v19  ;;  %8039 = vmatpush3.bf16.xpose.msra.mxu0 %v9765_v19  ;;  %12561 = vst [vmem:[#allocation42_spill] sm:$0xff] %v9857_v52  ;;  %v594_v0 = vsub.f32 %v9827_v41, %v9857_v52  ;;  %v9894_v1 = vand.u32 4294901760, %v9861_v53  ;;  %v9898_v2 = vsub.f32 %v9836_v46, %v9864_v54 }
  0x86   : > { %12562 = vst [vmem:[#allocation43_spill] sm:$0xff] %v9861_v53  ;;  %12563 = vst [vmem:[#allocation44_spill] sm:$0xff] %v9864_v54  ;;  %8017 = vmatprep.subr.bf16.mxu1 %v8016_v42  ;;  %8041 = vmatprep.subr.bf16.mxu0 %v8040_v43  ;;  %v9903_v5 = vand.u32 4294901760, %v574_v56  ;;  %v9907_v24 = vsub.f32 %v9843_v48, %v9872_v57  ;;  %v9910_v25 = vand.u32 4294901760, %v9879_v59  ;;  %v9913_v29 = vand.u32 4294901760, %v9876_v58 }
  0x87   : > { %12564 = vst [vmem:[#allocation45_spill] sm:$0xff] %v9872_v57  ;;  %12565 = vst [vmem:[#allocation46_spill] sm:$0xff] %v9876_v58  ;;  %v9920_v32 = vand.u32 4294901760, %v584_v61  ;;  %v604_v36 = vsub.f32 %v9852_v51, %v9886_v62  ;;  %v9926_v37 = vsub.f32 %v9867_v55, %v9889_v63  ;;  %v9929_v49 = vand.u32 4294901760, %v9901_v4 }
  0x88   : > { %12566 = vst [vmem:[#allocation47_spill] sm:$0xff] %v9881_v60  ;;  %12567 = vst [vmem:[#allocation48_spill] sm:$0xff] %v9886_v62  ;;  %v9931_v56 = vand.u32 4294901760, %v594_v0  ;;  %v614_v9 = vsub.f32 %v9861_v53, %v9894_v1  ;;  %v9936_v61 = vand.u32 4294901760, %v9898_v2  ;;  %v624_v0 = vsub.f32 %v9876_v58, %v9913_v29 }
  0x89   : > { %12568 = vst [vmem:[#allocation49_spill] sm:$0xff] %v9889_v63  ;;  %12569 = vst [vmem:[#allocation50_spill] sm:$0xff] %v9894_v1  ;;  %v12583_v26 = vand.u32 4294901760, %v9728_v3  ;;  %v9967_v40 = vand.u32 4294901760, %v604_v36  ;;  %v9970_v53 = vand.u32 4294901760, %v9926_v37  ;;  %v9974_v58 = vsub.f32 %v9901_v4, %v9929_v49 }
  0x8a   : > { %12570 = vst [vmem:[#allocation51_spill] sm:$0xff] %v9898_v2  ;;  %12571 = vst [vmem:[#allocation52_spill] sm:$0xff] %v9903_v5 }
  0x8b   : > { %12572 = vst [vmem:[#allocation53_spill] sm:$0xff] %v9907_v24  ;;  %12573 = vst [vmem:[#allocation54_spill] sm:$0xff] %v9910_v25  ;;  %v10011_v31 = vand.u32 4294901760, %v9974_v58 }
  0x8c   : > { %12574 = vst [vmem:[#allocation55_spill] sm:$0xff] %v9913_v29  ;;  %6841 = vmatmul.mubr.f32.vlgmr.msra.gmra.mrb[0].mxu1 %v9881_v60  ;;  %7009 = vmatmul.mubr.f32.vlgmr.msra.gmra.mrb[0].mxu0 %v9815_v35  ;;  %12575 = vst [vmem:[#allocation56_spill] sm:$0xff] %v9920_v32  ;;  %v9944_v35 = vand.u32 4294901760, %v9907_v24 }
  0x8d   : > { %12576 = vst [vmem:[#allocation57_spill] sm:$0xff] %v9926_v37  ;;  %12577 = vst [vmem:[#allocation58_spill] sm:$0xff] %v9929_v49  ;;  %8019 = vmatpush3.bf16.xpose.msra.mxu1 %v8016_v42  ;;  %8043 = vmatpush3.bf16.xpose.msra.mxu0 %v8040_v43  ;;  %v9948_v42 = vsub.f32 %v9879_v59, %v9910_v25  ;;  %v9951_v43 = vand.u32 4294901760, %v9916_v30 }
  0x8e   : > { %12578 = vst [vmem:[#allocation59_spill] sm:$0xff] %v9931_v56  ;;  %12579 = vst [vmem:[#allocation60_spill] sm:$0xff] %v9936_v61  ;;  %6843 = vmatprep.mubr.f32.mxu1 %v9903_v5  ;;  %7011 = vmatprep.mubr.f32.mxu0 %v9830_v44  ;;  %v9958_v5 = vsub.f32 %v9728_v3, %v12583_v26  ;;  %v12584_v44 = vand.u32 4294901760, %v9730_v6  ;;  %v9977_v3 = vand.u32 4294901760, %v9939_v7 }
  0x8f   : > { %12580 = vst [vmem:[#allocation61_spill] sm:$0xff] %v9944_v35  ;;  %12581 = vst [vmem:[#allocation62_spill] sm:$0xff] %v9948_v42  ;;  %v634_v26 = vsub.f32 %v9898_v2, %v9936_v61  ;;  %v9993_v51 = vand.u32 4294901760, %v9948_v42 }
  0x90   : > { %12582 = vst [vmem:[#allocation63_spill] sm:$0xff] %v9951_v43  ;;  %v9963_v60 = vsub.f32 %v9730_v6, %v12584_v44  ;;  %6844 = vmatmul.mubr.f32.gmra.mrb[2].mxu1 %v9920_v32  ;;  %7012 = vmatmul.mubr.f32.gmra.mrb[2].mxu0 %v9848_v50  ;;  %12585 = vst [vmem:[#allocation64_spill] sm:$0xff] %v9967_v40  ;;  %v9981_v6 = vand.u32 4294901760, %v614_v9  ;;  %v9986_v44 = vld [vmem:[%s9712_s11 + $0x78] sm:$0xff]  ;;  %v888_v36 = vand.u32 4294901760, %v9958_v5 }
  0x91   : > { %12586 = vst [vmem:[#allocation65_spill] sm:$0xff] %v9970_v53  ;;  %12587 = vst [vmem:[#allocation66_spill] sm:$0xff] %v9974_v58  ;;  %6846 = vmatprep.mubr.f32.mxu1 %v9931_v56  ;;  %7014 = vmatprep.mubr.f32.mxu0 %v9857_v52  ;;  %v644_v32 = vsub.f32 %v9907_v24, %v9944_v35  ;;  %v9997_v9 = vsub.f32 %v9916_v30, %v9951_v43  ;;  %v10000_v52 = vld [vmem:[%s9712_s11 + $0x80] sm:$0xff]  ;;  %v10002_v56 = vand.u32 4294901760, %v624_v0 }
  0x92   : > { %12588 = vst [vmem:[#allocation67_spill] sm:$0xff] %v9977_v3  ;;  %12589 = vst [vmem:[#allocation68_spill] sm:$0xff] %v9981_v6  ;;  %v895_v50 = vand.u32 4294901760, %v9963_v60  ;;  %v889_v2 = vsub.f32 %v9958_v5, %v888_v36  ;;  %v654_v24 = vsub.f32 %v9926_v37, %v9970_v53  ;;  %v10015_v0 = vsub.f32 %v9939_v7, %v9977_v3  ;;  %v10031_v37 = vld [vmem:[%s9712_s11 + $0x90] sm:$0xff] }
  0x93   : > { %12590 = vst [vmem:[#allocation69_spill] sm:$0xff] %v9993_v51  ;;  %12591 = vst [vmem:[#allocation70_spill] sm:$0xff] %v9997_v9  ;;  %v10018_v23 = vand.u32 4294901760, %v9986_v44  ;;  %v10034_v3 = vand.u32 4294901760, %v9997_v9  ;;  %v10037_v43 = vand.u32 4294901760, %v10021_v20 }
  0x94   : > { %12592 = vst [vmem:[#allocation71_spill] sm:$0xff] %v10002_v56  ;;  %v896_v41 = vsub.f32 %v9963_v60, %v895_v50  ;;  %v8044_v33 = vpack.c.bf16 %v895_v50, %v888_v36  ;;  %6847 = vmatmul.mubr.f32.gmra.mrb[4].mxu1 %v9967_v40  ;;  %7015 = vmatmul.mubr.f32.gmra.mrb[4].mxu0 %v9886_v62  ;;  %12593 = vst [vmem:[#allocation72_spill] sm:$0xff] %v10011_v31  ;;  %v10025_v50 = vand.u32 4294901760, %v634_v26 }
  0x95   : > { %12594 = vst [vmem:[#allocation73_spill] sm:$0xff] %v10015_v0  ;;  %12595 = vst [vmem:[#allocation74_spill] sm:$0xff] %v10018_v23  ;;  %6849 = vmatprep.mubr.f32.mxu1 %v9981_v6  ;;  %7017 = vmatprep.mubr.f32.mxu0 %v9894_v1  ;;  %v10028_v36 = vand.u32 4294901760, %v10000_v52  ;;  %v890_v62 = vand.u32 4294901760, %v889_v2  ;;  %v10041_v26 = vand.u32 4294901760, %v644_v32  ;;  %v10046_v2 = vand.u32 4294901760, %v10015_v0 }
  0x96   : > { %12596 = vst [vmem:[#allocation75_spill] sm:$0xff] %v10025_v50  ;;  %v897_v40 = vand.u32 4294901760, %v896_v41  ;;  %8045 = vmatprep.subr.bf16.mxu0 %v8044_v33  ;;  %12598 = vst [vmem:[#allocation77_spill] sm:$0xff] %v10034_v3  ;;  %v664_v41 = vsub.f32 %v9948_v42, %v9993_v51  ;;  %v10050_v1 = vsub.f32 %v9986_v44, %v10018_v23  ;;  %v10063_v32 = vand.u32 4294901760, %v10031_v37 }
  0x97   : > { %12597 = vst [vmem:[#allocation76_spill] sm:$0xff] %v10028_v36  ;;  %12599 = vst [vmem:[#allocation78_spill] sm:$0xff] %v10037_v43  ;;  %8047 = vmatpush3.bf16.xpose.msra.mxu0 %v8044_v33  ;;  %v10054_v33 = vand.u32 4294901760, %v654_v24  ;;  %v684_v24 = vsub.f32 %v9997_v9, %v10034_v3 }
  0x98   : > { %v8020_v6 = vpack.c.bf16 %v897_v40, %v890_v62  ;;  %6850 = vmatmul.mubr.f32.gmra.mrb[6].mxu1 %v10002_v56  ;;  %7018 = vmatmul.mubr.f32.gmra.mrb[6].mxu0 %v9913_v29  ;;  %12600 = vst [vmem:[#allocation79_spill] sm:$0xff] %v10041_v26  ;;  %12601 = vst [vmem:[#allocation80_spill] sm:$0xff] %v10046_v2  ;;  %v674_v40 = vsub.f32 %v9974_v58, %v10011_v31  ;;  %v10066_v29 = vld [vmem:[%s9712_s11 + $0x98] sm:$0xff]  ;;  %v10069_v56 = vld [vmem:[%s9712_s11 + $0xa0] sm:$0xff]  ;;  %v10085_v42 = vand.u32 4294901760, %v10050_v1 }
  0x99   : > { %12602 = vst [vmem:[#allocation81_spill] sm:$0xff] %v10050_v1  ;;  %6852 = vmatprep.mubr.f32.mxu1 %v10025_v50  ;;  %7020 = vmatprep.mubr.f32.mxu0 %v9936_v61  ;;  %12603 = vst [vmem:[#allocation82_spill] sm:$0xff] %v10054_v33  ;;  %v10060_v62 = vsub.f32 %v10000_v52, %v10028_v36  ;;  %v10076_v61 = vsub.f32 %v10021_v20, %v10037_v43  ;;  %v10080_v50 = vand.u32 4294901760, %v664_v41  ;;  %v10108_v43 = vld [vmem:[%s9712_s11 + $0xb0] sm:$0xff] }
  0x9a   : > { %12605 = vst [vmem:[#allocation84_spill] sm:$0xff] %v10063_v32  ;;  %8021 = vmatprep.subr.bf16.mxu1 %v8020_v6  ;;  %12606 = vst [vmem:[#allocation85_spill] sm:$0xff] %v10069_v56  ;;  %8049 = vmatprep.subr.bf16.mxu0 %v9749_v14  ;;  %v694_v58 = vsub.f32 %v10015_v0, %v10046_v2  ;;  %v10088_v9 = vand.u32 4294901760, %v10066_v29  ;;  %v10099_v41 = vsub.f32 %v10031_v37, %v10063_v32  ;;  %v10105_v0 = vld [vmem:[%s9712_s11 + $0xa8] sm:$0xff] }
  0x9b   : > { %12604 = vst [vmem:[#allocation83_spill] sm:$0xff] %v10060_v62  ;;  %12607 = vst [vmem:[#allocation86_spill] sm:$0xff] %v10076_v61  ;;  %8023 = vmatpush3.bf16.xpose.msra.mxu1 %v8020_v6  ;;  %v10092_v6 = vand.u32 4294901760, %v674_v40  ;;  %v10113_v40 = vand.u32 4294901760, %v10076_v61  ;;  %v704_v32 = vsub.f32 %v10050_v1, %v10085_v42  ;;  %v10126_v23 = vand.u32 4294901760, %v10105_v0 }
  0x9c   : > { %6853 = vmatmul.mubr.f32.gmra.mrb[8].mxu1 %v10041_v26  ;;  %7021 = vmatmul.mubr.f32.gmra.mrb[8].mxu0 %v9944_v35  ;;  %12608 = vst [vmem:[#allocation87_spill] sm:$0xff] %v10080_v50  ;;  %12609 = vst [vmem:[#allocation88_spill] sm:$0xff] %v10085_v42  ;;  %v10095_v35 = vand.u32 4294901760, %v10060_v62  ;;  %v10102_v26 = vand.u32 4294901760, %v10069_v56  ;;  %v10123_v36 = vsub.f32 %v10066_v29, %v10088_v9  ;;  %v10143_v1 = vand.u32 4294901760, %v10108_v43 }
  0x9d   : > { %12610 = vst [vmem:[#allocation89_spill] sm:$0xff] %v10088_v9  ;;  %6855 = vmatprep.mubr.f32.mxu1 %v10054_v33  ;;  %7023 = vmatprep.mubr.f32.mxu0 %v9970_v53  ;;  %12611 = vst [vmem:[#allocation90_spill] sm:$0xff] %v10092_v6  ;;  %v10110_v33 = vand.u32 4294901760, %v684_v24  ;;  %v10117_v53 = vand.u32 4294901760, %v694_v58  ;;  %v10129_v24 = vld [vmem:[%s9712_s11 + $0xb8] sm:$0xff]  ;;  %v10146_v9 = vld [vmem:[%s9712_s11 + $0xc0] sm:$0xff] }
  0x9e   : > { %12612 = vst [vmem:[#allocation91_spill] sm:$0xff] %v10095_v35  ;;  %12613 = vst [vmem:[#allocation92_spill] sm:$0xff] %v10099_v41  ;;  %v714_v58 = vsub.f32 %v10060_v62, %v10095_v35  ;;  %v10155_v62 = vand.u32 4294901760, %v10129_v24 }
  0x9f   : > { %12614 = vst [vmem:[#allocation93_spill] sm:$0xff] %v10102_v26  ;;  %12615 = vst [vmem:[#allocation94_spill] sm:$0xff] %v10105_v0 }
  0xa0   : > { %12616 = vst [vmem:[#allocation95_spill] sm:$0xff] %v10108_v43  ;;  %12617 = vst [vmem:[#allocation96_spill] sm:$0xff] %v10110_v33  ;;  %6856 = vmatmul.mubr.f32.gmra.mrb[10].mxu1 %v10080_v50  ;;  %7024 = vmatmul.mubr.f32.gmra.mrb[10].mxu0 %v9993_v51  ;;  %v10136_v51 = vand.u32 4294901760, %v10099_v41  ;;  %v10140_v50 = vsub.f32 %v10069_v56, %v10102_v26  ;;  %v10159_v26 = vand.u32 4294901760, %v704_v32  ;;  %v10162_v56 = vand.u32 4294901760, %v10123_v36 }
  0xa1   : > { %12618 = vst [vmem:[#allocation97_spill] sm:$0xff] %v10113_v40  ;;  %12619 = vst [vmem:[#allocation98_spill] sm:$0xff] %v10117_v53  ;;  %6858 = vmatprep.mubr.f32.mxu1 %v10092_v6  ;;  %7026 = vmatprep.mubr.f32.mxu0 %v10011_v31  ;;  %v10150_v6 = vpack.c.bf16 %v9756_v17, %v9754_v16  ;;  %v724_v31 = vsub.f32 %v10076_v61, %v10113_v40  ;;  %v10169_v17 = vand.u32 4294901760, %v10146_v9  ;;  %v10172_v61 = vld [vmem:[%s9712_s11 + $0xc8] sm:$0xff] }
  0xa2   : > { %12620 = vst [vmem:[#allocation99_spill] sm:$0xff] %v10123_v36  ;;  %12621 = vst [vmem:[#allocation100_spill] sm:$0xff] %v10126_v23  ;;  %v10166_v16 = vsub.f32 %v10105_v0, %v10126_v23  ;;  %v734_v32 = vsub.f32 %v10099_v41, %v10136_v51  ;;  %v10185_v23 = vsub.f32 %v10108_v43, %v10143_v1  ;;  %v10188_v0 = vld [vmem:[%s9712_s11 + $0xd0] sm:$0xff] }
  0xa3   : > { %12622 = vst [vmem:[#allocation101_spill] sm:$0xff] %v10129_v24  ;;  %12623 = vst [vmem:[#allocation102_spill] sm:$0xff] %v10136_v51  ;;  %8025 = vmatprep.subr.bf16.mxu1 %v10150_v6  ;;  %v744_v41 = vsub.f32 %v10123_v36, %v10162_v56  ;;  %v10209_v43 = vsub.f32 %v10146_v9, %v10169_v17  ;;  %v10224_v36 = vld [vmem:[%s9712_s11 + $0xd8] sm:$0xff] }
  0xa4   : > { %12624 = vst [vmem:[#allocation103_spill] sm:$0xff] %v10140_v50  ;;  %12625 = vst [vmem:[#allocation104_spill] sm:$0xff] %v10143_v1  ;;  %6859 = vmatmul.mubr.f32.gmra.mrb[12].mxu1 %v10110_v33  ;;  %7027 = vmatmul.mubr.f32.gmra.mrb[12].mxu0 %v10034_v3  ;;  %v10176_v33 = vand.u32 4294901760, %v714_v58  ;;  %v10181_v3 = vand.u32 4294901760, %v10140_v50  ;;  %v10193_v58 = vsub.f32 %v10129_v24, %v10155_v62  ;;  %v10205_v1 = vand.u32 4294901760, %v10166_v16 }
  0xa5   : > { %12626 = vst [vmem:[#allocation105_spill] sm:$0xff] %v10146_v9  ;;  %12627 = vst [vmem:[#allocation106_spill] sm:$0xff] %v10155_v62  ;;  %6861 = vmatprep.mubr.f32.mxu1 %v10117_v53  ;;  %7029 = vmatprep.mubr.f32.mxu0 %v10046_v2  ;;  %v10196_v2 = vand.u32 4294901760, %v10172_v61  ;;  %v10200_v53 = vand.u32 4294901760, %v724_v31  ;;  %v10213_v62 = vand.u32 4294901760, %v734_v32  ;;  %v10243_v9 = vand.u32 4294901760, %v10209_v43 }
  0xa6   : > { %12628 = vst [vmem:[#allocation107_spill] sm:$0xff] %v10159_v26  ;;  %12629 = vst [vmem:[#allocation108_spill] sm:$0xff] %v10162_v56  ;;  %v754_v31 = vsub.f32 %v10140_v50, %v10181_v3  ;;  %v764_v50 = vsub.f32 %v10166_v16, %v10205_v1  ;;  %v10246_v24 = vand.u32 4294901760, %v10224_v36 }
  0xa7   : > { %12630 = vst [vmem:[#allocation109_spill] sm:$0xff] %v10166_v16  ;;  %12631 = vst [vmem:[#allocation110_spill] sm:$0xff] %v10169_v17  ;;  %v10227_v17 = vld [vmem:[%s9712_s11 + $0xe0] sm:$0xff]  ;;  %v10234_v32 = vsub.f32 %v10172_v61, %v10196_v2  ;;  %v10262_v16 = vld [vmem:[%s9712_s11 + $0xe8] sm:$0xff] }
  0xa8   : > { %12632 = vst [vmem:[#allocation111_spill] sm:$0xff] %v10172_v61  ;;  %12633 = vst [vmem:[#allocation112_spill] sm:$0xff] %v10176_v33  ;;  %6862 = vmatmul.mubr.f32.gmra.mrb[14].mxu1 %v10159_v26  ;;  %7030 = vmatmul.mubr.f32.gmra.mrb[14].mxu0 %v10085_v42  ;;  %v10218_v42 = vand.u32 4294901760, %v10185_v23  ;;  %v10221_v26 = vand.u32 4294901760, %v10188_v0  ;;  %v10265_v61 = vld [vmem:[%s9712_s11 + $0xf0] sm:$0xff] }
  0xa9   : > { %12634 = vst [vmem:[#allocation113_spill] sm:$0xff] %v10181_v3  ;;  %12635 = vst [vmem:[#allocation114_spill] sm:$0xff] %v10185_v23  ;;  %6864 = vmatprep.mubr.f32.mxu1 %v10176_v33  ;;  %7032 = vmatprep.mubr.f32.mxu0 %v10095_v35  ;;  %v10230_v33 = vand.u32 4294901760, %v10193_v58  ;;  %v10238_v35 = vand.u32 4294901760, %v744_v41 }
  0xaa   : > { %12636 = vst [vmem:[#allocation115_spill] sm:$0xff] %v10188_v0  ;;  %12637 = vst [vmem:[#allocation116_spill] sm:$0xff] %v10193_v58  ;;  %v10256_v41 = vsub.f32 %v10188_v0, %v10221_v26  ;;  %v10283_v0 = vand.u32 4294901760, %v10262_v16 }
  0xab   : > { %12638 = vst [vmem:[#allocation117_spill] sm:$0xff] %v10196_v2  ;;  %12639 = vst [vmem:[#allocation118_spill] sm:$0xff] %v10200_v53  ;;  %v10250_v2 = vand.u32 4294901760, %v754_v31  ;;  %v10270_v31 = vand.u32 4294901760, %v10234_v32 }
  0xac   : > { %12640 = vst [vmem:[#allocation119_spill] sm:$0xff] %v10205_v1  ;;  %12641 = vst [vmem:[#allocation120_spill] sm:$0xff] %v10209_v43  ;;  %6865 = vmatmul.mubr.f32.gmra.mrb[16].mxu1 %v10200_v53  ;;  %7033 = vmatmul.mubr.f32.gmra.mrb[16].mxu0 %v10113_v40  ;;  %v774_v40 = vsub.f32 %v10185_v23, %v10218_v42  ;;  %v10259_v53 = vand.u32 4294901760, %v10227_v17  ;;  %v794_v23 = vsub.f32 %v10209_v43, %v10243_v9  ;;  %v10300_v43 = vld [vmem:[%s9712_s11 + $0xf8] sm:$0xff] }
  0xad   : > { %12642 = vst [vmem:[#allocation121_spill] sm:$0xff] %v10213_v62  ;;  %12643 = vst [vmem:[#allocation122_spill] sm:$0xff] %v10218_v42  ;;  %6867 = vmatprep.mubr.f32.mxu1 %v10213_v62  ;;  %7035 = vmatprep.mubr.f32.mxu0 %v10136_v51  ;;  %v784_v51 = vsub.f32 %v10193_v58, %v10230_v33  ;;  %v10274_v62 = vand.u32 4294901760, %v764_v50 }
  0xae   : > { %12644 = vst [vmem:[#allocation123_spill] sm:$0xff] %v10221_v26  ;;  %12645 = vst [vmem:[#allocation124_spill] sm:$0xff] %v10230_v33  ;;  %v10280_v26 = vsub.f32 %v10224_v36, %v10246_v24  ;;  %v10287_v58 = vand.u32 4294901760, %v774_v40  ;;  %v10294_v50 = vsub.f32 %v10227_v17, %v10259_v53 }
  0xaf   : > { %12646 = vst [vmem:[#allocation125_spill] sm:$0xff] %v10234_v32  ;;  %12647 = vst [vmem:[#allocation126_spill] sm:$0xff] %v10238_v35  ;;  %v10306_v40 = vand.u32 4294901760, %v784_v51 }
  0xb0   : > { %12648 = vst [vmem:[#allocation127_spill] sm:$0xff] %v10243_v9  ;;  %12649 = vst [vmem:[#allocation128_spill] sm:$0xff] %v10246_v24  ;;  %6868 = vmatmul.mubr.f32.gmra.mrb[18].mxu1 %v10238_v35  ;;  %7036 = vmatmul.mubr.f32.gmra.mrb[18].mxu0 %v10162_v56  ;;  %v10290_v56 = vand.u32 4294901760, %v10256_v41  ;;  %v10297_v35 = vand.u32 4294901760, %v10265_v61  ;;  %v804_v24 = vsub.f32 %v10234_v32, %v10270_v31  ;;  %v10320_v32 = vand.u32 4294901760, %v794_v23 }
  0xb1   : > { %12650 = vst [vmem:[#allocation129_spill] sm:$0xff] %v10250_v2  ;;  %12651 = vst [vmem:[#allocation130_spill] sm:$0xff] %v10256_v41  ;;  %6870 = vmatprep.mubr.f32.mxu1 %v10250_v2  ;;  %7038 = vmatprep.mubr.f32.mxu0 %v10181_v3  ;;  %v10309_v3 = vand.u32 4294901760, %v10280_v26  ;;  %v10313_v2 = vsub.f32 %v10262_v16, %v10283_v0 }
  0xb2   : > { %12652 = vst [vmem:[#allocation131_spill] sm:$0xff] %v10259_v53  ;;  %12653 = vst [vmem:[#allocation132_spill] sm:$0xff] %v10270_v31  ;;  %v10316_v53 = vand.u32 4294901760, %v10300_v43  ;;  %v814_v51 = vsub.f32 %v10256_v41, %v10290_v56 }
  0xb3   : > { %12654 = vst [vmem:[#allocation133_spill] sm:$0xff] %v10274_v62  ;;  %12655 = vst [vmem:[#allocation134_spill] sm:$0xff] %v10280_v26  ;;  %v824_v23 = vsub.f32 %v10280_v26, %v10309_v3 }
  0xb4   : > { %12656 = vst [vmem:[#allocation135_spill] sm:$0xff] %v10283_v0  ;;  %12657 = vst [vmem:[#allocation136_spill] sm:$0xff] %v10287_v58  ;;  %6871 = vmatmul.mubr.f32.gmra.mrb[20].mxu1 %v10274_v62  ;;  %7039 = vmatmul.mubr.f32.gmra.mrb[20].mxu0 %v10205_v1  ;;  %v10325_v1 = vand.u32 4294901760, %v10294_v50  ;;  %v10329_v62 = vsub.f32 %v10265_v61, %v10297_v35  ;;  %v10333_v0 = vand.u32 4294901760, %v804_v24  ;;  %v10346_v41 = vand.u32 4294901760, %v814_v51 }
  0xb5   : > { %12658 = vst [vmem:[#allocation137_spill] sm:$0xff] %v10290_v56  ;;  %12659 = vst [vmem:[#allocation138_spill] sm:$0xff] %v10294_v50  ;;  %6873 = vmatprep.mubr.f32.mxu1 %v10287_v58  ;;  %7041 = vmatprep.mubr.f32.mxu0 %v10218_v42  ;;  %v10338_v42 = vand.u32 4294901760, %v10313_v2  ;;  %v10342_v58 = vsub.f32 %v10300_v43, %v10316_v53 }
  0xb6   : > { %12660 = vst [vmem:[#allocation139_spill] sm:$0xff] %v10297_v35  ;;  %12661 = vst [vmem:[#allocation140_spill] sm:$0xff] %v10306_v40  ;;  %v834_v24 = vsub.f32 %v10294_v50, %v10325_v1 }
  0xb7   : > { %12662 = vst [vmem:[#allocation141_spill] sm:$0xff] %v10309_v3  ;;  %12663 = vst [vmem:[#allocation142_spill] sm:$0xff] %v10313_v2  ;;  %v844_v26 = vsub.f32 %v10313_v2, %v10338_v42 }
  0xb8   : > { %12664 = vst [vmem:[#allocation143_spill] sm:$0xff] %v10316_v53  ;;  %12665 = vst [vmem:[#allocation144_spill] sm:$0xff] %v10320_v32  ;;  %6874 = vmatmul.mubr.f32.gmra.mrb[22].mxu1 %v10306_v40  ;;  %7042 = vmatmul.mubr.f32.gmra.mrb[22].mxu0 %v10230_v33  ;;  %v10351_v33 = vand.u32 4294901760, %v10329_v62  ;;  %v10355_v40 = vand.u32 4294901760, %v824_v23  ;;  %v10364_v51 = vand.u32 4294901760, %v834_v24  ;;  %v318_v24 = vmul.f32 %v9734_v8, %v9734_v8 }
  0xb9   : > { %12666 = vst [vmem:[#allocation145_spill] sm:$0xff] %v10325_v1  ;;  %12667 = vst [vmem:[#allocation146_spill] sm:$0xff] %v10329_v62  ;;  %6876 = vmatprep.mubr.f32.mxu1 %v10320_v32  ;;  %7044 = vmatprep.mubr.f32.mxu0 %v10243_v9  ;;  %v10360_v32 = vand.u32 4294901760, %v10342_v58  ;;  %v10370_v23 = vand.u32 4294901760, %v844_v26  ;;  %v320_v26 = vmul.f32 %v9744_v12, %v9744_v12 }
  0xba   : > { %12668 = vst [vmem:[#allocation147_spill] sm:$0xff] %v10333_v0  ;;  %12669 = vst [vmem:[#allocation148_spill] sm:$0xff] %v10338_v42  ;;  %v854_v9 = vsub.f32 %v10329_v62, %v10351_v33  ;;  %350 = vadd.xlane.f32.xlu0 %v318_v24  ;;  %v321_v8 = vmul.f32 %v9747_v13, %v9747_v13  ;;  %v323_v12 = vmul.f32 %v9794_v28, %v9794_v28  ;;  %v12684_v24 = vld [vmem:[#allocation78_spill] sm:$0xff] }
  0xbb   : > { %12670 = vst [vmem:[#allocation149_spill] sm:$0xff] %v10342_v58  ;;  %12671 = vst [vmem:[#allocation150_spill] sm:$0xff] %v10346_v41  ;;  %354 = vadd.xlane.f32.xlu1 %v320_v26  ;;  %v324_v13 = vmul.f32 %v9812_v34, %v9812_v34  ;;  %v327_v28 = vmul.f32 %v9843_v48, %v9843_v48  ;;  %v328_v34 = vmul.f32 %v9867_v55, %v9867_v55  ;;  %v12686_v26 = vld [vmem:[#allocation94_spill] sm:$0xff] }
  0xbc   : > { %12672 = vst [vmem:[#allocation151_spill] sm:$0xff] %v10351_v33  ;;  %6877 = vmatmul.mubr.f32.gmra.mrb[24].mxu1 %v10333_v0  ;;  %7045 = vmatmul.mubr.f32.gmra.mrb[24].mxu0 %v10270_v31  ;;  %12673 = vst [vmem:[#allocation152_spill] sm:$0xff] %v10355_v40  ;;  %v864_v31 = vsub.f32 %v10342_v58, %v10360_v32  ;;  %v332_v48 = vmul.f32 %v9939_v7, %v9939_v7  ;;  %v12680_v7 = vld [vmem:[#allocation67_spill] sm:$0xff] }
  0xbd   : > { %12674 = vst [vmem:[#allocation153_spill] sm:$0xff] %v10360_v32  ;;  %6879 = vmatprep.mubr.f32.mxu1 %v10346_v41  ;;  %7047 = vmatprep.mubr.f32.mxu0 %v10290_v56  ;;  %12675 = vst [vmem:[#allocation154_spill] sm:$0xff] %v10364_v51  ;;  %v10376_v41 = vand.u32 4294901760, %v854_v9  ;;  %v319_v9 = vmul.f32 %v9741_v11, %v9741_v11  ;;  %v8028_v11 = vpack.c.bf16 %v9963_v60, %v9958_v5  ;;  %v12679_v60 = vld [vmem:[#allocation63_spill] sm:$0xff] }
  0xbe   : > { %12676 = vst [vmem:[#allocation155_spill] sm:$0xff] %v10370_v23  ;;  %v333_v55 = vmul.f32 %v9986_v44, %v9986_v44  ;;  %v336_v5 = vmul.f32 %v10031_v37, %v10031_v37  ;;  %v337_v44 = vmul.f32 %v10066_v29, %v10066_v29  ;;  %v12685_v37 = vld [vmem:[#allocation84_spill] sm:$0xff] }
  0xbf   : > { %12677 = vst [vmem:[#allocation156_spill] sm:$0xff] %v10376_v41  ;;  %352 = vadd.xlane.f32.xlu0 %v319_v9  ;;  %356 = vadd.xlane.f32.xlu1 %v321_v8  ;;  %v339_v9 = vmul.f32 %v12686_v26, %v12686_v26  ;;  %v12687_v8 = vld [vmem:[#allocation95_spill] sm:$0xff]  ;;  %v12700_v26 = vld [vmem:[#allocation128_spill] sm:$0xff] }
  0xc0   : > { %6880 = vmatmul.mubr.f32.gmra.mrb[26].mxu1 %v10355_v40  ;;  %7048 = vmatmul.mubr.f32.gmra.mrb[26].mxu0 %v10309_v3  ;;  %v10382_v3 = vand.u32 4294901760, %v864_v31  ;;  %v322_v31 = vmul.f32 %v9759_v18, %v9759_v18  ;;  %v326_v18 = vmul.f32 %v9836_v46, %v9836_v46  ;;  %v331_v46 = vmul.f32 %v9916_v30, %v9916_v30  ;;  %v12681_v30 = vld [vmem:[#allocation74_spill] sm:$0xff] }
  0xc1   : > { %6882 = vmatprep.mubr.f32.mxu1 %v10364_v51  ;;  %7050 = vmatprep.mubr.f32.mxu0 %v10325_v1  ;;  %v340_v29 = vmul.f32 %v12687_v8, %v12687_v8  ;;  %v12702_v8 = vld [vmem:[#allocation135_spill] sm:$0xff] }
  0xc2   : > { %12678 = vst [vmem:[#allocation157_spill] sm:$0xff] %v10382_v3 }
  0xc3   : > { %358 = vadd.xlane.f32.xlu0 %v322_v31  ;;  %360 = vadd.xlane.f32.xlu1 %v323_v12  ;;  %v12688_v31 = vld [vmem:[#allocation89_spill] sm:$0xff] }
  0xc4   : > { %6883 = vmatmul.mubr.f32.gmra.mrb[28].mxu1 %v10370_v23  ;;  %7051 = vmatmul.mubr.f32.gmra.mrb[28].mxu0 %v10338_v42  ;;  %v12690_v12 = vld [vmem:[#allocation101_spill] sm:$0xff] }
  0xc5   : > { %6885 = vmatprep.mubr.f32.mxu1 %v10376_v41  ;;  %7053 = vmatprep.mubr.f32.mxu0 %v10351_v33 }
  0xc7   : > { %362 = vadd.xlane.f32.xlu0 %v324_v13  ;;  %v341_v13 = vmul.f32 %v12690_v12, %v12690_v12  ;;  %v12707_v12 = vld [vmem:[#allocation36_spill] sm:$0xff] }
  0xc8   : > { %6886 = vmatmul.mubr.f32.gmra.mrb[30].mxu1 %v10382_v3  ;;  %7054 = vmatmul.mubr.f32.gmra.mrb[30].mxu0 %v10360_v32 }
  0xc9   : > { %6896 = vmatprep.mubr.f32.mxu1 %v9738_v10  ;;  %7064 = vmatprep.mubr.f32.mxu0 %v9738_v10 }
  0xcb   : > { %366 = vadd.xlane.f32.xlu0 %v326_v18 }
  0xcc   : > { %6897 = vmatmul.mubr.f32.vlgmr.msra.gmra.mrb[0].mxu1 %v9752_v15  ;;  %7065 = vmatmul.mubr.f32.vlgmr.msra.gmra.mrb[0].mxu0 %v9752_v15 }
  0xcd   : > { %8027 = vmatpush3.bf16.xpose.msra.mxu1 %v10150_v6  ;;  %8051 = vmatpush3.bf16.xpose.msra.mxu0 %v9749_v14  ;;  %v325_v14 = vmul.f32 %v9821_v39, %v9821_v39  ;;  %v330_v39 = vmul.f32 %v9901_v4, %v9901_v4  ;;  %v335_v4 = vmul.f32 %v10021_v20, %v10021_v20  ;;  %v12683_v6 = vld [vmem:[#allocation85_spill] sm:$0xff] }
  0xce   : > { %6899 = vmatprep.mubr.f32.mxu1 %v9772_v21  ;;  %7067 = vmatprep.mubr.f32.mxu0 %v9772_v21  ;;  %v338_v20 = vmul.f32 %v12683_v6, %v12683_v6  ;;  %v12699_v6 = vld [vmem:[#allocation123_spill] sm:$0xff] }
  0xcf   : > { %8029 = vmatprep.subr.bf16.mxu1 %v8028_v11  ;;  %8053 = vmatprep.subr.bf16.mxu0 %v9765_v19 }
  0xd0   : > { %6900 = vmatmul.mubr.f32.gmra.mrb[2].mxu1 %v9775_v22  ;;  %7068 = vmatmul.mubr.f32.gmra.mrb[2].mxu0 %v9775_v22 }
  0xd1   : > { %6902 = vmatprep.mubr.f32.mxu1 %v9791_v27  ;;  %7070 = vmatprep.mubr.f32.mxu0 %v9791_v27 }
  0xd2   : > { %364 = vadd.xlane.f32.xlu1 %v325_v14  ;;  %370 = vadd.xlane.f32.xlu0 %v328_v34  ;;  %v12691_v14 = vld [vmem:[#allocation105_spill] sm:$0xff]  ;;  %v12693_v34 = vld [vmem:[#allocation104_spill] sm:$0xff] }
  0xd3   : > { %v342_v18 = vmul.f32 %v12691_v14, %v12691_v14  ;;  %v12709_v14 = vld [vmem:[#allocation43_spill] sm:$0xff] }
  0xd4   : > { %6903 = vmatmul.mubr.f32.gmra.mrb[4].mxu1 %v9818_v38  ;;  %7071 = vmatmul.mubr.f32.gmra.mrb[4].mxu0 %v9818_v38 }
  0xd5   : > { %6905 = vmatprep.mubr.f32.mxu1 %v9833_v45  ;;  %7073 = vmatprep.mubr.f32.mxu0 %v9833_v45 }
  0xd6   : > { %8031 = vmatpush3.bf16.xpose.msra.mxu1 %v8028_v11  ;;  %8055 = vmatpush3.bf16.xpose.msra.mxu0 %v9765_v19  ;;  %v329_v19 = vmul.f32 %v9879_v59, %v9879_v59  ;;  %v334_v59 = vmul.f32 %v10000_v52, %v10000_v52  ;;  %v12682_v52 = vld [vmem:[#allocation76_spill] sm:$0xff]  ;;  %v12689_v11 = vld [vmem:[#allocation93_spill] sm:$0xff] }
  0xd7   : > { %368 = vadd.xlane.f32.xlu1 %v327_v28  ;;  %374 = vadd.xlane.f32.xlu0 %v330_v39  ;;  %v12692_v28 = vld [vmem:[#allocation100_spill] sm:$0xff] }
  0xd8   : > { %6906 = vmatmul.mubr.f32.gmra.mrb[6].mxu1 %v9840_v47  ;;  %7074 = vmatmul.mubr.f32.gmra.mrb[6].mxu0 %v9840_v47 }
  0xd9   : > { %6908 = vmatprep.mubr.f32.mxu1 %v9864_v54  ;;  %7076 = vmatprep.mubr.f32.mxu0 %v9864_v54 }
  0xdb   : > { %372 = vadd.xlane.f32.xlu1 %v329_v19  ;;  %378 = vadd.xlane.f32.xlu0 %v332_v48  ;;  %v12694_v19 = vld [vmem:[#allocation111_spill] sm:$0xff] }
  0xdc   : > { %6909 = vmatmul.mubr.f32.gmra.mrb[8].mxu1 %v9872_v57  ;;  %7077 = vmatmul.mubr.f32.gmra.mrb[8].mxu0 %v9872_v57  ;;  %v343_v39 = vmul.f32 %v12694_v19, %v12694_v19  ;;  %v12711_v19 = vld [vmem:[#allocation51_spill] sm:$0xff] }
  0xdd   : > { %6911 = vmatprep.mubr.f32.mxu1 %v9889_v63  ;;  %7079 = vmatprep.mubr.f32.mxu0 %v9889_v63 }
  0xdf   : > { %376 = vadd.xlane.f32.xlu1 %v331_v46  ;;  %382 = vadd.xlane.f32.xlu0 %v334_v59  ;;  %v12695_v46 = vld [vmem:[#allocation115_spill] sm:$0xff]  ;;  %v12697_v59 = vld [vmem:[#allocation110_spill] sm:$0xff] }
  0xe0   : > { %6912 = vmatmul.mubr.f32.gmra.mrb[10].mxu1 %v9910_v25  ;;  %7080 = vmatmul.mubr.f32.gmra.mrb[10].mxu0 %v9910_v25  ;;  %v344_v48 = vmul.f32 %v12695_v46, %v12695_v46  ;;  %v12713_v46 = vld [vmem:[#allocation57_spill] sm:$0xff] }
  0xe1   : > { %6914 = vmatprep.mubr.f32.mxu1 %v9929_v49  ;;  %7082 = vmatprep.mubr.f32.mxu0 %v9929_v49 }
  0xe3   : > { %380 = vadd.xlane.f32.xlu1 %v333_v55  ;;  %386 = vadd.xlane.f32.xlu0 %v336_v5  ;;  %v12696_v55 = vld [vmem:[#allocation106_spill] sm:$0xff]  ;;  %v346_v5 = vmul.f32 %v10227_v17, %v10227_v17  ;;  %v12701_v17 = vld [vmem:[#allocation131_spill] sm:$0xff] }
  0xe4   : > { %6915 = vmatmul.mubr.f32.gmra.mrb[12].mxu1 %v12679_v60  ;;  %7083 = vmatmul.mubr.f32.gmra.mrb[12].mxu0 %v12679_v60 }
  0xe5   : > { %6917 = vmatprep.mubr.f32.mxu1 %v12680_v7  ;;  %7085 = vmatprep.mubr.f32.mxu0 %v12680_v7 }
  0xe7   : > { %384 = vadd.xlane.f32.xlu1 %v335_v4  ;;  %390 = vadd.xlane.f32.xlu0 %v338_v20  ;;  %v345_v4 = vmul.f32 %v10224_v36, %v10224_v36  ;;  %v347_v20 = vmul.f32 %v10262_v16, %v10262_v16  ;;  %v348_v36 = vmul.f32 %v10265_v61, %v10265_v61  ;;  %v12703_v61 = vld [vmem:[#allocation25_spill] sm:$0xff]  ;;  %v12704_v16 = vld [vmem:[#allocation28_spill] sm:$0xff] }
  0xe8   : > { %6918 = vmatmul.mubr.f32.gmra.mrb[14].mxu1 %v12681_v30  ;;  %7086 = vmatmul.mubr.f32.gmra.mrb[14].mxu0 %v12681_v30 }
  0xe9   : > { %6920 = vmatprep.mubr.f32.mxu1 %v12682_v52  ;;  %7088 = vmatprep.mubr.f32.mxu0 %v12682_v52 }
  0xeb   : > { %388 = vadd.xlane.f32.xlu1 %v337_v44  ;;  %394 = vadd.xlane.f32.xlu0 %v340_v29  ;;  %v12698_v44 = vld [vmem:[#allocation117_spill] sm:$0xff]  ;;  %v12706_v29 = vld [vmem:[#allocation32_spill] sm:$0xff] }
  0xec   : > { %6921 = vmatmul.mubr.f32.gmra.mrb[16].mxu1 %v12684_v24  ;;  %7089 = vmatmul.mubr.f32.gmra.mrb[16].mxu0 %v12684_v24 }
  0xed   : > { %6923 = vmatprep.mubr.f32.mxu1 %v12685_v37  ;;  %7091 = vmatprep.mubr.f32.mxu0 %v12685_v37 }
  0xef   : > { %392 = vadd.xlane.f32.xlu1 %v339_v9  ;;  %398 = vadd.xlane.f32.xlu0 %v342_v18  ;;  %v349_v9 = vmul.f32 %v10300_v43, %v10300_v43  ;;  %v12705_v43 = vld [vmem:[#allocation31_spill] sm:$0xff]  ;;  %v12710_v18 = vld [vmem:[#allocation46_spill] sm:$0xff] }
  0xf0   : > { %6924 = vmatmul.mubr.f32.gmra.mrb[18].mxu1 %v12688_v31  ;;  %7092 = vmatmul.mubr.f32.gmra.mrb[18].mxu0 %v12688_v31 }
  0xf1   : > { %6926 = vmatprep.mubr.f32.mxu1 %v12689_v11  ;;  %7094 = vmatprep.mubr.f32.mxu0 %v12689_v11 }
  0xf3   : > { %396 = vadd.xlane.f32.xlu1 %v341_v13  ;;  %402 = vadd.xlane.f32.xlu0 %v344_v48  ;;  %v12708_v13 = vld [vmem:[#allocation41_spill] sm:$0xff]  ;;  %v12714_v48 = vld [vmem:[#allocation62_spill] sm:$0xff] }
  0xf4   : > { %6927 = vmatmul.mubr.f32.gmra.mrb[20].mxu1 %v12692_v28  ;;  %7095 = vmatmul.mubr.f32.gmra.mrb[20].mxu0 %v12692_v28 }
  0xf5   : > { %6929 = vmatprep.mubr.f32.mxu1 %v12693_v34  ;;  %7097 = vmatprep.mubr.f32.mxu0 %v12693_v34 }
  0xf7   : > { %400 = vadd.xlane.f32.xlu1 %v343_v39  ;;  %406 = vadd.xlane.f32.xlu0 %v346_v5  ;;  %v12712_v39 = vld [vmem:[#allocation53_spill] sm:$0xff]  ;;  %v12716_v5 = vld [vmem:[#allocation70_spill] sm:$0xff] }
  0xf8   : > { %6930 = vmatmul.mubr.f32.gmra.mrb[22].mxu1 %v12696_v55  ;;  %7098 = vmatmul.mubr.f32.gmra.mrb[22].mxu0 %v12696_v55 }
  0xf9   : > { %6932 = vmatprep.mubr.f32.mxu1 %v12697_v59  ;;  %7100 = vmatprep.mubr.f32.mxu0 %v12697_v59 }
  0xfb   : > { %404 = vadd.xlane.f32.xlu1 %v345_v4  ;;  %410 = vadd.xlane.f32.xlu0 %v348_v36  ;;  %v12715_v4 = vld [vmem:[#allocation66_spill] sm:$0xff]  ;;  %v12718_v36 = vld [vmem:[#allocation81_spill] sm:$0xff] }
  0xfc   : > { %6933 = vmatmul.mubr.f32.gmra.mrb[24].mxu1 %v12698_v44  ;;  %7101 = vmatmul.mubr.f32.gmra.mrb[24].mxu0 %v12698_v44 }
  0xfd   : > { %6935 = vmatprep.mubr.f32.mxu1 %v12699_v6  ;;  %7103 = vmatprep.mubr.f32.mxu0 %v12699_v6 }
  0xff   : > { %408 = vadd.xlane.f32.xlu1 %v347_v20  ;;  %v12717_v20 = vld [vmem:[#allocation73_spill] sm:$0xff] }
 0x100   : > { %6936 = vmatmul.mubr.f32.gmra.mrb[26].mxu1 %v12700_v26  ;;  %7104 = vmatmul.mubr.f32.gmra.mrb[26].mxu0 %v12700_v26 }
 0x101   : > { %6938 = vmatprep.mubr.f32.mxu1 %v12701_v17  ;;  %7106 = vmatprep.mubr.f32.mxu0 %v12701_v17 }
 0x103   : > { %412 = vadd.xlane.f32.xlu1 %v349_v9  ;;  %v12719_v9 = vld [vmem:[#allocation83_spill] sm:$0xff] }
 0x104   : > { %6939 = vmatmul.mubr.f32.gmra.mrb[28].mxu1 %v12702_v8  ;;  %7107 = vmatmul.mubr.f32.gmra.mrb[28].mxu0 %v12702_v8 }
 0x105   : > { %6941 = vmatprep.mubr.f32.mxu1 %v10297_v35  ;;  %7109 = vmatprep.mubr.f32.mxu0 %v10297_v35 }
 0x108   : > { %6942 = vmatmul.mubr.f32.gmra.mrb[30].mxu1 %v10316_v53  ;;  %7110 = vmatmul.mubr.f32.gmra.mrb[30].mxu0 %v10316_v53 }
 0x109   : > { %6952 = vmatprep.mubr.f32.mxu1 %v12703_v61  ;;  %7120 = vmatprep.mubr.f32.mxu0 %v9738_v10  ;;  %v12720_v61 = vld [vmem:[#allocation86_spill] sm:$0xff] }
 0x10c   : > { %6953 = vmatmul.mubr.f32.vlgmr.msra.gmra.mrb[0].mxu1 %v12704_v16  ;;  %7121 = vmatmul.mubr.f32.vlgmr.msra.gmra.mrb[0].mxu0 %v9752_v15  ;;  %v12721_v16 = vld [vmem:[#allocation92_spill] sm:$0xff] }
 0x10d   : > { %6955 = vmatprep.mubr.f32.mxu1 %v12705_v43  ;;  %7123 = vmatprep.mubr.f32.mxu0 %v9772_v21 }
 0x110   : > { %6956 = vmatmul.mubr.f32.gmra.mrb[2].mxu1 %v12706_v29  ;;  %7124 = vmatmul.mubr.f32.gmra.mrb[2].mxu0 %v9775_v22 }
 0x111   : > { %6958 = vmatprep.mubr.f32.mxu1 %v12707_v12  ;;  %7126 = vmatprep.mubr.f32.mxu0 %v9791_v27 }
 0x114   : > { %6959 = vmatmul.mubr.f32.gmra.mrb[4].mxu1 %v12708_v13  ;;  %7127 = vmatmul.mubr.f32.gmra.mrb[4].mxu0 %v9818_v38 }
 0x115   : > { %6961 = vmatprep.mubr.f32.mxu1 %v12709_v14  ;;  %7129 = vmatprep.mubr.f32.mxu0 %v9833_v45 }
 0x118   : > { %6962 = vmatmul.mubr.f32.gmra.mrb[6].mxu1 %v12710_v18  ;;  %7130 = vmatmul.mubr.f32.gmra.mrb[6].mxu0 %v9840_v47 }
 0x119   : > { %6964 = vmatprep.mubr.f32.mxu1 %v12711_v19  ;;  %7132 = vmatprep.mubr.f32.mxu0 %v9864_v54 }
 0x11c   : > { %6965 = vmatmul.mubr.f32.gmra.mrb[8].mxu1 %v12712_v39  ;;  %7133 = vmatmul.mubr.f32.gmra.mrb[8].mxu0 %v9872_v57 }
 0x11d   : > { %6967 = vmatprep.mubr.f32.mxu1 %v12713_v46  ;;  %7135 = vmatprep.mubr.f32.mxu0 %v9889_v63 }
 0x120   : > { %6968 = vmatmul.mubr.f32.gmra.mrb[10].mxu1 %v12714_v48  ;;  %7136 = vmatmul.mubr.f32.gmra.mrb[10].mxu0 %v9910_v25 }
 0x121   : > { %6970 = vmatprep.mubr.f32.mxu1 %v12715_v4  ;;  %7138 = vmatprep.mubr.f32.mxu0 %v9929_v49 }
 0x124   : > { %6971 = vmatmul.mubr.f32.gmra.mrb[12].mxu1 %v12716_v5  ;;  %7139 = vmatmul.mubr.f32.gmra.mrb[12].mxu0 %v12679_v60  ;;  %v12722_v60 = vld [vmem:[#allocation99_spill] sm:$0xff] }
 0x125   : > { %6973 = vmatprep.mubr.f32.mxu1 %v12717_v20  ;;  %7141 = vmatprep.mubr.f32.mxu0 %v12680_v7  ;;  %v12723_v7 = vld [vmem:[#allocation103_spill] sm:$0xff] }
 0x128   : > { %6974 = vmatmul.mubr.f32.gmra.mrb[14].mxu1 %v12718_v36  ;;  %7142 = vmatmul.mubr.f32.gmra.mrb[14].mxu0 %v12681_v30  ;;  %v12724_v30 = vld [vmem:[#allocation109_spill] sm:$0xff] }
 0x129   : > { %6976 = vmatprep.mubr.f32.mxu1 %v12719_v9  ;;  %7144 = vmatprep.mubr.f32.mxu0 %v12682_v52  ;;  %v12725_v52 = vld [vmem:[#allocation114_spill] sm:$0xff] }
 0x12c   : > { %6977 = vmatmul.mubr.f32.gmra.mrb[16].mxu1 %v12720_v61  ;;  %7145 = vmatmul.mubr.f32.gmra.mrb[16].mxu0 %v12684_v24  ;;  %v12726_v24 = vld [vmem:[#allocation116_spill] sm:$0xff] }
 0x12d   : > { %6979 = vmatprep.mubr.f32.mxu1 %v12721_v16  ;;  %7147 = vmatprep.mubr.f32.mxu0 %v12685_v37  ;;  %v12727_v37 = vld [vmem:[#allocation120_spill] sm:$0xff] }
 0x130   : > { %6980 = vmatmul.mubr.f32.gmra.mrb[18].mxu1 %v12722_v60  ;;  %7148 = vmatmul.mubr.f32.gmra.mrb[18].mxu0 %v12688_v31  ;;  %v12728_v31 = vld [vmem:[#allocation125_spill] sm:$0xff] }
 0x131   : > { %6982 = vmatprep.mubr.f32.mxu1 %v12723_v7  ;;  %7150 = vmatprep.mubr.f32.mxu0 %v12689_v11  ;;  %v12729_v11 = vld [vmem:[#allocation130_spill] sm:$0xff] }
 0x134   : > { %6983 = vmatmul.mubr.f32.gmra.mrb[20].mxu1 %v12724_v30  ;;  %7151 = vmatmul.mubr.f32.gmra.mrb[20].mxu0 %v12692_v28  ;;  %v12730_v28 = vld [vmem:[#allocation134_spill] sm:$0xff] }
 0x135   : > { %6985 = vmatprep.mubr.f32.mxu1 %v12725_v52  ;;  %7153 = vmatprep.mubr.f32.mxu0 %v12693_v34 }
 0x138   : > { %6986 = vmatmul.mubr.f32.gmra.mrb[22].mxu1 %v12726_v24  ;;  %7154 = vmatmul.mubr.f32.gmra.mrb[22].mxu0 %v12696_v55 }
 0x139   : > { %6988 = vmatprep.mubr.f32.mxu1 %v12727_v37  ;;  %7156 = vmatprep.mubr.f32.mxu0 %v12697_v59 }
 0x13c   : > { %6989 = vmatmul.mubr.f32.gmra.mrb[24].mxu1 %v12728_v31  ;;  %7157 = vmatmul.mubr.f32.gmra.mrb[24].mxu0 %v12698_v44 }
 0x13d   : > { %6991 = vmatprep.mubr.f32.mxu1 %v12729_v11  ;;  %7159 = vmatprep.mubr.f32.mxu0 %v12699_v6 }
 0x140   : > { %6992 = vmatmul.mubr.f32.gmra.mrb[26].mxu1 %v12730_v28  ;;  %7160 = vmatmul.mubr.f32.gmra.mrb[26].mxu0 %v12700_v26 }
 0x141   : > { %6994 = vmatprep.mubr.f32.mxu1 %v10294_v50  ;;  %7162 = vmatprep.mubr.f32.mxu0 %v12701_v17 }
 0x144   : > { %6995 = vmatmul.mubr.f32.gmra.mrb[28].mxu1 %v10313_v2  ;;  %7163 = vmatmul.mubr.f32.gmra.mrb[28].mxu0 %v12702_v8 }
 0x145   : > { %6997 = vmatprep.mubr.f32.mxu1 %v10329_v62  ;;  %7165 = vmatprep.mubr.f32.mxu0 %v10297_v35 }
 0x147   : > { %v351_v55 = vpop.xlane.xlu0 %350 }
 0x148   : > { %6998 = vmatmul.mubr.f32.gmra.mrb[30].mxu1 %v10342_v58  ;;  %7166 = vmatmul.mubr.f32.gmra.mrb[30].mxu0 %v10316_v53  ;;  %v355_v34 = vpop.xlane.xlu1 %354  ;;  %v414_v48 = vmax.f32 %v351_v55, 1e-24 }
 0x149   : > { %v416_v36 = vmax.f32 %v355_v34, 1e-24 }
 0x14c   : > { %v357_v59 = vpop.xlane.xlu1 %356  ;;  %v353_v44 = vpop.xlane.xlu0 %352 }
 0x14d   : > { %v415_v46 = vmax.f32 %v353_v44, 1e-24  ;;  %v417_v4 = vmax.f32 %v357_v59, 1e-24 }
 0x14f   : > { %9151 = vrsqrt.f32 %v415_v46 }
 0x150   : > { %v361_v6 = vpop.xlane.xlu1 %360  ;;  %v359_v26 = vpop.xlane.xlu0 %358  ;;  %9153 = vrsqrt.f32 %v414_v48 }
 0x151   : > { %9155 = vrsqrt.f32 %v417_v4  ;;  %v419_v9 = vmax.f32 %v361_v6, 1e-24  ;;  %v418_v61 = vmax.f32 %v359_v26, 1e-24 }
 0x152   : > { %9157 = vrsqrt.f32 %v416_v36 }
 0x153   : > { %9159 = vrsqrt.f32 %v419_v9 }
 0x154   : > { %v363_v17 = vpop.xlane.xlu0 %362  ;;  %9161 = vrsqrt.f32 %v418_v61 }
 0x155   : > { %v420_v30 = vmax.f32 %v363_v17, 1e-24 }
 0x158   : > { %v367_v12 = vpop.xlane.xlu0 %366 }
 0x159   : > { %v10604_v52 = vpop.eup %9151  ;;  %v422_v6 = vmax.f32 %v367_v12, 1e-24 }
 0x15a   : > { %v10606_v59 = vpop.eup %9153 }
 0x15b   : > { %v10615_v17 = vpop.eup %9155 }
 0x15f   : > { %v365_v43 = vpop.xlane.xlu1 %364  ;;  %v10586_v8 = vpop.xlane.xlu0 %370 }
 0x160   : > { %v421_v7 = vmax.f32 %v365_v43, 1e-24 }
 0x162   : > { %9163 = vrsqrt.f32 %v421_v7 }
 0x163   : > { %9165 = vrsqrt.f32 %v420_v30 }
 0x164   : > { %v369_v29 = vpop.xlane.xlu1 %368  ;;  %v10590_v18 = vpop.xlane.xlu0 %374 }
 0x165   : > { %v423_v55 = vmax.f32 %v369_v29, 1e-24 }
 0x167   : > { %9167 = vrsqrt.f32 %v423_v55 }
 0x168   : > { %v10584_v13 = vpop.xlane.xlu1 %372  ;;  %v10594_v39 = vpop.xlane.xlu0 %378  ;;  %9169 = vrsqrt.f32 %v422_v6 }
 0x169   : > { %v425_v30 = vmax.f32 %v10584_v13, 1e-24 }
 0x16b   : > { %9171 = vrsqrt.f32 %v425_v30 }
 0x16c   : > { %v10588_v14 = vpop.xlane.xlu1 %376  ;;  %v10598_v20 = vpop.xlane.xlu0 %382 }
 0x170   : > { %v10592_v19 = vpop.xlane.xlu1 %380  ;;  %v10602_v60 = vpop.xlane.xlu0 %386 }
 0x171   : > { %v429_v33 = vmax.f32 %v10592_v19, 1e-24 }
 0x174   : > { %v10596_v5 = vpop.xlane.xlu1 %384  ;;  %v10613_v43 = vpop.xlane.xlu0 %390 }
 0x178   : > { %v10600_v16 = vpop.xlane.xlu1 %388 }
 0x179   : > { %v433_v2 = vmax.f32 %v10600_v16, 1e-24 }
 0x17c   : > { %v10611_v26 = vpop.xlane.xlu1 %392 }
 0x1df   : > { %v6954_v24 = vpop.f32.mrb[0].mxu1  ;;  %v7122_v37 = vpop.f32.mrb[0].mxu0 }
 0x1e0   : > { %v8824_v31 = vadd.f32 %v7122_v37, %v6954_v24  ;;  %v1224_v11 = vpop.f32.mrb[1].mxu1  ;;  %v2110_v28 = vpop.f32.mrb[1].mxu0 }
 0x1e1   : > { %v8825_v34 = vadd.f32 %v2110_v28, %v1224_v11  ;;  %v10625_v24 = vpop.eup %9157 }
 0x1e2   : > { %v10609_v44 = vmul.f32 %v10604_v52, %v8824_v31  ;;  %v424_v31 = vmax.f32 %v10586_v8, 1e-24  ;;  %v10631_v11 = vpop.eup %9159 }
 0x1e3   : > { %v6957_v46 = vpop.f32.mrb[2].mxu1  ;;  %v7125_v48 = vpop.f32.mrb[2].mxu0  ;;  %v10618_v4 = vmul.f32 %v10606_v59, %v8825_v34 }
 0x1e4   : > { %v8826_v29 = vadd.f32 %v7125_v48, %v6957_v46  ;;  %v1238_v36 = vpop.f32.mrb[3].mxu1  ;;  %v2122_v9 = vpop.f32.mrb[3].mxu0  ;;  %v2336_v61 = vsel %vm2332_vm1, %v10609_v44, -inf  ;;  %9173 = vrsqrt.f32 %v424_v31 }
 0x1e5   : > { %v8827_v7 = vadd.f32 %v2122_v9, %v1238_v36  ;;  %2337 = vmax.xlane.f32.xlu1 %v2336_v61  ;;  %v2333_v12 = vsel %vm2332_vm1, %v10618_v4, -inf  ;;  %v10636_v46 = vpop.eup %9161  ;;  %v427_v9 = vmax.f32 %v10588_v14, 1e-24 }
 0x1e6   : > { %2334 = vmax.xlane.f32.xlu0 %v2333_v12  ;;  %v10628_v37 = vmul.f32 %v10615_v17, %v8826_v29  ;;  %v10647_v12 = vpop.xlane.xlu1 %396 }
 0x1e7   : > { %v6960_v28 = vpop.f32.mrb[4].mxu1  ;;  %v7128_v34 = vpop.f32.mrb[4].mxu0  ;;  %v10634_v55 = vmul.f32 %v10625_v24, %v8827_v7  ;;  %v426_v7 = vmax.f32 %v10590_v18, 1e-24  ;;  %9175 = vrsqrt.f32 %v427_v9  ;;  %v437_v40 = vmax.f32 %v10647_v12, 1e-24 }
 0x1e8   : > { %v8828_v48 = vadd.f32 %v7128_v34, %v6960_v28  ;;  %v1252_v13 = vpop.f32.mrb[5].mxu1  ;;  %v2134_v36 = vpop.f32.mrb[5].mxu0  ;;  %v2342_v6 = vsel %vm2332_vm1, %v10628_v37, -inf }
 0x1e9   : > { %v8829_v29 = vadd.f32 %v2134_v36, %v1252_v13  ;;  %2343 = vmax.xlane.f32.xlu1 %v2342_v6  ;;  %v2339_v8 = vsel %vm2332_vm1, %v10634_v55, -inf  ;;  %v10649_v28 = vpop.xlane.xlu0 %394  ;;  %v10651_v34 = vpop.eup %9163  ;;  %9177 = vrsqrt.f32 %v426_v7  ;;  %v431_v7 = vmax.f32 %v10596_v5, 1e-24 }
 0x1ea   : > { %2340 = vmax.xlane.f32.xlu0 %v2339_v8  ;;  %v10644_v61 = vmul.f32 %v10631_v11, %v8828_v48  ;;  %v10656_v6 = vpop.eup %9165  ;;  %9179 = vrsqrt.f32 %v429_v33 }
 0x1eb   : > { %v6963_v30 = vpop.f32.mrb[6].mxu1  ;;  %v7131_v13 = vpop.f32.mrb[6].mxu0  ;;  %v10654_v36 = vmul.f32 %v10636_v46, %v8829_v29 }
 0x1ec   : > { %v8830_v14 = vadd.f32 %v7131_v13, %v6963_v30  ;;  %v1266_v31 = vpop.f32.mrb[7].mxu1  ;;  %v2146_v8 = vpop.f32.mrb[7].mxu0  ;;  %v2348_v48 = vsel %vm2332_vm1, %v10644_v61, -inf  ;;  %v428_v30 = vmax.f32 %v10594_v39, 1e-24 }
 0x1ed   : > { %v8831_v18 = vadd.f32 %v2146_v8, %v1266_v31  ;;  %2349 = vmax.xlane.f32.xlu1 %v2348_v48  ;;  %v2345_v32 = vsel %vm2332_vm1, %v10654_v36, -inf  ;;  %v10667_v13 = vpop.eup %9167 }
 0x1ee   : > { %2346 = vmax.xlane.f32.xlu0 %v2345_v32  ;;  %v10664_v29 = vmul.f32 %v10651_v34, %v8830_v14  ;;  %v10672_v31 = vpop.eup %9169  ;;  %9181 = vrsqrt.f32 %v428_v30 }
 0x1ef   : > { %v6966_v42 = vpop.f32.mrb[8].mxu1  ;;  %v7134_v1 = vpop.f32.mrb[8].mxu0  ;;  %v10670_v9 = vmul.f32 %v10656_v6, %v8831_v18  ;;  %9183 = vrsqrt.f32 %v431_v7 }
 0x1f0   : > { %v8832_v8 = vadd.f32 %v7134_v1, %v6966_v42  ;;  %v1280_v48 = vpop.f32.mrb[9].mxu1  ;;  %v2158_v56 = vpop.f32.mrb[9].mxu0  ;;  %v2354_v32 = vsel %vm2332_vm1, %v10664_v29, -inf  ;;  %v430_v1 = vmax.f32 %v10598_v20, 1e-24 }
 0x1f1   : > { %v8833_v19 = vadd.f32 %v2158_v56, %v1280_v48  ;;  %2355 = vmax.xlane.f32.xlu1 %v2354_v32  ;;  %v2351_v39 = vsel %vm2332_vm1, %v10670_v9, -inf  ;;  %v10683_v42 = vpop.xlane.xlu1 %400  ;;  %v10685_v18 = vpop.xlane.xlu0 %398 }
 0x1f2   : > { %2352 = vmax.xlane.f32.xlu0 %v2351_v39  ;;  %v10680_v14 = vmul.f32 %v10667_v13, %v8832_v8  ;;  %v10687_v58 = vpop.eup %9171  ;;  %9185 = vrsqrt.f32 %v430_v1  ;;  %v435_v1 = vmax.f32 %v10611_v26, 1e-24 }
 0x1f3   : > { %v6969_v56 = vpop.f32.mrb[10].mxu1  ;;  %v7137_v33 = vpop.f32.mrb[10].mxu0  ;;  %v10690_v48 = vmul.f32 %v10672_v31, %v8833_v19  ;;  %9187 = vrsqrt.f32 %v433_v2 }
 0x1f4   : > { %v10692_v32 = vpop.eup %9173  ;;  %v8834_v5 = vadd.f32 %v7137_v33, %v6969_v56  ;;  %v1294_v30 = vpop.f32.mrb[11].mxu1  ;;  %v2360_v8 = vsel %vm2332_vm1, %v10680_v14, -inf  ;;  %v432_v56 = vmax.f32 %v10602_v60, 1e-24 }
 0x1f5   : > { %v2170_v39 = vpop.f32.mrb[11].mxu0  ;;  %2361 = vmax.xlane.f32.xlu1 %v2360_v8  ;;  %v2357_v62 = vsel %vm2332_vm1, %v10690_v48, -inf  ;;  %v10703_v33 = vpop.eup %9175 }
 0x1f6   : > { %v8835_v20 = vadd.f32 %v2170_v39, %v1294_v30  ;;  %2358 = vmax.xlane.f32.xlu0 %v2357_v62  ;;  %v10700_v19 = vmul.f32 %v10687_v58, %v8834_v5  ;;  %v10708_v30 = vpop.eup %9177  ;;  %9189 = vrsqrt.f32 %v432_v56 }
 0x1f7   : > { %v6972_v50 = vpop.f32.mrb[12].mxu1  ;;  %v7140_v3 = vpop.f32.mrb[12].mxu0  ;;  %9191 = vrsqrt.f32 %v435_v1 }
 0x1f8   : > { %v10706_v7 = vmul.f32 %v10692_v32, %v8835_v20  ;;  %v8836_v39 = vadd.f32 %v7140_v3, %v6972_v50  ;;  %v1308_v8 = vpop.f32.mrb[13].mxu1  ;;  %v2182_v41 = vpop.f32.mrb[13].mxu0  ;;  %v2366_v62 = vsel %vm2332_vm1, %v10700_v19, -inf  ;;  %v434_v3 = vmax.f32 %v10613_v43, 1e-24 }
 0x1f9   : > { %v8837_v16 = vadd.f32 %v2182_v41, %v1308_v8  ;;  %2367 = vmax.xlane.f32.xlu1 %v2366_v62  ;;  %v10719_v50 = vpop.xlane.xlu1 %404  ;;  %v10721_v20 = vpop.xlane.xlu0 %402 }
 0x1fa   : > { %v2363_v60 = vsel %vm2332_vm1, %v10706_v7, -inf  ;;  %v10716_v5 = vmul.f32 %v10703_v33, %v8836_v39  ;;  %v10723_v23 = vpop.eup %9179  ;;  %9193 = vrsqrt.f32 %v434_v3  ;;  %v439_v3 = vmax.f32 %v10683_v42, 1e-24 }
 0x1fb   : > { %2364 = vmax.xlane.f32.xlu0 %v2363_v60  ;;  %v6975_v2 = vpop.f32.mrb[14].mxu1  ;;  %v7143_v41 = vpop.f32.mrb[14].mxu0  ;;  %v10726_v8 = vmul.f32 %v10708_v30, %v8837_v16  ;;  %9195 = vrsqrt.f32 %v437_v40  ;;  %v441_v63 = vmax.f32 %v10719_v50, 1e-24 }
 0x1fc   : > { %v10728_v62 = vpop.eup %9181  ;;  %v8838_v26 = vadd.f32 %v7143_v41, %v6975_v2  ;;  %v1322_v56 = vpop.f32.mrb[15].mxu1  ;;  %v2372_v39 = vsel %vm2332_vm1, %v10716_v5, -inf  ;;  %v436_v2 = vmax.f32 %v10649_v28, 1e-24 }
 0x1fd   : > { %v2194_v60 = vpop.f32.mrb[15].mxu0  ;;  %2373 = vmax.xlane.f32.xlu1 %v2372_v39  ;;  %v2369_v51 = vsel %vm2332_vm1, %v10726_v8, -inf  ;;  %v10739_v41 = vpop.eup %9183 }
 0x1fe   : > { %v8839_v43 = vadd.f32 %v2194_v60, %v1322_v56  ;;  %v10736_v16 = vmul.f32 %v10723_v23, %v8838_v26  ;;  %v10744_v56 = vpop.eup %9185  ;;  %9197 = vrsqrt.f32 %v436_v2 }
 0x1ff   : > { %2370 = vmax.xlane.f32.xlu0 %v2369_v51  ;;  %v6978_v0 = vpop.f32.mrb[16].mxu1  ;;  %v7146_v53 = vpop.f32.mrb[16].mxu0  ;;  %9199 = vrsqrt.f32 %v439_v3 }
 0x200   : > { %v10742_v1 = vmul.f32 %v10728_v62, %v8839_v43  ;;  %v8840_v60 = vadd.f32 %v7146_v53, %v6978_v0  ;;  %v1336_v39 = vpop.f32.mrb[17].mxu1  ;;  %v2206_v35 = vpop.f32.mrb[17].mxu0  ;;  %v2378_v51 = vsel %vm2332_vm1, %v10736_v16, -inf  ;;  %v438_v53 = vmax.f32 %v10685_v18, 1e-24 }
 0x201   : > { %v8841_v12 = vadd.f32 %v2206_v35, %v1336_v39  ;;  %2379 = vmax.xlane.f32.xlu1 %v2378_v51  ;;  %v409_v0 = vpop.xlane.xlu1 %408  ;;  %v407_v43 = vpop.xlane.xlu0 %406 }
 0x202   : > { %v2375_v28 = vsel %vm2332_vm1, %v10742_v1, -inf  ;;  %v10752_v26 = vmul.f32 %v10739_v41, %v8840_v60  ;;  %v10755_v49 = vpop.eup %9187  ;;  %9201 = vrsqrt.f32 %v438_v53 }
 0x203   : > { %2376 = vmax.xlane.f32.xlu0 %v2375_v28  ;;  %12731 = vst [vmem:[#allocation85_spill] sm:$0xff] %v10755_v49  ;;  %v6981_v25 = vpop.f32.mrb[18].mxu1  ;;  %v7149_v40 = vpop.f32.mrb[18].mxu0  ;;  %v10758_v35 = vmul.f32 %v10744_v56, %v8841_v12  ;;  %9203 = vrsqrt.f32 %v441_v63 }
 0x204   : > { %v10760_v39 = vpop.eup %9189  ;;  %v8842_v51 = vadd.f32 %v7149_v40, %v6981_v25  ;;  %v1350_v42 = vpop.f32.mrb[19].mxu1  ;;  %v2384_v60 = vsel %vm2332_vm1, %v10752_v26, -inf  ;;  %v440_v25 = vmax.f32 %v10721_v20, 1e-24 }
 0x205   : > { %12732 = vst [vmem:[#allocation94_spill] sm:$0xff] %v10760_v39  ;;  %v2218_v2 = vpop.f32.mrb[19].mxu0  ;;  %2385 = vmax.xlane.f32.xlu1 %v2384_v60  ;;  %v2381_v18 = vsel %vm2332_vm1, %v10758_v35, -inf  ;;  %v10771_v40 = vpop.eup %9191 }
 0x206   : > { %v8843_v28 = vadd.f32 %v2218_v2, %v1350_v42  ;;  %v10768_v12 = vmul.f32 %v10755_v49, %v8842_v51  ;;  %12733 = vst [vmem:[#allocation95_spill] sm:$0xff] %v10771_v40  ;;  %v10776_v42 = vpop.eup %9193  ;;  %v443_v51 = vmax.f32 %v409_v0, 1e-24  ;;  %9205 = vrsqrt.f32 %v440_v25  ;;  %v413_v45 = vpop.xlane.xlu1 %412 }
 0x207   : > { %2382 = vmax.xlane.f32.xlu0 %v2381_v18  ;;  %v6984_v57 = vpop.f32.mrb[20].mxu1  ;;  %v7152_v54 = vpop.f32.mrb[20].mxu0  ;;  %12734 = vst [vmem:[#allocation101_spill] sm:$0xff] %v10776_v42  ;;  %v442_v18 = vmax.f32 %v407_v43, 1e-24 }
 0x208   : > { %v10774_v3 = vmul.f32 %v10760_v39, %v8843_v28  ;;  %v8844_v2 = vadd.f32 %v7152_v54, %v6984_v57  ;;  %v1364_v60 = vpop.f32.mrb[21].mxu1  ;;  %v2230_v47 = vpop.f32.mrb[21].mxu0  ;;  %v2390_v50 = vsel %vm2332_vm1, %v10768_v12, -inf  ;;  %9207 = vrsqrt.f32 %v443_v51 }
 0x209   : > { %v8845_v53 = vadd.f32 %v2230_v47, %v1364_v60  ;;  %2391 = vmax.xlane.f32.xlu1 %v2390_v50  ;;  %v411_v54 = vpop.xlane.xlu0 %410  ;;  %v10785_v57 = vpop.eup %9195  ;;  %9209 = vrsqrt.f32 %v442_v18 }
 0x20a   : > { %v2387_v20 = vsel %vm2332_vm1, %v10774_v3, -inf  ;;  %v10783_v28 = vmul.f32 %v10771_v40, %v8844_v2  ;;  %12735 = vst [vmem:[#allocation105_spill] sm:$0xff] %v10785_v57  ;;  %v10790_v47 = vpop.eup %9197  ;;  %v444_v22 = vmax.f32 %v411_v54, 1e-24 }
 0x20b   : > { %2388 = vmax.xlane.f32.xlu0 %v2387_v20  ;;  %v6987_v38 = vpop.f32.mrb[22].mxu1  ;;  %v7155_v27 = vpop.f32.mrb[22].mxu0  ;;  %v10788_v63 = vmul.f32 %v10776_v42, %v8845_v53  ;;  %12736 = vst [vmem:[#allocation111_spill] sm:$0xff] %v10790_v47  ;;  %v445_v20 = vmax.f32 %v413_v45, 1e-24 }
 0x20c   : > { %v8846_v60 = vadd.f32 %v7155_v27, %v6987_v38  ;;  %v1378_v50 = vpop.f32.mrb[23].mxu1  ;;  %v2242_v0 = vpop.f32.mrb[23].mxu0  ;;  %v2396_v25 = vsel %vm2332_vm1, %v10783_v28, -inf }
 0x20d   : > { %v8847_v2 = vadd.f32 %v2242_v0, %v1378_v50  ;;  %2397 = vmax.xlane.f32.xlu1 %v2396_v25  ;;  %v2393_v43 = vsel %vm2332_vm1, %v10788_v63, -inf  ;;  %v10799_v21 = vpop.eup %9199  ;;  %9211 = vrsqrt.f32 %v445_v20 }
 0x20e   : > { %v10797_v53 = vmul.f32 %v10785_v57, %v8846_v60  ;;  %12737 = vst [vmem:[#allocation115_spill] sm:$0xff] %v10799_v21  ;;  %v10804_v51 = vpop.eup %9201  ;;  %9213 = vrsqrt.f32 %v444_v22 }
 0x20f   : > { %2394 = vmax.xlane.f32.xlu0 %v2393_v43  ;;  %v6990_v27 = vpop.f32.mrb[24].mxu1  ;;  %v7158_v38 = vpop.f32.mrb[24].mxu0  ;;  %v10802_v15 = vmul.f32 %v10790_v47, %v8847_v2  ;;  %12738 = vst [vmem:[#allocation158_spill] sm:$0xff] %v10804_v51 }
 0x210   : > { %v8848_v50 = vadd.f32 %v7158_v38, %v6990_v27  ;;  %v1392_v0 = vpop.f32.mrb[25].mxu1  ;;  %v2254_v25 = vpop.f32.mrb[25].mxu0  ;;  %v2402_v45 = vsel %vm2332_vm1, %v10797_v53, -inf }
 0x211   : > { %v8849_v18 = vadd.f32 %v2254_v25, %v1392_v0  ;;  %2403 = vmax.xlane.f32.xlu1 %v2402_v45  ;;  %v2399_v54 = vsel %vm2332_vm1, %v10802_v15, -inf  ;;  %v10813_v2 = vpop.eup %9203 }
 0x212   : > { %v10811_v60 = vmul.f32 %v10799_v21, %v8848_v50  ;;  %12739 = vst [vmem:[#allocation159_spill] sm:$0xff] %v10813_v2  ;;  %v10818_v10 = vpop.eup %9205 }
 0x213   : > { %2400 = vmax.xlane.f32.xlu0 %v2399_v54  ;;  %v6993_v43 = vpop.f32.mrb[26].mxu1  ;;  %v7161_v27 = vpop.f32.mrb[26].mxu0  ;;  %v10816_v38 = vmul.f32 %v10804_v51, %v8849_v18  ;;  %12740 = vst [vmem:[#allocation160_spill] sm:$0xff] %v10818_v10 }
 0x214   : > { %v8850_v20 = vadd.f32 %v7161_v27, %v6993_v43  ;;  %v1406_v0 = vpop.f32.mrb[27].mxu1  ;;  %v2266_v25 = vpop.f32.mrb[27].mxu0  ;;  %v2408_v45 = vsel %vm2332_vm1, %v10811_v60, -inf }
 0x215   : > { %v8851_v22 = vadd.f32 %v2266_v25, %v1406_v0  ;;  %2409 = vmax.xlane.f32.xlu1 %v2408_v45  ;;  %v2405_v50 = vsel %vm2332_vm1, %v10816_v38, -inf  ;;  %v10827_v21 = vpop.eup %9207 }
 0x216   : > { %v10825_v54 = vmul.f32 %v10813_v2, %v8850_v20  ;;  %12741 = vst [vmem:[#allocation161_spill] sm:$0xff] %v10827_v21  ;;  %v10832_v27 = vpop.eup %9209 }
 0x217   : > { %2406 = vmax.xlane.f32.xlu0 %v2405_v50  ;;  %v6996_v18 = vpop.f32.mrb[28].mxu1  ;;  %v7164_v51 = vpop.f32.mrb[28].mxu0  ;;  %v10830_v43 = vmul.f32 %v10818_v10, %v8851_v22  ;;  %12742 = vst [vmem:[#allocation162_spill] sm:$0xff] %v10832_v27 }
 0x218   : > { %v8852_v47 = vadd.f32 %v7164_v51, %v6996_v18  ;;  %v1420_v57 = vpop.f32.mrb[29].mxu1  ;;  %v2278_v0 = vpop.f32.mrb[29].mxu0  ;;  %v2414_v25 = vsel %vm2332_vm1, %v10825_v54, -inf }
 0x219   : > { %v8853_v45 = vadd.f32 %v2278_v0, %v1420_v57  ;;  %2415 = vmax.xlane.f32.xlu1 %v2414_v25  ;;  %v2411_v20 = vsel %vm2332_vm1, %v10830_v43, -inf  ;;  %v10841_v2 = vpop.eup %9211 }
 0x21a   : > { %v10839_v50 = vmul.f32 %v10827_v21, %v8852_v47  ;;  %12743 = vst [vmem:[#allocation163_spill] sm:$0xff] %v10841_v2  ;;  %v10846_v18 = vpop.eup %9213 }
 0x21b   : > { %2412 = vmax.xlane.f32.xlu0 %v2411_v20  ;;  %v6999_v22 = vpop.f32.mrb[30].mxu1  ;;  %v7167_v10 = vpop.f32.mrb[30].mxu0  ;;  %v10844_v51 = vmul.f32 %v10832_v27, %v8853_v45  ;;  %12744 = vst [vmem:[#allocation164_spill] sm:$0xff] %v10846_v18 }
 0x21c   : > { %v8854_v42 = vadd.f32 %v7167_v10, %v6999_v22  ;;  %v1434_v40 = vpop.f32.mrb[31].mxu1  ;;  %v2290_v57 = vpop.f32.mrb[31].mxu0  ;;  %v2420_v0 = vsel %vm2332_vm1, %v10839_v50, -inf }
 0x21d   : > { %v8855_v25 = vadd.f32 %v2290_v57, %v1434_v40  ;;  %2421 = vmax.xlane.f32.xlu1 %v2420_v0  ;;  %v2417_v47 = vsel %vm2332_vm1, %v10844_v51, -inf }
 0x21e   : > { %v10853_v20 = vmul.f32 %v10841_v2, %v8854_v42 }
 0x21f   : > { %2418 = vmax.xlane.f32.xlu0 %v2417_v47  ;;  %v10856_v45 = vmul.f32 %v10846_v18, %v8855_v25 }
 0x220   : > { %v2426_v10 = vsel %vm2332_vm1, %v10853_v20, -inf }
 0x221   : > { %2427 = vmax.xlane.f32.xlu1 %v2426_v10  ;;  %v2423_v22 = vsel %vm2332_vm1, %v10856_v45, -inf }
 0x223   : > { %2424 = vmax.xlane.f32.xlu0 %v2423_v22 }
 0x272   : > { %v2338_v40 = vpop.xlane.xlu1 %2337 }
 0x273   : > { %v2430_v57 = vsub.f32 %v10609_v44, %v2338_v40  ;;  %v2335_v0 = vpop.xlane.xlu0 %2334 }
 0x274   : > { %v2429_v47 = vsub.f32 %v10618_v4, %v2335_v0 }
 0x275   : > { %v2463_v27 = vmul.f32 1.442695, %v2430_v57 }
 0x276   : > { %v2461_v42 = vmul.f32 1.442695, %v2429_v47  ;;  %v2344_v2 = vpop.xlane.xlu1 %2343 }
 0x277   : > { %9215 = vpow2.f32 %v2463_v27  ;;  %v2432_v25 = vsub.f32 %v10628_v37, %v2344_v2  ;;  %v2341_v18 = vpop.xlane.xlu0 %2340 }
 0x278   : > { %9217 = vpow2.f32 %v2461_v42  ;;  %v2431_v10 = vsub.f32 %v10634_v55, %v2341_v18 }
 0x279   : > { %v2467_v21 = vmul.f32 1.442695, %v2432_v25 }
 0x27a   : > { %v2465_v39 = vmul.f32 1.442695, %v2431_v10  ;;  %v2350_v49 = vpop.xlane.xlu1 %2349 }
 0x27b   : > { %9219 = vpow2.f32 %v2467_v21  ;;  %v2434_v22 = vsub.f32 %v10644_v61, %v2350_v49  ;;  %v2347_v44 = vpop.xlane.xlu0 %2346 }
 0x27c   : > { %9221 = vpow2.f32 %v2465_v39  ;;  %v2433_v4 = vsub.f32 %v10654_v36, %v2347_v44 }
 0x27d   : > { %v2471_v40 = vmul.f32 1.442695, %v2434_v22 }
 0x27e   : > { %v2469_v57 = vmul.f32 1.442695, %v2433_v4  ;;  %v2356_v0 = vpop.xlane.xlu1 %2355 }
 0x27f   : > { %9223 = vpow2.f32 %v2471_v40  ;;  %v2436_v37 = vsub.f32 %v10664_v29, %v2356_v0  ;;  %v2353_v2 = vpop.xlane.xlu0 %2352 }
 0x280   : > { %9225 = vpow2.f32 %v2469_v57  ;;  %v2435_v55 = vsub.f32 %v10670_v9, %v2353_v2 }
 0x281   : > { %v10870_v27 = vpop.eup %9215  ;;  %v2475_v18 = vmul.f32 1.442695, %v2436_v37 }
 0x282   : > { %v10872_v21 = vpop.eup %9217  ;;  %v2473_v49 = vmul.f32 1.442695, %v2435_v55  ;;  %v2362_v61 = vpop.xlane.xlu1 %2361  ;;  %v2528_v36 = vsel %vm2332_vm1, %v10870_v27, 0.0 }
 0x283   : > { %9227 = vpow2.f32 %v2475_v18  ;;  %v2438_v39 = vsub.f32 %v10680_v14, %v2362_v61  ;;  %2529 = vadd.xlane.f32.xlu1 %v2528_v36  ;;  %v2359_v47 = vpop.xlane.xlu0 %2358  ;;  %v2525_v29 = vsel %vm2332_vm1, %v10872_v21, 0.0 }
 0x284   : > { %9229 = vpow2.f32 %v2473_v49  ;;  %v2437_v9 = vsub.f32 %v10690_v48, %v2359_v47  ;;  %2526 = vadd.xlane.f32.xlu0 %v2525_v29 }
 0x285   : > { %v10880_v42 = vpop.eup %9219  ;;  %v2479_v25 = vmul.f32 1.442695, %v2438_v39 }
 0x286   : > { %v10882_v10 = vpop.eup %9221  ;;  %v2477_v22 = vmul.f32 1.442695, %v2437_v9  ;;  %v2368_v44 = vpop.xlane.xlu1 %2367  ;;  %v2534_v4 = vsel %vm2332_vm1, %v10880_v42, 0.0 }
 0x287   : > { %9231 = vpow2.f32 %v2479_v25  ;;  %v2440_v14 = vsub.f32 %v10700_v19, %v2368_v44  ;;  %2535 = vadd.xlane.f32.xlu1 %v2534_v4  ;;  %v2531_v57 = vsel %vm2332_vm1, %v10882_v10, 0.0 }
 0x288   : > { %v2365_v40 = vpop.xlane.xlu0 %2364  ;;  %9233 = vpow2.f32 %v2477_v22  ;;  %2532 = vadd.xlane.f32.xlu0 %v2531_v57 }
 0x289   : > { %v2439_v48 = vsub.f32 %v10706_v7, %v2365_v40  ;;  %v10890_v0 = vpop.eup %9223  ;;  %v2483_v37 = vmul.f32 1.442695, %v2440_v14 }
 0x28a   : > { %v10892_v2 = vpop.eup %9225  ;;  %v2374_v18 = vpop.xlane.xlu1 %2373  ;;  %v2540_v49 = vsel %vm2332_vm1, %v10890_v0, 0.0 }
 0x28b   : > { %v2481_v55 = vmul.f32 1.442695, %v2439_v48  ;;  %9235 = vpow2.f32 %v2483_v37  ;;  %v2442_v19 = vsub.f32 %v10716_v5, %v2374_v18  ;;  %2541 = vadd.xlane.f32.xlu1 %v2540_v49  ;;  %v2537_v36 = vsel %vm2332_vm1, %v10892_v2, 0.0 }
 0x28c   : > { %v2371_v61 = vpop.xlane.xlu0 %2370  ;;  %2538 = vadd.xlane.f32.xlu0 %v2537_v36 }
 0x28d   : > { %9237 = vpow2.f32 %v2481_v55  ;;  %v2441_v7 = vsub.f32 %v10726_v8, %v2371_v61  ;;  %v10900_v39 = vpop.eup %9227  ;;  %v2487_v47 = vmul.f32 1.442695, %v2442_v19 }
 0x28e   : > { %v10902_v29 = vpop.eup %9229  ;;  %v2380_v25 = vpop.xlane.xlu1 %2379  ;;  %v2546_v22 = vsel %vm2332_vm1, %v10900_v39, 0.0 }
 0x28f   : > { %v2485_v9 = vmul.f32 1.442695, %v2441_v7  ;;  %9239 = vpow2.f32 %v2487_v47  ;;  %v2444_v5 = vsub.f32 %v10736_v16, %v2380_v25  ;;  %2547 = vadd.xlane.f32.xlu1 %v2546_v22  ;;  %v2543_v4 = vsel %vm2332_vm1, %v10902_v29, 0.0 }
 0x290   : > { %v2377_v44 = vpop.xlane.xlu0 %2376  ;;  %2544 = vadd.xlane.f32.xlu0 %v2543_v4 }
 0x291   : > { %9241 = vpow2.f32 %v2485_v9  ;;  %v2443_v8 = vsub.f32 %v10742_v1, %v2377_v44  ;;  %v10910_v14 = vpop.eup %9231  ;;  %v2491_v40 = vmul.f32 1.442695, %v2444_v5 }
 0x292   : > { %v10912_v57 = vpop.eup %9233  ;;  %v2386_v37 = vpop.xlane.xlu1 %2385  ;;  %v2552_v55 = vsel %vm2332_vm1, %v10910_v14, 0.0 }
 0x293   : > { %v2489_v48 = vmul.f32 1.442695, %v2443_v8  ;;  %9243 = vpow2.f32 %v2491_v40  ;;  %v2446_v16 = vsub.f32 %v10752_v26, %v2386_v37  ;;  %2553 = vadd.xlane.f32.xlu1 %v2552_v55  ;;  %v2549_v49 = vsel %vm2332_vm1, %v10912_v57, 0.0 }
 0x294   : > { %v2383_v18 = vpop.xlane.xlu0 %2382  ;;  %2550 = vadd.xlane.f32.xlu0 %v2549_v49 }
 0x295   : > { %9245 = vpow2.f32 %v2489_v48  ;;  %v2445_v1 = vsub.f32 %v10758_v35, %v2383_v18  ;;  %v10920_v19 = vpop.eup %9235  ;;  %v2495_v61 = vmul.f32 1.442695, %v2446_v16 }
 0x296   : > { %v2392_v47 = vpop.xlane.xlu1 %2391  ;;  %v2558_v9 = vsel %vm2332_vm1, %v10920_v19, 0.0 }
 0x297   : > { %v10922_v36 = vpop.eup %9237  ;;  %v2493_v7 = vmul.f32 1.442695, %v2445_v1  ;;  %9247 = vpow2.f32 %v2495_v61  ;;  %v2448_v26 = vsub.f32 %v10768_v12, %v2392_v47  ;;  %2559 = vadd.xlane.f32.xlu1 %v2558_v9 }
 0x298   : > { %v2389_v25 = vpop.xlane.xlu0 %2388  ;;  %v2555_v22 = vsel %vm2332_vm1, %v10922_v36, 0.0 }
 0x299   : > { %9249 = vpow2.f32 %v2493_v7  ;;  %v2447_v35 = vsub.f32 %v10774_v3, %v2389_v25  ;;  %2556 = vadd.xlane.f32.xlu0 %v2555_v22  ;;  %v10930_v5 = vpop.eup %9239  ;;  %v2499_v44 = vmul.f32 1.442695, %v2448_v26 }
 0x29a   : > { %v2398_v40 = vpop.xlane.xlu1 %2397  ;;  %v2564_v48 = vsel %vm2332_vm1, %v10930_v5, 0.0 }
 0x29b   : > { %v10932_v4 = vpop.eup %9241  ;;  %v2497_v8 = vmul.f32 1.442695, %v2447_v35  ;;  %9251 = vpow2.f32 %v2499_v44  ;;  %v2450_v12 = vsub.f32 %v10783_v28, %v2398_v40  ;;  %2565 = vadd.xlane.f32.xlu1 %v2564_v48 }
 0x29c   : > { %v2395_v37 = vpop.xlane.xlu0 %2394  ;;  %v2561_v55 = vsel %vm2332_vm1, %v10932_v4, 0.0 }
 0x29d   : > { %9253 = vpow2.f32 %v2497_v8  ;;  %v2449_v3 = vsub.f32 %v10788_v63, %v2395_v37  ;;  %2562 = vadd.xlane.f32.xlu0 %v2561_v55  ;;  %v10940_v16 = vpop.eup %9243  ;;  %v2503_v18 = vmul.f32 1.442695, %v2450_v12 }
 0x29e   : > { %v2404_v61 = vpop.xlane.xlu1 %2403  ;;  %v2570_v7 = vsel %vm2332_vm1, %v10940_v16, 0.0 }
 0x29f   : > { %v10942_v49 = vpop.eup %9245  ;;  %v2501_v1 = vmul.f32 1.442695, %v2449_v3  ;;  %9255 = vpow2.f32 %v2503_v18  ;;  %v2452_v28 = vsub.f32 %v10797_v53, %v2404_v61  ;;  %2571 = vadd.xlane.f32.xlu1 %v2570_v7 }
 0x2a0   : > { %v2401_v47 = vpop.xlane.xlu0 %2400  ;;  %v2567_v9 = vsel %vm2332_vm1, %v10942_v49, 0.0 }
 0x2a1   : > { %9257 = vpow2.f32 %v2501_v1  ;;  %v2451_v63 = vsub.f32 %v10802_v15, %v2401_v47  ;;  %2568 = vadd.xlane.f32.xlu0 %v2567_v9  ;;  %v10950_v26 = vpop.eup %9247  ;;  %v2507_v25 = vmul.f32 1.442695, %v2452_v28 }
 0x2a2   : > { %v2410_v44 = vpop.xlane.xlu1 %2409  ;;  %v2576_v8 = vsel %vm2332_vm1, %v10950_v26, 0.0 }
 0x2a3   : > { %v10952_v22 = vpop.eup %9249  ;;  %v2505_v35 = vmul.f32 1.442695, %v2451_v63  ;;  %9259 = vpow2.f32 %v2507_v25  ;;  %v2454_v53 = vsub.f32 %v10811_v60, %v2410_v44  ;;  %2577 = vadd.xlane.f32.xlu1 %v2576_v8 }
 0x2a4   : > { %v2407_v40 = vpop.xlane.xlu0 %2406  ;;  %v2573_v48 = vsel %vm2332_vm1, %v10952_v22, 0.0 }
 0x2a5   : > { %9261 = vpow2.f32 %v2505_v35  ;;  %v2453_v15 = vsub.f32 %v10816_v38, %v2407_v40  ;;  %2574 = vadd.xlane.f32.xlu0 %v2573_v48  ;;  %v10960_v12 = vpop.eup %9251  ;;  %v2511_v37 = vmul.f32 1.442695, %v2454_v53 }
 0x2a6   : > { %v2416_v18 = vpop.xlane.xlu1 %2415  ;;  %v2582_v1 = vsel %vm2332_vm1, %v10960_v12, 0.0 }
 0x2a7   : > { %v10962_v55 = vpop.eup %9253  ;;  %v2509_v3 = vmul.f32 1.442695, %v2453_v15  ;;  %9263 = vpow2.f32 %v2511_v37  ;;  %v2456_v60 = vsub.f32 %v10825_v54, %v2416_v18  ;;  %2583 = vadd.xlane.f32.xlu1 %v2582_v1 }
 0x2a8   : > { %v2413_v61 = vpop.xlane.xlu0 %2412  ;;  %v2579_v7 = vsel %vm2332_vm1, %v10962_v55, 0.0 }
 0x2a9   : > { %9265 = vpow2.f32 %v2509_v3  ;;  %v2455_v38 = vsub.f32 %v10830_v43, %v2413_v61  ;;  %2580 = vadd.xlane.f32.xlu0 %v2579_v7  ;;  %v10970_v28 = vpop.eup %9255  ;;  %v2515_v47 = vmul.f32 1.442695, %v2456_v60 }
 0x2aa   : > { %v2422_v25 = vpop.xlane.xlu1 %2421  ;;  %v2588_v35 = vsel %vm2332_vm1, %v10970_v28, 0.0 }
 0x2ab   : > { %v10972_v9 = vpop.eup %9257  ;;  %v2513_v63 = vmul.f32 1.442695, %v2455_v38  ;;  %9267 = vpow2.f32 %v2515_v47  ;;  %v2458_v54 = vsub.f32 %v10839_v50, %v2422_v25  ;;  %2589 = vadd.xlane.f32.xlu1 %v2588_v35 }
 0x2ac   : > { %v2419_v44 = vpop.xlane.xlu0 %2418  ;;  %v2585_v8 = vsel %vm2332_vm1, %v10972_v9, 0.0 }
 0x2ad   : > { %9269 = vpow2.f32 %v2513_v63  ;;  %v2457_v43 = vsub.f32 %v10844_v51, %v2419_v44  ;;  %2586 = vadd.xlane.f32.xlu0 %v2585_v8  ;;  %v10980_v53 = vpop.eup %9259  ;;  %v2519_v40 = vmul.f32 1.442695, %v2458_v54 }
 0x2ae   : > { %v2428_v37 = vpop.xlane.xlu1 %2427  ;;  %v2594_v3 = vsel %vm2332_vm1, %v10980_v53, 0.0 }
 0x2af   : > { %v10982_v48 = vpop.eup %9261  ;;  %v2517_v15 = vmul.f32 1.442695, %v2457_v43  ;;  %9271 = vpow2.f32 %v2519_v40  ;;  %v2460_v50 = vsub.f32 %v10853_v20, %v2428_v37  ;;  %2595 = vadd.xlane.f32.xlu1 %v2594_v3 }
 0x2b0   : > { %v2425_v18 = vpop.xlane.xlu0 %2424  ;;  %v2591_v1 = vsel %vm2332_vm1, %v10982_v48, 0.0 }
 0x2b1   : > { %9273 = vpow2.f32 %v2517_v15  ;;  %v2459_v51 = vsub.f32 %v10856_v45, %v2425_v18  ;;  %2592 = vadd.xlane.f32.xlu0 %v2591_v1  ;;  %v10990_v60 = vpop.eup %9263  ;;  %v2523_v61 = vmul.f32 1.442695, %v2460_v50 }
 0x2b2   : > { %v2600_v47 = vsel %vm2332_vm1, %v10990_v60, 0.0 }
 0x2b3   : > { %v10992_v7 = vpop.eup %9265  ;;  %v2521_v38 = vmul.f32 1.442695, %v2459_v51  ;;  %9275 = vpow2.f32 %v2523_v61  ;;  %2601 = vadd.xlane.f32.xlu1 %v2600_v47 }
 0x2b4   : > { %v2597_v20 = vsel %vm2332_vm1, %v10992_v7, 0.0 }
 0x2b5   : > { %9277 = vpow2.f32 %v2521_v38  ;;  %2598 = vadd.xlane.f32.xlu0 %v2597_v20  ;;  %v10998_v63 = vpop.eup %9267 }
 0x2b6   : > { %v2606_v25 = vsel %vm2332_vm1, %v10998_v63, 0.0 }
 0x2b7   : > { %v11000_v45 = vpop.eup %9269  ;;  %2607 = vadd.xlane.f32.xlu1 %v2606_v25 }
 0x2b8   : > { %v2603_v35 = vsel %vm2332_vm1, %v11000_v45, 0.0 }
 0x2b9   : > { %2604 = vadd.xlane.f32.xlu0 %v2603_v35  ;;  %v11006_v54 = vpop.eup %9271 }
 0x2ba   : > { %v2612_v8 = vsel %vm2332_vm1, %v11006_v54, 0.0 }
 0x2bb   : > { %v11008_v44 = vpop.eup %9273  ;;  %2613 = vadd.xlane.f32.xlu1 %v2612_v8 }
 0x2bc   : > { %v2609_v43 = vsel %vm2332_vm1, %v11008_v44, 0.0 }
 0x2bd   : > { %2610 = vadd.xlane.f32.xlu0 %v2609_v43  ;;  %v11014_v40 = vpop.eup %9275 }
 0x2be   : > { %v2618_v37 = vsel %vm2332_vm1, %v11014_v40, 0.0 }
 0x2bf   : > { %v11016_v15 = vpop.eup %9277  ;;  %2619 = vadd.xlane.f32.xlu1 %v2618_v37 }
 0x2c0   : > { %v2615_v3 = vsel %vm2332_vm1, %v11016_v15, 0.0 }
 0x2c1   : > { %2616 = vadd.xlane.f32.xlu0 %v2615_v3 }
 0x310   : > { %v2530_v50 = vpop.xlane.xlu1 %2529 }
 0x311   : > { %9279 = vrcp.f32 %v2530_v50  ;;  %v2527_v18 = vpop.xlane.xlu0 %2526 }
 0x312   : > { %9281 = vrcp.f32 %v2527_v18 }
 0x314   : > { %v2536_v1 = vpop.xlane.xlu1 %2535 }
 0x315   : > { %9283 = vrcp.f32 %v2536_v1  ;;  %v2533_v51 = vpop.xlane.xlu0 %2532 }
 0x316   : > { %9285 = vrcp.f32 %v2533_v51 }
 0x318   : > { %v2542_v61 = vpop.xlane.xlu1 %2541 }
 0x319   : > { %9287 = vrcp.f32 %v2542_v61  ;;  %v2539_v38 = vpop.xlane.xlu0 %2538 }
 0x31a   : > { %9289 = vrcp.f32 %v2539_v38 }
 0x31b   : > { %v9280_v47 = vpop.eup %9279 }
 0x31c   : > { %v9282_v20 = vpop.eup %9281  ;;  %v11023_v25 = vmul.f32 %v9280_v47, %v10870_v27  ;;  %v2548_v35 = vpop.xlane.xlu1 %2547 }
 0x31d   : > { %v11026_v8 = vmul.f32 %v9282_v20, %v10872_v21  ;;  %9291 = vrcp.f32 %v2548_v35  ;;  %v2545_v43 = vpop.xlane.xlu0 %2544 }
 0x31e   : > { %v11030_v37 = vmul.f32 %v10604_v52, %v11023_v25  ;;  %9293 = vrcp.f32 %v2545_v43 }
 0x31f   : > { %v9284_v3 = vpop.eup %9283  ;;  %v11034_v50 = vmul.f32 %v10606_v59, %v11026_v8 }
 0x320   : > { %12745 = vst [vmem:[#allocation165_spill] sm:$0xff] %v11030_v37  ;;  %v9286_v18 = vpop.eup %9285  ;;  %v11037_v27 = vmul.f32 %v9284_v3, %v10880_v42  ;;  %v2554_v1 = vpop.xlane.xlu1 %2553 }
 0x321   : > { %v11040_v21 = vmul.f32 %v9286_v18, %v10882_v10  ;;  %9295 = vrcp.f32 %v2554_v1  ;;  %v2551_v51 = vpop.xlane.xlu0 %2550  ;;  %2726 = vxpose.xlu0.b32.start [1/16] (narrow) (!%p6172_p5), %v11034_v50, 16 }
 0x322   : > { %v11044_v52 = vmul.f32 %v10615_v17, %v11037_v27  ;;  %9297 = vrcp.f32 %v2551_v51 }
 0x323   : > { %v9288_v61 = vpop.eup %9287  ;;  %v11048_v59 = vmul.f32 %v10625_v24, %v11040_v21 }
 0x324   : > { %12746 = vst [vmem:[#allocation166_spill] sm:$0xff] %v11044_v52  ;;  %v9290_v38 = vpop.eup %9289  ;;  %v11051_v42 = vmul.f32 %v9288_v61, %v10890_v0  ;;  %v2560_v47 = vpop.xlane.xlu1 %2559 }
 0x325   : > { %12747 = vst [vmem:[#allocation167_spill] sm:$0xff] %v11048_v59  ;;  %v11054_v10 = vmul.f32 %v9290_v38, %v10892_v2  ;;  %9299 = vrcp.f32 %v2560_v47  ;;  %2727 = vxpose.xlu0.b32.cont [2/16] (narrow) (!%p6172_p5), %v11030_v37, 16  ;;  %v12816_v37 = vld [vmem:[#allocation106_spill] sm:$0xff] (!%p6172_p5) }
 0x326   : > { %v2557_v20 = vpop.xlane.xlu0 %2556  ;;  %v11058_v17 = vmul.f32 %v10631_v11, %v11051_v42 }
 0x327   : > { %9301 = vrcp.f32 %v2557_v20  ;;  %v9292_v35 = vpop.eup %9291  ;;  %v11062_v24 = vmul.f32 %v10636_v46, %v11054_v10 }
 0x328   : > { %12748 = vst [vmem:[#allocation168_spill] sm:$0xff] %v11058_v17  ;;  %v9294_v43 = vpop.eup %9293  ;;  %v11065_v0 = vmul.f32 %v9292_v35, %v10900_v39  ;;  %v2566_v3 = vpop.xlane.xlu1 %2565 }
 0x329   : > { %12749 = vst [vmem:[#allocation169_spill] sm:$0xff] %v11062_v24  ;;  %v11068_v2 = vmul.f32 %v9294_v43, %v10902_v29  ;;  %9303 = vrcp.f32 %v2566_v3  ;;  %2728 = vxpose.xlu0.b32.cont [3/16] (narrow) (!%p6172_p5), %v11048_v59, 16  ;;  %v12818_v59 = vld [vmem:[#allocation45_spill] sm:$0xff] (!%p6172_p5) }
 0x32a   : > { %v2563_v18 = vpop.xlane.xlu0 %2562  ;;  %v11072_v11 = vmul.f32 %v10651_v34, %v11065_v0 }
 0x32b   : > { %9305 = vrcp.f32 %v2563_v18  ;;  %v9296_v1 = vpop.eup %9295  ;;  %v11076_v46 = vmul.f32 %v10656_v6, %v11068_v2 }
 0x32c   : > { %12750 = vst [vmem:[#allocation170_spill] sm:$0xff] %v11072_v11  ;;  %v9298_v51 = vpop.eup %9297  ;;  %v11079_v39 = vmul.f32 %v9296_v1, %v10910_v14  ;;  %v2572_v61 = vpop.xlane.xlu1 %2571 }
 0x32d   : > { %12751 = vst [vmem:[#allocation171_spill] sm:$0xff] %v11076_v46  ;;  %v11082_v29 = vmul.f32 %v9298_v51, %v10912_v57  ;;  %9307 = vrcp.f32 %v2572_v61  ;;  %2729 = vxpose.xlu0.b32.cont [4/16] (narrow) (!%p6172_p5), %v11044_v52, 16  ;;  %v12822_v52 = vld [vmem:[#allocation54_spill] sm:$0xff] (!%p6172_p5) }
 0x32e   : > { %v2569_v38 = vpop.xlane.xlu0 %2568  ;;  %v11086_v34 = vmul.f32 %v10667_v13, %v11079_v39 }
 0x32f   : > { %9309 = vrcp.f32 %v2569_v38  ;;  %v9300_v47 = vpop.eup %9299  ;;  %v11090_v6 = vmul.f32 %v10672_v31, %v11082_v29 }
 0x330   : > { %12752 = vst [vmem:[#allocation172_spill] sm:$0xff] %v11086_v34  ;;  %v11093_v14 = vmul.f32 %v9300_v47, %v10920_v19  ;;  %v2578_v35 = vpop.xlane.xlu1 %2577 }
 0x331   : > { %12753 = vst [vmem:[#allocation173_spill] sm:$0xff] %v11090_v6  ;;  %v9302_v20 = vpop.eup %9301  ;;  %9311 = vrcp.f32 %v2578_v35  ;;  %2730 = vxpose.xlu0.b32.cont [5/16] (narrow) (!%p6172_p5), %v11062_v24, 16  ;;  %v12826_v24 = vld [vmem:[#allocation63_spill] sm:$0xff] (!%p6172_p5) }
 0x332   : > { %12754 = vst [vmem:[#allocation174_spill] sm:$0xff] %v11093_v14  ;;  %v11096_v57 = vmul.f32 %v9302_v20, %v10922_v36  ;;  %v2575_v43 = vpop.xlane.xlu0 %2574  ;;  %v11100_v13 = vmul.f32 %v10687_v58, %v11093_v14 }
 0x333   : > { %9313 = vrcp.f32 %v2575_v43  ;;  %v9304_v3 = vpop.eup %9303 }
 0x334   : > { %12755 = vst [vmem:[#allocation175_spill] sm:$0xff] %v11096_v57  ;;  %12756 = vst [vmem:[#allocation176_spill] sm:$0xff] %v11100_v13  ;;  %v11104_v31 = vmul.f32 %v10692_v32, %v11096_v57  ;;  %v11107_v19 = vmul.f32 %v9304_v3, %v10930_v5  ;;  %v2584_v1 = vpop.xlane.xlu1 %2583 }
 0x335   : > { %v9306_v18 = vpop.eup %9305  ;;  %9315 = vrcp.f32 %v2584_v1  ;;  %2731 = vxpose.xlu0.b32.cont [6/16] (narrow) (!%p6172_p5), %v11058_v17, 16  ;;  %v12830_v17 = vld [vmem:[#allocation74_spill] sm:$0xff] (!%p6172_p5) }
 0x336   : > { %12757 = vst [vmem:[#allocation177_spill] sm:$0xff] %v11104_v31  ;;  %12758 = vst [vmem:[#allocation178_spill] sm:$0xff] %v11107_v19  ;;  %v11110_v36 = vmul.f32 %v9306_v18, %v10932_v4  ;;  %v2581_v51 = vpop.xlane.xlu0 %2580  ;;  %v11114_v58 = vmul.f32 %v10703_v33, %v11107_v19  ;;  %v12781_v19 = vld [vmem:[#allocation158_spill] sm:$0xff] }
 0x337   : > { %9317 = vrcp.f32 %v2581_v51  ;;  %v9308_v61 = vpop.eup %9307 }
 0x338   : > { %12759 = vst [vmem:[#allocation179_spill] sm:$0xff] %v11110_v36  ;;  %12760 = vst [vmem:[#allocation180_spill] sm:$0xff] %v11114_v58  ;;  %v11118_v32 = vmul.f32 %v10708_v30, %v11110_v36  ;;  %v11121_v5 = vmul.f32 %v9308_v61, %v10940_v16  ;;  %v2590_v47 = vpop.xlane.xlu1 %2589 }
 0x339   : > { %v9310_v38 = vpop.eup %9309  ;;  %9319 = vrcp.f32 %v2590_v47  ;;  %v12767_v47 = vld [vmem:[#allocation85_spill] sm:$0xff]  ;;  %2732 = vxpose.xlu0.b32.cont [7/16] (narrow) (!%p6172_p5), %v11076_v46, 16  ;;  %v12834_v46 = vld [vmem:[#allocation47_spill] sm:$0xff] (!%p6172_p5) }
 0x33a   : > { %12761 = vst [vmem:[#allocation181_spill] sm:$0xff] %v11118_v32  ;;  %12762 = vst [vmem:[#allocation182_spill] sm:$0xff] %v11121_v5  ;;  %v11124_v4 = vmul.f32 %v9310_v38, %v10942_v49  ;;  %v2587_v20 = vpop.xlane.xlu0 %2586  ;;  %v11128_v33 = vmul.f32 %v10723_v23, %v11121_v5  ;;  %v12777_v5 = vld [vmem:[#allocation111_spill] sm:$0xff] }
 0x33b   : > { %9321 = vrcp.f32 %v2587_v20  ;;  %v9312_v35 = vpop.eup %9311 }
 0x33c   : > { %12763 = vst [vmem:[#allocation183_spill] sm:$0xff] %v11124_v4  ;;  %12764 = vst [vmem:[#allocation184_spill] sm:$0xff] %v11128_v33  ;;  %v11132_v30 = vmul.f32 %v10728_v62, %v11124_v4  ;;  %v11135_v16 = vmul.f32 %v9312_v35, %v10950_v26  ;;  %v2596_v3 = vpop.xlane.xlu1 %2595  ;;  %v12769_v35 = vld [vmem:[#allocation94_spill] sm:$0xff] }
 0x33d   : > { %v9314_v43 = vpop.eup %9313  ;;  %9323 = vrcp.f32 %v2596_v3  ;;  %2733 = vxpose.xlu0.b32.cont [8/16] (narrow) (!%p6172_p5), %v11072_v11, 16  ;;  %v12840_v11 = vld [vmem:[#allocation126_spill] sm:$0xff] (!%p6172_p5) }
 0x33e   : > { %12765 = vst [vmem:[#allocation185_spill] sm:$0xff] %v11132_v30  ;;  %v11138_v49 = vmul.f32 %v9314_v43, %v10952_v22  ;;  %v2593_v18 = vpop.xlane.xlu0 %2592  ;;  %v11142_v23 = vmul.f32 %v10739_v41, %v11135_v16 }
 0x33f   : > { %9325 = vrcp.f32 %v2593_v18  ;;  %v9316_v1 = vpop.eup %9315 }
 0x340   : > { %12766 = vst [vmem:[#allocation186_spill] sm:$0xff] %v11142_v23  ;;  %v11146_v62 = vmul.f32 %v10744_v56, %v11138_v49  ;;  %v11149_v26 = vmul.f32 %v9316_v1, %v10960_v12  ;;  %v2602_v61 = vpop.xlane.xlu1 %2601  ;;  %v12771_v1 = vld [vmem:[#allocation95_spill] sm:$0xff] }
 0x341   : > { %v9318_v51 = vpop.eup %9317  ;;  %9327 = vrcp.f32 %v2602_v61  ;;  %2734 = vxpose.xlu0.b32.cont [9/16] (narrow) (!%p6172_p5), %v11090_v6, 16 }
 0x342   : > { %v11152_v22 = vmul.f32 %v9318_v51, %v10962_v55  ;;  %v2599_v38 = vpop.xlane.xlu0 %2598  ;;  %v11156_v41 = vmul.f32 %v12767_v47, %v11149_v26  ;;  %3442 = vxpose.xlu1.b32.start [1/16] (narrow) (!%p6172_p5), %v11146_v62, 16 }
 0x343   : > { %9329 = vrcp.f32 %v2599_v38  ;;  %v9320_v20 = vpop.eup %9319  ;;  %v12773_v38 = vld [vmem:[#allocation101_spill] sm:$0xff] }
 0x344   : > { %12768 = vst [vmem:[#allocation85_spill] sm:$0xff] %v11156_v41  ;;  %v11160_v56 = vmul.f32 %v12769_v35, %v11152_v22  ;;  %v11163_v12 = vmul.f32 %v9320_v20, %v10970_v28  ;;  %v2608_v3 = vpop.xlane.xlu1 %2607 }
 0x345   : > { %v9322_v43 = vpop.eup %9321  ;;  %9331 = vrcp.f32 %v2608_v3  ;;  %v12775_v3 = vld [vmem:[#allocation105_spill] sm:$0xff]  ;;  %2735 = vxpose.xlu0.b32.cont [10/16] (narrow) (!%p6172_p5), %v11086_v34, 16 }
 0x346   : > { %12770 = vst [vmem:[#allocation94_spill] sm:$0xff] %v11160_v56  ;;  %v11166_v55 = vmul.f32 %v9322_v43, %v10972_v9  ;;  %v2605_v18 = vpop.xlane.xlu0 %2604  ;;  %v11170_v51 = vmul.f32 %v12771_v1, %v11163_v12  ;;  %3443 = vxpose.xlu1.b32.cont [2/16] (narrow) (!%p6172_p5), %v11142_v23, 16 }
 0x347   : > { %9333 = vrcp.f32 %v2605_v18  ;;  %v9324_v61 = vpop.eup %9323 }
 0x348   : > { %12772 = vst [vmem:[#allocation95_spill] sm:$0xff] %v11170_v51  ;;  %v11174_v47 = vmul.f32 %v12773_v38, %v11166_v55  ;;  %v11177_v28 = vmul.f32 %v9324_v61, %v10980_v53  ;;  %v2614_v20 = vpop.xlane.xlu1 %2613 }
 0x349   : > { %v9326_v35 = vpop.eup %9325  ;;  %9335 = vrcp.f32 %v2614_v20  ;;  %v12779_v20 = vld [vmem:[#allocation115_spill] sm:$0xff]  ;;  %2736 = vxpose.xlu0.b32.cont [11/16] (narrow) (!%p6172_p5), %v11104_v31, 16 }
 0x34a   : > { %12774 = vst [vmem:[#allocation101_spill] sm:$0xff] %v11174_v47  ;;  %v11180_v9 = vmul.f32 %v9326_v35, %v10982_v48  ;;  %v2611_v43 = vpop.xlane.xlu0 %2610  ;;  %v11184_v1 = vmul.f32 %v12775_v3, %v11177_v28  ;;  %3444 = vxpose.xlu1.b32.cont [3/16] (narrow) (!%p6172_p5), %v11160_v56, 16  ;;  %v12820_v56 = vld [vmem:[#allocation117_spill] sm:$0xff] (!%p6172_p5) }
 0x34b   : > { %9337 = vrcp.f32 %v2611_v43  ;;  %v9328_v18 = vpop.eup %9327 }
 0x34c   : > { %12776 = vst [vmem:[#allocation105_spill] sm:$0xff] %v11184_v1  ;;  %v11188_v38 = vmul.f32 %v12777_v5, %v11180_v9  ;;  %v11191_v53 = vmul.f32 %v9328_v18, %v10990_v60  ;;  %v2620_v61 = vpop.xlane.xlu1 %2619 }
 0x34d   : > { %v9330_v4 = vpop.eup %9329  ;;  %9339 = vrcp.f32 %v2620_v61  ;;  %2737 = vxpose.xlu0.b32.cont [12/16] (narrow) (!%p6172_p5), %v11100_v13, 16 }
 0x34e   : > { %12778 = vst [vmem:[#allocation111_spill] sm:$0xff] %v11188_v38  ;;  %v11194_v48 = vmul.f32 %v9330_v4, %v10992_v7  ;;  %v2617_v35 = vpop.xlane.xlu0 %2616  ;;  %v11198_v3 = vmul.f32 %v12779_v20, %v11191_v53  ;;  %v12785_v7 = vld [vmem:[#allocation159_spill] sm:$0xff]  ;;  %v12787_v20 = vld [vmem:[#allocation160_spill] sm:$0xff]  ;;  %3445 = vxpose.xlu1.b32.cont [4/16] (narrow) (!%p6172_p5), %v11156_v41, 16 }
 0x34f   : > { %9341 = vrcp.f32 %v2617_v35  ;;  %v9332_v43 = vpop.eup %9331  ;;  %v12824_v41 = vld [vmem:[#allocation128_spill] sm:$0xff] (!%p6172_p5) }
 0x350   : > { %12780 = vst [vmem:[#allocation115_spill] sm:$0xff] %v11198_v3  ;;  %v11202_v5 = vmul.f32 %v12781_v19, %v11194_v48  ;;  %v11205_v60 = vmul.f32 %v9332_v43, %v10998_v63  ;;  %v12791_v63 = vld [vmem:[#allocation161_spill] sm:$0xff]  ;;  %v12793_v43 = vld [vmem:[#allocation162_spill] sm:$0xff] }
 0x351   : > { %v9334_v36 = vpop.eup %9333  ;;  %2738 = vxpose.xlu0.b32.cont [13/16] (narrow) (!%p6172_p5), %v11118_v32, 16 }
 0x352   : > { %12782 = vst [vmem:[#allocation158_spill] sm:$0xff] %v11202_v5  ;;  %12783 = vst [vmem:[#allocation187_spill] sm:$0xff] %v11205_v60  ;;  %v11208_v18 = vmul.f32 %v9334_v36, %v11000_v45  ;;  %v11212_v4 = vmul.f32 %v12785_v7, %v11205_v60  ;;  %3446 = vxpose.xlu1.b32.cont [5/16] (narrow) (!%p6172_p5), %v11174_v47, 16  ;;  %v12828_v47 = vld [vmem:[#allocation135_spill] sm:$0xff] (!%p6172_p5) }
 0x353   : > { %v9336_v61 = vpop.eup %9335 }
 0x354   : > { %12784 = vst [vmem:[#allocation188_spill] sm:$0xff] %v11208_v18  ;;  %12786 = vst [vmem:[#allocation159_spill] sm:$0xff] %v11212_v4  ;;  %v11216_v35 = vmul.f32 %v12787_v20, %v11208_v18  ;;  %v11219_v19 = vmul.f32 %v9336_v61, %v11006_v54  ;;  %v12797_v54 = vld [vmem:[#allocation163_spill] sm:$0xff] }
 0x355   : > { %v9338_v14 = vpop.eup %9337  ;;  %2739 = vxpose.xlu0.b32.cont [14/16] (narrow) (!%p6172_p5), %v11114_v58, 16 }
 0x356   : > { %12788 = vst [vmem:[#allocation160_spill] sm:$0xff] %v11216_v35  ;;  %12789 = vst [vmem:[#allocation189_spill] sm:$0xff] %v11219_v19  ;;  %v11222_v57 = vmul.f32 %v9338_v14, %v11008_v44  ;;  %v11226_v45 = vmul.f32 %v12791_v63, %v11219_v19  ;;  %v12799_v14 = vld [vmem:[#allocation164_spill] sm:$0xff]  ;;  %3447 = vxpose.xlu1.b32.cont [6/16] (narrow) (!%p6172_p5), %v11170_v51, 16  ;;  %v12832_v51 = vld [vmem:[#allocation143_spill] sm:$0xff] (!%p6172_p5) }
 0x357   : > { %v9340_v36 = vpop.eup %9339  ;;  %v12802_v63 = vld [vmem:[#allocation24_spill] sm:$0xff] (!%p6172_p5) }
 0x358   : > { %12790 = vst [vmem:[#allocation190_spill] sm:$0xff] %v11222_v57  ;;  %12792 = vst [vmem:[#allocation161_spill] sm:$0xff] %v11226_v45  ;;  %v11230_v7 = vmul.f32 %v12793_v43, %v11222_v57  ;;  %v11233_v20 = vmul.f32 %v9340_v36, %v11014_v40  ;;  %2721 = sbr.rel (%p6172_p5) target bundleno = 1354 (0x54a), region = 52  ;;  %v12801_v40 = vld [vmem:[#allocation23_spill] sm:$0xff] (!%p6172_p5) }
 0x359   : > { %v9342_v60 = vpop.eup %9341  ;;  %v11251_v36 = vpack.c.bf16 (!%p6172_p5), %v12802_v63, %v12801_v40  ;;  %v12810_v40 = vld [vmem:[#allocation34_spill] sm:$0xff] (!%p6172_p5)  ;;  %v12811_v63 = vld [vmem:[#allocation93_spill] sm:$0xff] (!%p6172_p5)  ;;  %2740 = vxpose.xlu0.b32.cont [15/16] (narrow) (!%p6172_p5), %v11132_v30, 16 }
 0x35a   : > { %12794 = vst [vmem:[#allocation162_spill] sm:$0xff] %v11230_v7  ;;  %12795 = vst [vmem:[#allocation191_spill] sm:$0xff] %v11233_v20  ;;  %v11236_v18 = vmul.f32 %v9342_v60, %v11016_v15  ;;  %v11240_v44 = vmul.f32 %v12797_v54, %v11233_v20  ;;  %v12803_v15 = vld [vmem:[#allocation76_spill] sm:$0xff] (!%p6172_p5)  ;;  %v12804_v60 = vld [vmem:[#allocation78_spill] sm:$0xff] (!%p6172_p5)  ;;  %3448 = vxpose.xlu1.b32.cont [7/16] (narrow) (!%p6172_p5), %v11188_v38, 16 }
 0x35b   : > { %v11255_v43 = vpack.c.bf16 (!%p6172_p5), %v12804_v60, %v12803_v15  ;;  %v12805_v54 = vld [vmem:[#allocation26_spill] sm:$0xff] (!%p6172_p5)  ;;  %v12806_v20 = vld [vmem:[#allocation27_spill] sm:$0xff] (!%p6172_p5)  ;;  %8057 = vmatprep.subr.bf16.mxu0 (!%p6172_p5), %v11251_v36  ;;  %v12812_v15 = vld [vmem:[#allocation100_spill] sm:$0xff] (!%p6172_p5) }
 0x35c   : > { %12796 = vst [vmem:[#allocation192_spill] sm:$0xff] %v11236_v18  ;;  %12798 = vst [vmem:[#allocation163_spill] sm:$0xff] %v11240_v44  ;;  %v11244_v61 = vmul.f32 %v12799_v14, %v11236_v18  ;;  %v11259_v19 = vpack.c.bf16 (!%p6172_p5), %v12806_v20, %v12805_v54  ;;  %v12807_v14 = vld [vmem:[#allocation84_spill] sm:$0xff] (!%p6172_p5)  ;;  %v12808_v18 = vld [vmem:[#allocation89_spill] sm:$0xff] (!%p6172_p5)  ;;  %8059 = vmatpush3.bf16.msra.mxu0 (!%p6172_p5), %v11251_v36  ;;  %v11279_v60 = vpack.c.bf16 (!%p6172_p5), %v12812_v15, %v12811_v63 }
 0x35d   : > { %v11263_v57 = vpack.c.bf16 (!%p6172_p5), %v12808_v18, %v12807_v14  ;;  %8249 = vmatprep.subr.bf16.mxu1 (!%p6172_p5), %v11255_v43  ;;  %v12809_v20 = vld [vmem:[#allocation30_spill] sm:$0xff] (!%p6172_p5)  ;;  %v12814_v14 = vld [vmem:[#allocation39_spill] sm:$0xff] (!%p6172_p5)  ;;  %v12817_v15 = vld [vmem:[#allocation44_spill] sm:$0xff] (!%p6172_p5)  ;;  %2741 = vxpose.xlu0.b32.end [16/16] (narrow) (!%p6172_p5), %v11128_v33, 16 }
 0x35e   : > { %12800 = vst [vmem:[#allocation164_spill] sm:$0xff] %v11244_v61  ;;  %8251 = vmatpush3.bf16.msra.mxu1 (!%p6172_p5), %v11255_v43  ;;  %8061 = vmatprep.subr.bf16.mxu0 (!%p6172_p5), %v11259_v19  ;;  %v11275_v18 = vpack.c.bf16 (!%p6172_p5), %v12810_v40, %v12809_v20  ;;  %v12813_v54 = vld [vmem:[#allocation38_spill] sm:$0xff] (!%p6172_p5)  ;;  %v12815_v40 = vld [vmem:[#allocation104_spill] sm:$0xff] (!%p6172_p5) }
 0x35f   : > { %8253 = vmatprep.subr.bf16.mxu1 %v11263_v57  ;;  %v11289_v20 = vpack.c.bf16 %v12814_v14, %v12813_v54  ;;  %v11293_v63 = vpack.c.bf16 %v12816_v37, %v12815_v40  ;;  %v11303_v54 = vpack.c.bf16 %v12818_v59, %v12817_v15  ;;  %v12819_v14 = vld [vmem:[#allocation110_spill] sm:$0xff]  ;;  %v12821_v40 = vld [vmem:[#allocation49_spill] sm:$0xff]  ;;  %v12823_v15 = vld [vmem:[#allocation123_spill] sm:$0xff]  ;;  %3449 = vxpose.xlu1.b32.cont [8/16] (narrow) %v11184_v1, 16 }
 0x360   : > { %8063 = vmatpush3.bf16.msra.mxu0 %v11259_v19  ;;  %v11307_v37 = vpack.c.bf16 %v12820_v56, %v12819_v14  ;;  %v11317_v59 = vpack.c.bf16 %v12822_v52, %v12821_v40  ;;  %v11321_v56 = vpack.c.bf16 %v12824_v41, %v12823_v15  ;;  %v12825_v14 = vld [vmem:[#allocation58_spill] sm:$0xff]  ;;  %v12827_v40 = vld [vmem:[#allocation131_spill] sm:$0xff] }
 0x361   : > { %8065 = vmatprep.subr.bf16.mxu0 %v11275_v18  ;;  %v11331_v52 = vpack.c.bf16 %v12826_v24, %v12825_v14  ;;  %v11335_v41 = vpack.c.bf16 %v12828_v47, %v12827_v40  ;;  %v12829_v15 = vld [vmem:[#allocation67_spill] sm:$0xff]  ;;  %v12836_v38 = vld [vmem:[#allocation118_spill] sm:$0xff] }
 0x362   : > { %8255 = vmatpush3.bf16.msra.mxu1 %v11263_v57  ;;  %v11345_v24 = vpack.c.bf16 %v12830_v17, %v12829_v15  ;;  %v12831_v14 = vld [vmem:[#allocation139_spill] sm:$0xff]  ;;  %v12835_v15 = vld [vmem:[#allocation112_spill] sm:$0xff] }
 0x363   : > { %8257 = vmatprep.subr.bf16.mxu1 %v11279_v60  ;;  %v11349_v47 = vpack.c.bf16 %v12832_v51, %v12831_v14  ;;  %v12833_v40 = vld [vmem:[#allocation35_spill] sm:$0xff]  ;;  %v8280_v23 = vpack.c.bf16 %v12836_v38, %v12835_v15  ;;  %3450 = vxpose.xlu1.b32.cont [9/16] (narrow) %v11202_v5, 16  ;;  %v12839_v5 = vld [vmem:[#allocation121_spill] sm:$0xff] }
 0x364   : > { %8067 = vmatpush3.bf16.msra.mxu0 %v11275_v18  ;;  %v8088_v17 = vpack.c.bf16 %v12834_v46, %v12833_v40  ;;  %v8284_v1 = vpack.c.bf16 %v12840_v11, %v12839_v5  ;;  %v12845_v11 = vld [vmem:[#allocation68_spill] sm:$0xff] }
 0x365   : > { %8069 = vmatprep.subr.bf16.mxu0 %v11289_v20 }
 0x366   : > { %8259 = vmatpush3.bf16.msra.mxu1 %v11279_v60 }
 0x367   : > { %8261 = vmatprep.subr.bf16.mxu1 %v11293_v63  ;;  %3451 = vxpose.xlu1.b32.cont [10/16] (narrow) %v11198_v3, 16  ;;  %v12837_v3 = vld [vmem:[#allocation52_spill] sm:$0xff] }
 0x368   : > { %8071 = vmatpush3.bf16.msra.mxu0 %v11289_v20 }
 0x369   : > { %8073 = vmatprep.subr.bf16.mxu0 %v11303_v54 }
 0x36a   : > { %8263 = vmatpush3.bf16.msra.mxu1 %v11293_v63 }
 0x36b   : > { %8265 = vmatprep.subr.bf16.mxu1 %v11307_v37  ;;  %3452 = vxpose.xlu1.b32.cont [11/16] (narrow) %v11216_v35, 16 }
 0x36c   : > { %8075 = vmatpush3.bf16.msra.mxu0 %v11303_v54 }
 0x36d   : > { %8077 = vmatprep.subr.bf16.mxu0 %v11317_v59 }
 0x36e   : > { %8267 = vmatpush3.bf16.msra.mxu1 %v11307_v37 }
 0x36f   : > { %8269 = vmatprep.subr.bf16.mxu1 %v11321_v56  ;;  %3453 = vxpose.xlu1.b32.cont [12/16] (narrow) %v11212_v4, 16 }
 0x370   : > { %8079 = vmatpush3.bf16.msra.mxu0 %v11317_v59 }
 0x371   : > { %8081 = vmatprep.subr.bf16.mxu0 %v11331_v52 }
 0x372   : > { %8271 = vmatpush3.bf16.msra.mxu1 %v11321_v56 }
 0x373   : > { %8273 = vmatprep.subr.bf16.mxu1 %v11335_v41  ;;  %3454 = vxpose.xlu1.b32.cont [13/16] (narrow) %v11230_v7, 16 }
 0x374   : > { %8083 = vmatpush3.bf16.msra.mxu0 %v11331_v52 }
 0x375   : > { %8085 = vmatprep.subr.bf16.mxu0 %v11345_v24 }
 0x376   : > { %8275 = vmatpush3.bf16.msra.mxu1 %v11335_v41 }
 0x377   : > { %8277 = vmatprep.subr.bf16.mxu1 %v11349_v47  ;;  %3455 = vxpose.xlu1.b32.cont [14/16] (narrow) %v11226_v45, 16 }
 0x378   : > { %8087 = vmatpush3.bf16.msra.mxu0 %v11345_v24 }
 0x379   : > { %8089 = vmatprep.subr.bf16.mxu0 %v8088_v17 }
 0x37a   : > { %8279 = vmatpush3.bf16.msra.mxu1 %v11349_v47 }
 0x37b   : > { %8281 = vmatprep.subr.bf16.mxu1 %v8280_v23  ;;  %3456 = vxpose.xlu1.b32.cont [15/16] (narrow) %v11244_v61, 16 }
 0x37f   : > { %3457 = vxpose.xlu1.b32.end [16/16] (narrow) %v11240_v44, 16 }
 0x3a1   : > { %v2742_v51 = vpop.trf.xlu0 }
 0x3a2   : > { %v11381_v14 = vand.u32 4294901760, %v2742_v51 }
 0x3a4   : > { %v11387_v15 = vsub.f32 %v2742_v51, %v11381_v14 }
 0x3a5   : > { %v2743_v61 = vpop.trf.xlu0 }
 0x3a6   : > { %v11391_v30 = vand.u32 4294901760, %v2743_v61  ;;  %v12513_v33 = vand.u32 4294901760, %v11387_v15 }
 0x3a8   : > { %v11399_v7 = vsub.f32 %v2743_v61, %v11391_v30 }
 0x3aa   : > { %v2851_v4 = vand.u32 4294901760, %v11399_v7 }
 0x3c3   : > { %v3458_v46 = vpop.trf.xlu1 }
 0x3c4   : > { %v11379_v38 = vand.u32 4294901760, %v3458_v46 }
 0x3c6   : > { %v11384_v40 = vsub.f32 %v3458_v46, %v11379_v38  ;;  %v2842_v46 = vsub.f32 %v11387_v15, %v12513_v33 }
 0x3c7   : > { %v3459_v58 = vpop.trf.xlu1 }
 0x3c8   : > { %v11389_v45 = vand.u32 4294901760, %v3459_v58  ;;  %v12516_v44 = vand.u32 4294901760, %v11384_v40  ;;  %v2843_v31 = vand.u32 4294901760, %v2842_v46 }
 0x3ca   : > { %v11396_v32 = vsub.f32 %v3459_v58, %v11389_v45  ;;  %v3558_v51 = vsub.f32 %v11384_v40, %v12516_v44  ;;  %7200 = vmatprep.mubr.f32.mxu0 %v2843_v31  ;;  %v2852_v58 = vsub.f32 %v11399_v7, %v2851_v4  ;;  %v12838_v44 = vld [vmem:[#allocation56_spill] sm:$0xff]  ;;  %v12841_v31 = vld [vmem:[#allocation59_spill] sm:$0xff] }
 0x3cb   : > { %v8092_v6 = vpack.c.bf16 %v12838_v44, %v12837_v3  ;;  %v12848_v3 = vld [vmem:[#allocation140_spill] sm:$0xff]  ;;  %v12849_v44 = vld [vmem:[#allocation75_spill] sm:$0xff] }
 0x3cc   : > { %v12521_v13 = vand.u32 4294901760, %v11396_v32  ;;  %v3559_v35 = vand.u32 4294901760, %v3558_v51  ;;  %v2853_v33 = vand.u32 4294901760, %v2852_v58  ;;  %v12843_v51 = vld [vmem:[#allocation129_spill] sm:$0xff] }
 0x3cd   : > { %v12844_v58 = vld [vmem:[#allocation133_spill] sm:$0xff] }
 0x3ce   : > { %7410 = vmatprep.mubr.f32.mxu1 %v3559_v35  ;;  %v3568_v61 = vsub.f32 %v11396_v32, %v12521_v13  ;;  %7201 = vmatmul.mubr.f32.vlgmr.msra.gmra.mrb[0].mxu0 %v2853_v33  ;;  %v12842_v35 = vld [vmem:[#allocation64_spill] sm:$0xff] }
 0x3cf   : > { %8091 = vmatpush3.bf16.msra.mxu0 %v8088_v17  ;;  %7235 = vmatprep.mubr.f32.mxu0 %v11381_v14  ;;  %v8096_v46 = vpack.c.bf16 %v12842_v35, %v12841_v31  ;;  %v12850_v17 = vld [vmem:[#allocation79_spill] sm:$0xff]  ;;  %v12851_v35 = vld [vmem:[#allocation144_spill] sm:$0xff] }
 0x3d0   : > { %v3569_v34 = vand.u32 4294901760, %v3568_v61  ;;  %v8288_v61 = vpack.c.bf16 %v12844_v58, %v12843_v51  ;;  %8093 = vmatprep.subr.bf16.mxu0 %v8092_v6  ;;  %v8104_v31 = vpack.c.bf16 %v12850_v17, %v12849_v44  ;;  %v12852_v51 = vld [vmem:[#allocation147_spill] sm:$0xff]  ;;  %v12856_v13 = vld [vmem:[#allocation152_spill] sm:$0xff]  ;;  %v12859_v44 = vld [vmem:[#allocation154_spill] sm:$0xff] }
 0x3d1   : > { %v8296_v58 = vpack.c.bf16 %v12852_v51, %v12851_v35  ;;  %v12860_v17 = vld [vmem:[#allocation155_spill] sm:$0xff] }
 0x3d2   : > { %7411 = vmatmul.mubr.f32.vlgmr.msra.gmra.mrb[0].mxu1 %v3569_v34  ;;  %v12846_v34 = vld [vmem:[#allocation71_spill] sm:$0xff]  ;;  %v8304_v35 = vpack.c.bf16 %v12860_v17, %v12859_v44 }
 0x3d3   : > { %8283 = vmatpush3.bf16.msra.mxu1 %v8280_v23  ;;  %7445 = vmatprep.mubr.f32.mxu1 %v11379_v38  ;;  %v8100_v33 = vpack.c.bf16 %v12846_v34, %v12845_v11  ;;  %v12847_v23 = vld [vmem:[#allocation136_spill] sm:$0xff]  ;;  %v12855_v34 = vld [vmem:[#allocation150_spill] sm:$0xff] }
 0x3d4   : > { %8285 = vmatprep.subr.bf16.mxu1 %v8284_v1  ;;  %8095 = vmatpush3.bf16.msra.mxu0 %v8092_v6  ;;  %v8292_v5 = vpack.c.bf16 %v12848_v3, %v12847_v23  ;;  %v12853_v6 = vld [vmem:[#allocation82_spill] sm:$0xff]  ;;  %v8300_v23 = vpack.c.bf16 %v12856_v13, %v12855_v34 }
 0x3d5   : > { %8097 = vmatprep.subr.bf16.mxu0 %v8096_v46 }
 0x3d7   : > { %8287 = vmatpush3.bf16.msra.mxu1 %v8284_v1  ;;  %v12854_v1 = vld [vmem:[#allocation87_spill] sm:$0xff] }
 0x3d8   : > { %8289 = vmatprep.subr.bf16.mxu1 %v8288_v61  ;;  %8099 = vmatpush3.bf16.msra.mxu0 %v8096_v46  ;;  %v8108_v11 = vpack.c.bf16 %v12854_v1, %v12853_v6  ;;  %v12857_v46 = vld [vmem:[#allocation90_spill] sm:$0xff]  ;;  %v12863_v6 = vld [vmem:[#allocation156_spill] sm:$0xff]  ;;  %v12864_v1 = vld [vmem:[#allocation157_spill] sm:$0xff] }
 0x3d9   : > { %8101 = vmatprep.subr.bf16.mxu0 %v8100_v33  ;;  %v8308_v13 = vpack.c.bf16 %v12864_v1, %v12863_v6  ;;  %v12875_v1 = vld [vmem:[#allocation103_spill] sm:$0xff] }
 0x3db   : > { %8291 = vmatpush3.bf16.msra.mxu1 %v8288_v61  ;;  %v12858_v61 = vld [vmem:[#allocation96_spill] sm:$0xff] }
 0x3dc   : > { %8293 = vmatprep.subr.bf16.mxu1 %v8292_v5  ;;  %8103 = vmatpush3.bf16.msra.mxu0 %v8100_v33  ;;  %v8112_v3 = vpack.c.bf16 %v12858_v61, %v12857_v46  ;;  %v12861_v33 = vld [vmem:[#allocation98_spill] sm:$0xff]  ;;  %v12867_v46 = vld [vmem:[#allocation83_spill] sm:$0xff] }
 0x3dd   : > { %8105 = vmatprep.subr.bf16.mxu0 %v8104_v31  ;;  %v12868_v61 = vld [vmem:[#allocation86_spill] sm:$0xff] }
 0x3de   : > { %v8312_v44 = vpack.c.bf16 %v12868_v61, %v12867_v46  ;;  %v12878_v46 = vld [vmem:[#allocation46_spill] sm:$0xff] }
 0x3df   : > { %8295 = vmatpush3.bf16.msra.mxu1 %v8292_v5  ;;  %v12862_v5 = vld [vmem:[#allocation107_spill] sm:$0xff] }
 0x3e0   : > { %8297 = vmatprep.subr.bf16.mxu1 %v8296_v58  ;;  %8107 = vmatpush3.bf16.msra.mxu0 %v8104_v31  ;;  %v8116_v51 = vpack.c.bf16 %v12862_v5, %v12861_v33  ;;  %v12865_v31 = vld [vmem:[#allocation25_spill] sm:$0xff]  ;;  %v12871_v33 = vld [vmem:[#allocation92_spill] sm:$0xff]  ;;  %v12872_v5 = vld [vmem:[#allocation99_spill] sm:$0xff] }
 0x3e1   : > { %8109 = vmatprep.subr.bf16.mxu0 %v8108_v11  ;;  %v8316_v6 = vpack.c.bf16 %v12872_v5, %v12871_v33  ;;  %v12882_v33 = vld [vmem:[#allocation53_spill] sm:$0xff] }
 0x3e3   : > { %8299 = vmatpush3.bf16.msra.mxu1 %v8296_v58  ;;  %v12866_v58 = vld [vmem:[#allocation28_spill] sm:$0xff] }
 0x3e4   : > { %8301 = vmatprep.subr.bf16.mxu1 %v8300_v23  ;;  %8111 = vmatpush3.bf16.msra.mxu0 %v8108_v11  ;;  %v8120_v34 = vpack.c.bf16 %v12866_v58, %v12865_v31  ;;  %v12869_v11 = vld [vmem:[#allocation31_spill] sm:$0xff] }
 0x3e5   : > { %8113 = vmatprep.subr.bf16.mxu0 %v8112_v3  ;;  %v12877_v58 = vld [vmem:[#allocation43_spill] sm:$0xff] }
 0x3e6   : > { %v8132_v61 = vpack.c.bf16 %v12878_v46, %v12877_v58  ;;  %v12887_v58 = vld [vmem:[#allocation130_spill] sm:$0xff] }
 0x3e7   : > { %8303 = vmatpush3.bf16.msra.mxu1 %v8300_v23  ;;  %v12870_v23 = vld [vmem:[#allocation32_spill] sm:$0xff]  ;;  %v12888_v46 = vld [vmem:[#allocation134_spill] sm:$0xff] }
 0x3e8   : > { %8305 = vmatprep.subr.bf16.mxu1 %v8304_v35  ;;  %8115 = vmatpush3.bf16.msra.mxu0 %v8112_v3  ;;  %v8124_v17 = vpack.c.bf16 %v12870_v23, %v12869_v11  ;;  %v12873_v3 = vld [vmem:[#allocation36_spill] sm:$0xff]  ;;  %v12881_v23 = vld [vmem:[#allocation51_spill] sm:$0xff] }
 0x3e9   : > { %8117 = vmatprep.subr.bf16.mxu0 %v8116_v51  ;;  %v12880_v11 = vld [vmem:[#allocation116_spill] sm:$0xff]  ;;  %v8136_v5 = vpack.c.bf16 %v12882_v33, %v12881_v23  ;;  %v12891_v23 = vld [vmem:[#allocation138_spill] sm:$0xff] }
 0x3ea   : > { %v12892_v33 = vld [vmem:[#allocation142_spill] sm:$0xff] }
 0x3eb   : > { %8307 = vmatpush3.bf16.msra.mxu1 %v8304_v35  ;;  %v12874_v35 = vld [vmem:[#allocation41_spill] sm:$0xff] }
 0x3ec   : > { %8309 = vmatprep.subr.bf16.mxu1 %v8308_v13  ;;  %8119 = vmatpush3.bf16.msra.mxu0 %v8116_v51  ;;  %v8128_v51 = vpack.c.bf16 %v12874_v35, %v12873_v3  ;;  %v12883_v3 = vld [vmem:[#allocation120_spill] sm:$0xff]  ;;  %v12884_v35 = vld [vmem:[#allocation125_spill] sm:$0xff] }
 0x3ed   : > { %8121 = vmatprep.subr.bf16.mxu0 %v8120_v34 }
 0x3ef   : > { %8311 = vmatpush3.bf16.msra.mxu1 %v8308_v13  ;;  %7236 = vmatmul.mubr.f32.vlgmr.msra.gmra.mrb[0].mxu0 %v11391_v30  ;;  %v12876_v13 = vld [vmem:[#allocation109_spill] sm:$0xff] }
 0x3f0   : > { %8313 = vmatprep.subr.bf16.mxu1 %v8312_v44  ;;  %8123 = vmatpush3.bf16.msra.mxu0 %v8120_v34  ;;  %v8320_v31 = vpack.c.bf16 %v12876_v13, %v12875_v1  ;;  %v12879_v34 = vld [vmem:[#allocation114_spill] sm:$0xff]  ;;  %v8328_v1 = vpack.c.bf16 %v12884_v35, %v12883_v3  ;;  %v8336_v3 = vpack.c.bf16 %v12892_v33, %v12891_v23 }
 0x3f1   : > { %7270 = vmatprep.mubr.f32.mxu0 %v11387_v15  ;;  %8125 = vmatprep.subr.bf16.mxu0 %v8124_v17  ;;  %v12905_v33 = vld [vmem:[#allocation102_spill] sm:$0xff] }
 0x3f2   : > { %7446 = vmatmul.mubr.f32.vlgmr.msra.gmra.mrb[0].mxu1 %v11389_v45 }
 0x3f3   : > { %8315 = vmatpush3.bf16.msra.mxu1 %v8312_v44  ;;  %7480 = vmatprep.mubr.f32.mxu1 %v11384_v40  ;;  %v8324_v44 = vpack.c.bf16 %v12880_v11, %v12879_v34  ;;  %v8332_v34 = vpack.c.bf16 %v12888_v46, %v12887_v58  ;;  %v12901_v46 = vld [vmem:[#allocation91_spill] sm:$0xff] }
 0x3f4   : > { %8317 = vmatprep.subr.bf16.mxu1 %v8316_v6  ;;  %8127 = vmatpush3.bf16.msra.mxu0 %v8124_v17  ;;  %v12885_v17 = vld [vmem:[#allocation57_spill] sm:$0xff] }
 0x3f5   : > { %8129 = vmatprep.subr.bf16.mxu0 %v8128_v51 }
 0x3f7   : > { %8319 = vmatpush3.bf16.msra.mxu1 %v8316_v6  ;;  %v12886_v6 = vld [vmem:[#allocation62_spill] sm:$0xff] }
 0x3f8   : > { %8321 = vmatprep.subr.bf16.mxu1 %v8320_v31  ;;  %8131 = vmatpush3.bf16.msra.mxu0 %v8128_v51  ;;  %v8140_v13 = vpack.c.bf16 %v12886_v6, %v12885_v17  ;;  %v12889_v51 = vld [vmem:[#allocation66_spill] sm:$0xff]  ;;  %v12896_v6 = vld [vmem:[#allocation149_spill] sm:$0xff] }
 0x3f9   : > { %8133 = vmatprep.subr.bf16.mxu0 %v8132_v61  ;;  %v12895_v17 = vld [vmem:[#allocation146_spill] sm:$0xff] }
 0x3fa   : > { %v8340_v58 = vpack.c.bf16 %v12896_v6, %v12895_v17  ;;  %v12909_v17 = vld [vmem:[#allocation48_spill] sm:$0xff] }
 0x3fb   : > { %8323 = vmatpush3.bf16.msra.mxu1 %v8320_v31  ;;  %v12890_v31 = vld [vmem:[#allocation70_spill] sm:$0xff] }
 0x3fc   : > { %8325 = vmatprep.subr.bf16.mxu1 %v8324_v44  ;;  %8135 = vmatpush3.bf16.msra.mxu0 %v8132_v61  ;;  %v8144_v11 = vpack.c.bf16 %v12890_v31, %v12889_v51  ;;  %v12893_v61 = vld [vmem:[#allocation73_spill] sm:$0xff] }
 0x3fd   : > { %8137 = vmatprep.subr.bf16.mxu0 %v8136_v5  ;;  %v12903_v31 = vld [vmem:[#allocation37_spill] sm:$0xff] }
 0x3ff   : > { %8327 = vmatpush3.bf16.msra.mxu1 %v8324_v44  ;;  %v12894_v44 = vld [vmem:[#allocation81_spill] sm:$0xff] }
 0x400   : > { %8329 = vmatprep.subr.bf16.mxu1 %v8328_v1  ;;  %8139 = vmatpush3.bf16.msra.mxu0 %v8136_v5  ;;  %v8148_v35 = vpack.c.bf16 %v12894_v44, %v12893_v61  ;;  %v12897_v5 = vand.u32 4294901760, %v11387_v15  ;;  %v12900_v15 = vld [vmem:[#allocation33_spill] sm:$0xff]  ;;  %v12907_v44 = vand.u32 4294901760, %v11396_v32 }
 0x401   : > { %8141 = vmatprep.subr.bf16.mxu0 %v8140_v13 }
 0x403   : > { %8331 = vmatpush3.bf16.msra.mxu1 %v8328_v1  ;;  %v12898_v1 = vand.u32 4294901760, %v11384_v40  ;;  %v12899_v40 = vld [vmem:[#allocation29_spill] sm:$0xff] }
 0x404   : > { %8333 = vmatprep.subr.bf16.mxu1 %v8332_v34  ;;  %8143 = vmatpush3.bf16.msra.mxu0 %v8140_v13  ;;  %v8184_v13 = vpack.c.bf16 %v12900_v15, %v12899_v40  ;;  %v12914_v40 = vld [vmem:[#allocation122_spill] sm:$0xff]  ;;  %v12915_v15 = vld [vmem:[#allocation124_spill] sm:$0xff] }
 0x405   : > { %8145 = vmatprep.subr.bf16.mxu0 %v8144_v11 }
 0x407   : > { %8335 = vmatpush3.bf16.msra.mxu1 %v8332_v34  ;;  %v12902_v34 = vld [vmem:[#allocation97_spill] sm:$0xff] }
 0x408   : > { %8337 = vmatprep.subr.bf16.mxu1 %v8336_v3  ;;  %8147 = vmatpush3.bf16.msra.mxu0 %v8144_v11  ;;  %v8376_v51 = vpack.c.bf16 %v12902_v34, %v12901_v46  ;;  %v12904_v11 = vld [vmem:[#allocation40_spill] sm:$0xff]  ;;  %v12917_v34 = vld [vmem:[#allocation61_spill] sm:$0xff] }
 0x409   : > { %8149 = vmatprep.subr.bf16.mxu0 %v8148_v35  ;;  %v8188_v23 = vpack.c.bf16 %v12904_v11, %v12903_v31  ;;  %v12916_v46 = vld [vmem:[#allocation60_spill] sm:$0xff]  ;;  %v12918_v31 = vld [vmem:[#allocation127_spill] sm:$0xff] }
 0x40a   : > { %v12919_v11 = vld [vmem:[#allocation132_spill] sm:$0xff] }
 0x40b   : > { %8339 = vmatpush3.bf16.msra.mxu1 %v8336_v3  ;;  %v12906_v3 = vld [vmem:[#allocation108_spill] sm:$0xff] }
 0x40c   : > { %8341 = vmatprep.subr.bf16.mxu1 %v8340_v58  ;;  %8151 = vmatpush3.bf16.msra.mxu0 %v8148_v35  ;;  %v8380_v61 = vpack.c.bf16 %v12906_v3, %v12905_v33  ;;  %v12908_v35 = vld [vmem:[#allocation42_spill] sm:$0xff]  ;;  %v8392_v33 = vpack.c.bf16 %v12919_v11, %v12918_v31  ;;  %v12921_v3 = vld [vmem:[#allocation69_spill] sm:$0xff]  ;;  %v4179_v11 = vsel %vm4167_vm2, %v11068_v2, 0.0 }
 0x40d   : > { %8153 = vmatprep.subr.bf16.mxu0 %v11251_v36  ;;  %v8192_v6 = vpack.c.bf16 %v12909_v17, %v12908_v35  ;;  %v12923_v35 = vld [vmem:[#allocation141_spill] sm:$0xff] }
 0x40f   : > { %8343 = vmatpush3.bf16.msra.mxu1 %v8340_v58  ;;  %7271 = vmatmul.mubr.f32.vlgmr.msra.gmra.mrb[0].mxu0 %v11399_v7  ;;  %v12910_v58 = vld [vmem:[#allocation113_spill] sm:$0xff] }
 0x410   : > { %8345 = vmatprep.subr.bf16.mxu1 %v11255_v43  ;;  %8155 = vmatpush3.bf16.msra.mxu0 %v11251_v36 }
 0x411   : > { %7305 = vmatprep.mubr.f32.mxu0 %v12897_v5  ;;  %8157 = vmatprep.subr.bf16.mxu0 %v11259_v19  ;;  %v12911_v5 = vld [vmem:[#allocation119_spill] sm:$0xff] }
 0x412   : > { %7481 = vmatmul.mubr.f32.vlgmr.msra.gmra.mrb[0].mxu1 %v11396_v32  ;;  %v8384_v7 = vpack.c.bf16 %v12911_v5, %v12910_v58  ;;  %v12913_v32 = vld [vmem:[#allocation55_spill] sm:$0xff]  ;;  %v12925_v58 = vld [vmem:[#allocation77_spill] sm:$0xff] }
 0x413   : > { %8347 = vmatpush3.bf16.msra.mxu1 %v11255_v43  ;;  %7515 = vmatprep.mubr.f32.mxu1 %v12898_v1 }
 0x414   : > { %8349 = vmatprep.subr.bf16.mxu1 %v11263_v57  ;;  %8159 = vmatpush3.bf16.msra.mxu0 %v11259_v19 }
 0x415   : > { %8161 = vmatprep.subr.bf16.mxu0 %v11275_v18 }
 0x417   : > { %8351 = vmatpush3.bf16.msra.mxu1 %v11263_v57 }
 0x418   : > { %8353 = vmatprep.subr.bf16.mxu1 %v11279_v60  ;;  %8163 = vmatpush3.bf16.msra.mxu0 %v11275_v18 }
 0x419   : > { %8165 = vmatprep.subr.bf16.mxu0 %v11289_v20 }
 0x41b   : > { %8355 = vmatpush3.bf16.msra.mxu1 %v11279_v60 }
 0x41c   : > { %8357 = vmatprep.subr.bf16.mxu1 %v11293_v63  ;;  %8167 = vmatpush3.bf16.msra.mxu0 %v11289_v20 }
 0x41d   : > { %8169 = vmatprep.subr.bf16.mxu0 %v11303_v54 }
 0x41f   : > { %8359 = vmatpush3.bf16.msra.mxu1 %v11293_v63 }
 0x420   : > { %8361 = vmatprep.subr.bf16.mxu1 %v11307_v37  ;;  %8171 = vmatpush3.bf16.msra.mxu0 %v11303_v54 }
 0x421   : > { %8173 = vmatprep.subr.bf16.mxu0 %v11317_v59 }
 0x423   : > { %8363 = vmatpush3.bf16.msra.mxu1 %v11307_v37 }
 0x424   : > { %8365 = vmatprep.subr.bf16.mxu1 %v11321_v56  ;;  %8175 = vmatpush3.bf16.msra.mxu0 %v11317_v59 }
 0x425   : > { %8177 = vmatprep.subr.bf16.mxu0 %v11331_v52 }
 0x427   : > { %8367 = vmatpush3.bf16.msra.mxu1 %v11321_v56 }
 0x428   : > { %8369 = vmatprep.subr.bf16.mxu1 %v11335_v41  ;;  %8179 = vmatpush3.bf16.msra.mxu0 %v11331_v52 }
 0x429   : > { %8181 = vmatprep.subr.bf16.mxu0 %v11345_v24 }
 0x42b   : > { %8371 = vmatpush3.bf16.msra.mxu1 %v11335_v41 }
 0x42c   : > { %8373 = vmatprep.subr.bf16.mxu1 %v11349_v47  ;;  %8183 = vmatpush3.bf16.msra.mxu0 %v11345_v24 }
 0x42d   : > { %8185 = vmatprep.subr.bf16.mxu0 %v8184_v13 }
 0x42f   : > { %8375 = vmatpush3.bf16.msra.mxu1 %v11349_v47  ;;  %7306 = vmatmul.mubr.f32.vlgmr.msra.gmra.mrb[0].mxu0 %v2851_v4  ;;  %v12912_v4 = vld [vmem:[#allocation50_spill] sm:$0xff] }
 0x430   : > { %8377 = vmatprep.subr.bf16.mxu1 %v8376_v51  ;;  %8187 = vmatpush3.bf16.msra.mxu0 %v8184_v13  ;;  %v8196_v1 = vpack.c.bf16 %v12913_v32, %v12912_v4  ;;  %v8388_v13 = vpack.c.bf16 %v12915_v15, %v12914_v40  ;;  %v12927_v4 = vld [vmem:[#allocation148_spill] sm:$0xff] }
 0x431   : > { %7340 = vmatprep.mubr.f32.mxu0 %v11381_v14  ;;  %8189 = vmatprep.subr.bf16.mxu0 %v8188_v23  ;;  %v12929_v40 = vld [vmem:[#allocation88_spill] sm:$0xff] }
 0x432   : > { %7516 = vmatmul.mubr.f32.vlgmr.msra.gmra.mrb[0].mxu1 %v12907_v44  ;;  %v12922_v44 = vld [vmem:[#allocation137_spill] sm:$0xff] }
 0x433   : > { %8379 = vmatpush3.bf16.msra.mxu1 %v8376_v51  ;;  %7550 = vmatprep.mubr.f32.mxu1 %v11379_v38  ;;  %v8200_v51 = vpack.c.bf16 %v12917_v34, %v12916_v46  ;;  %v8396_v17 = vpack.c.bf16 %v12923_v35, %v12922_v44  ;;  %v12931_v46 = vld [vmem:[#allocation153_spill] sm:$0xff]  ;;  %v4218_v44 = vsel %vm4167_vm2, %v11177_v28, 0.0 }
 0x434   : > { %8381 = vmatprep.subr.bf16.mxu1 %v8380_v61  ;;  %8191 = vmatpush3.bf16.msra.mxu0 %v8188_v23  ;;  %v12920_v23 = vld [vmem:[#allocation65_spill] sm:$0xff] }
 0x435   : > { %8193 = vmatprep.subr.bf16.mxu0 %v8192_v6 }
 0x437   : > { %8383 = vmatpush3.bf16.msra.mxu1 %v8380_v61  ;;  %v8204_v61 = vpack.c.bf16 %v12921_v3, %v12920_v23 }
 0x438   : > { %8385 = vmatprep.subr.bf16.mxu1 %v8384_v7  ;;  %8195 = vmatpush3.bf16.msra.mxu0 %v8192_v6  ;;  %v12924_v6 = vld [vmem:[#allocation72_spill] sm:$0xff] }
 0x439   : > { %8197 = vmatprep.subr.bf16.mxu0 %v8196_v1  ;;  %v8208_v5 = vpack.c.bf16 %v12925_v58, %v12924_v6  ;;  %v4183_v6 = vsel %vm4167_vm2, %v11082_v29, 0.0  ;;  %v4220_v58 = vsel %vm4167_vm2, %v11194_v48, 0.0 }
 0x43b   : > { %8387 = vmatpush3.bf16.msra.mxu1 %v8384_v7  ;;  %v12926_v7 = vld [vmem:[#allocation145_spill] sm:$0xff] }
 0x43c   : > { %8389 = vmatprep.subr.bf16.mxu1 %v8388_v13  ;;  %8199 = vmatpush3.bf16.msra.mxu0 %v8196_v1  ;;  %v8400_v32 = vpack.c.bf16 %v12927_v4, %v12926_v7  ;;  %v12928_v1 = vld [vmem:[#allocation80_spill] sm:$0xff]  ;;  %v4185_v4 = vsel %vm4167_vm2, %v11079_v39, 0.0 }
 0x43d   : > { %8201 = vmatprep.subr.bf16.mxu0 %v8200_v51  ;;  %v8212_v15 = vpack.c.bf16 %v12929_v40, %v12928_v1 }
 0x43f   : > { %8391 = vmatpush3.bf16.msra.mxu1 %v8388_v13  ;;  %v12930_v13 = vld [vmem:[#allocation151_spill] sm:$0xff] }
 0x440   : > { %8393 = vmatprep.subr.bf16.mxu1 %v8392_v33  ;;  %8203 = vmatpush3.bf16.msra.mxu0 %v8200_v51  ;;  %v8404_v34 = vpack.c.bf16 %v12931_v46, %v12930_v13  ;;  %v12933_v46 = vld [vmem:[#allocation188_spill] sm:$0xff] }
 0x441   : > { %8205 = vmatprep.subr.bf16.mxu0 %v8204_v61 }
 0x443   : > { %8395 = vmatpush3.bf16.msra.mxu1 %v8392_v33  ;;  %v4216_v33 = vsel %vm4167_vm2, %v11180_v9, 0.0 }
 0x444   : > { %8397 = vmatprep.subr.bf16.mxu1 %v8396_v17  ;;  %8207 = vmatpush3.bf16.msra.mxu0 %v8204_v61  ;;  %v4181_v61 = vsel %vm4167_vm2, %v11065_v0, 0.0 }
 0x445   : > { %8209 = vmatprep.subr.bf16.mxu0 %v8208_v5 }
 0x447   : > { %8399 = vmatpush3.bf16.msra.mxu1 %v8396_v17 }
 0x448   : > { %8401 = vmatprep.subr.bf16.mxu1 %v8400_v32  ;;  %8211 = vmatpush3.bf16.msra.mxu0 %v8208_v5 }
 0x449   : > { %8213 = vmatprep.subr.bf16.mxu0 %v8212_v15 }
 0x44b   : > { %8403 = vmatpush3.bf16.msra.mxu1 %v8400_v32  ;;  %v4222_v32 = vsel %vm4167_vm2, %v11191_v53, 0.0 }
 0x44c   : > { %8405 = vmatprep.subr.bf16.mxu1 %v8404_v34  ;;  %8215 = vmatpush3.bf16.msra.mxu0 %v8212_v15  ;;  %v12932_v15 = vld [vmem:[#allocation175_spill] sm:$0xff] }
 0x44d   : > { %8217 = vmatprep.subr.bf16.mxu0 %v11251_v36  ;;  %v4187_v13 = vsel %vm4167_vm2, %v12932_v15, 0.0 }
 0x44f   : > { %8407 = vmatpush3.bf16.msra.mxu1 %v8404_v34  ;;  %7341 = vmatmul.mubr.f32.vlgmr.msra.gmra.mrb[0].mxu0 %v11391_v30  ;;  %v4224_v34 = vsel %vm4167_vm2, %v12933_v46, 0.0 }
 0x450   : > { %8409 = vmatprep.subr.bf16.mxu1 %v11255_v43  ;;  %8219 = vmatpush3.bf16.msra.mxu0 %v11251_v36  ;;  %v4205_v36 = vsel %vm4167_vm2, %v11138_v49, 0.0 }
 0x451   : > { %7375 = vmatprep.mubr.f32.mxu0 %v11381_v14  ;;  %8221 = vmatprep.subr.bf16.mxu0 %v11259_v19  ;;  %v4214_v14 = vsel %vm4167_vm2, %v11163_v12, 0.0 }
 0x452   : > { %7551 = vmatmul.mubr.f32.vlgmr.msra.gmra.mrb[0].mxu1 %v11389_v45 }
 0x453   : > { %8411 = vmatpush3.bf16.msra.mxu1 %v11255_v43  ;;  %7585 = vmatprep.mubr.f32.mxu1 %v11379_v38  ;;  %v4206_v43 = vsel %vm4167_vm2, %v11135_v16, 0.0  ;;  %v4177_v38 = vsel %vm4167_vm2, %v11051_v42, 0.0 }
 0x454   : > { %8413 = vmatprep.subr.bf16.mxu1 %v11263_v57  ;;  %8223 = vmatpush3.bf16.msra.mxu0 %v11259_v19  ;;  %v4169_v19 = vsel %vm4167_vm2, %v11023_v25, 0.0 }
 0x455   : > { %8225 = vmatprep.subr.bf16.mxu0 %v11275_v18 }
 0x457   : > { %8415 = vmatpush3.bf16.msra.mxu1 %v11263_v57  ;;  %v4168_v57 = vsel %vm4167_vm2, %v11026_v8, 0.0 }
 0x458   : > { %8417 = vmatprep.subr.bf16.mxu1 %v11279_v60  ;;  %8227 = vmatpush3.bf16.msra.mxu0 %v11275_v18  ;;  %v4170_v18 = vadd.f32 %v4169_v19, %v4168_v57 }
 0x459   : > { %8229 = vmatprep.subr.bf16.mxu0 %v11289_v20 }
 0x45b   : > { %8419 = vmatpush3.bf16.msra.mxu1 %v11279_v60  ;;  %v4207_v60 = vadd.f32 %v4206_v43, %v4205_v36  ;;  %v12934_v36 = vld [vmem:[#allocation174_spill] sm:$0xff] }
 0x45c   : > { %8421 = vmatprep.subr.bf16.mxu1 %v11293_v63  ;;  %8231 = vmatpush3.bf16.msra.mxu0 %v11289_v20  ;;  %v4189_v43 = vsel %vm4167_vm2, %v12934_v36, 0.0  ;;  %v4166_v36 = vld [vmem:[#allocation3] sm:$0x3] }
 0x45d   : > { %8233 = vmatprep.subr.bf16.mxu0 %v11303_v54 }
 0x45f   : > { %8423 = vmatpush3.bf16.msra.mxu1 %v11293_v63 }
 0x460   : > { %8425 = vmatprep.subr.bf16.mxu1 %v11307_v37  ;;  %8235 = vmatpush3.bf16.msra.mxu0 %v11303_v54  ;;  %v4173_v54 = vsel %vm4167_vm2, %v11037_v27, 0.0 }
 0x461   : > { %8237 = vmatprep.subr.bf16.mxu0 %v11317_v59 }
 0x463   : > { %8427 = vmatpush3.bf16.msra.mxu1 %v11307_v37  ;;  %v4210_v37 = vsel %vm4167_vm2, %v11149_v26, 0.0 }
 0x464   : > { %8429 = vmatprep.subr.bf16.mxu1 %v11321_v56  ;;  %8239 = vmatpush3.bf16.msra.mxu0 %v11317_v59 }
 0x465   : > { %8241 = vmatprep.subr.bf16.mxu0 %v11331_v52 }
 0x467   : > { %8431 = vmatpush3.bf16.msra.mxu1 %v11321_v56 }
 0x468   : > { %8433 = vmatprep.subr.bf16.mxu1 %v11335_v41  ;;  %8243 = vmatpush3.bf16.msra.mxu0 %v11331_v52  ;;  %v4175_v52 = vsel %vm4167_vm2, %v11054_v10, 0.0 }
 0x469   : > { %8245 = vmatprep.subr.bf16.mxu0 %v11345_v24 }
 0x46b   : > { %8435 = vmatpush3.bf16.msra.mxu1 %v11335_v41  ;;  %v4212_v41 = vsel %vm4167_vm2, %v11166_v55, 0.0 }
 0x46c   : > { %8437 = vmatprep.subr.bf16.mxu1 %v11349_v47  ;;  %8247 = vmatpush3.bf16.msra.mxu0 %v11345_v24 }
 0x46f   : > { %8439 = vmatpush3.bf16.msra.mxu1 %v11349_v47  ;;  %7376 = vmatmul.mubr.f32.vlgmr.msra.gmra.mrb[0].mxu0 %v11391_v30  ;;  %v4171_v30 = vsel %vm4167_vm2, %v11040_v21, 0.0 }
 0x470   : > { %v4172_v20 = vadd.f32 %v4171_v30, %v4170_v18  ;;  %v12935_v18 = vld [vmem:[#allocation187_spill] sm:$0xff] }
 0x472   : > { %7586 = vmatmul.mubr.f32.vlgmr.msra.gmra.mrb[0].mxu1 %v11389_v45  ;;  %v4208_v45 = vsel %vm4167_vm2, %v11152_v22, 0.0  ;;  %v4174_v59 = vadd.f32 %v4173_v54, %v4172_v20  ;;  %v12936_v20 = vld [vmem:[#allocation179_spill] sm:$0xff]  ;;  %v12937_v54 = vld [vmem:[#allocation190_spill] sm:$0xff] }
 0x473   : > { %v4209_v63 = vadd.f32 %v4208_v45, %v4207_v60  ;;  %v4226_v60 = vsel %vm4167_vm2, %v12935_v18, 0.0 }
 0x474   : > { %v4176_v24 = vadd.f32 %v4175_v52, %v4174_v59  ;;  %v12938_v52 = vld [vmem:[#allocation178_spill] sm:$0xff] }
 0x475   : > { %v4211_v56 = vadd.f32 %v4210_v37, %v4209_v63  ;;  %v4191_v63 = vsel %vm4167_vm2, %v12936_v20, 0.0  ;;  %v4228_v37 = vsel %vm4167_vm2, %v12937_v54, 0.0 }
 0x476   : > { %v4178_v51 = vadd.f32 %v4177_v38, %v4176_v24  ;;  %v12939_v24 = vld [vmem:[#allocation189_spill] sm:$0xff] }
 0x477   : > { %v4213_v47 = vadd.f32 %v4212_v41, %v4211_v56  ;;  %v4193_v41 = vsel %vm4167_vm2, %v12938_v52, 0.0 }
 0x478   : > { %v4180_v23 = vadd.f32 %v4179_v11, %v4178_v51  ;;  %v12940_v51 = vld [vmem:[#allocation183_spill] sm:$0xff]  ;;  %v12941_v11 = vld [vmem:[#allocation192_spill] sm:$0xff] }
 0x479   : > { %v4215_v31 = vadd.f32 %v4214_v14, %v4213_v47  ;;  %v4230_v47 = vsel %vm4167_vm2, %v12939_v24, 0.0 }
 0x47a   : > { %v4182_v35 = vadd.f32 %v4181_v61, %v4180_v23  ;;  %v12942_v61 = vld [vmem:[#allocation182_spill] sm:$0xff] }
 0x47b   : > { %v4217_v3 = vadd.f32 %v4216_v33, %v4215_v31  ;;  %v4195_v31 = vsel %vm4167_vm2, %v12940_v51, 0.0  ;;  %v4232_v33 = vsel %vm4167_vm2, %v12941_v11, 0.0 }
 0x47c   : > { %v4184_v5 = vadd.f32 %v4183_v6, %v4182_v35  ;;  %v12943_v35 = vld [vmem:[#allocation191_spill] sm:$0xff] }
 0x47d   : > { %v4219_v17 = vadd.f32 %v4218_v44, %v4217_v3  ;;  %v4197_v44 = vsel %vm4167_vm2, %v12942_v61, 0.0 }
 0x47e   : > { %v4186_v1 = vadd.f32 %v4185_v4, %v4184_v5 }
 0x47f   : > { %v4221_v7 = vadd.f32 %v4220_v58, %v4219_v17  ;;  %v4234_v17 = vsel %vm4167_vm2, %v12943_v35, 0.0 }
 0x480   : > { %v4188_v57 = vadd.f32 %v4187_v13, %v4186_v1 }
 0x481   : > { %v4223_v40 = vadd.f32 %v4222_v32, %v4221_v7 }
 0x482   : > { %v4190_v30 = vadd.f32 %v4189_v43, %v4188_v57 }
 0x483   : > { %v4225_v19 = vadd.f32 %v4224_v34, %v4223_v40 }
 0x484   : > { %v4192_v59 = vadd.f32 %v4191_v63, %v4190_v30  ;;  %v2725_v30 = vld [vmem:[#allocation2 + $0x18] sm:$0xff]  ;;  %v2724_v63 = vld [vmem:[#allocation2 + $0x10] sm:$0xff] }
 0x485   : > { %v4227_v45 = vadd.f32 %v4226_v60, %v4225_v19  ;;  %v2723_v60 = vld [vmem:[#allocation2 + $0x8] sm:$0xff] }
 0x486   : > { %v4194_v38 = vadd.f32 %v4193_v41, %v4192_v59 }
 0x487   : > { %v4229_v56 = vadd.f32 %v4228_v37, %v4227_v45  ;;  %v2722_v45 = vld [vmem:[#allocation2] sm:$0xff] }
 0x488   : > { %v4196_v23 = vadd.f32 %v4195_v31, %v4194_v38 }
 0x489   : > { %v4231_v14 = vadd.f32 %v4230_v47, %v4229_v56 }
 0x48a   : > { %v4198_v6 = vadd.f32 %v4197_v44, %v4196_v23 }
 0x48b   : > { %v4233_v3 = vadd.f32 %v4232_v33, %v4231_v14 }
 0x48c   : > { %v4199_v5 = vrot.slane %v4198_v6, 4 }
 0x48d   : > { %v4235_v58 = vadd.f32 %v4234_v17, %v4233_v3 }
 0x48e   : > { %v4200_v4 = vadd.f32 %v4199_v5, %v4198_v6 }
 0x48f   : > { %v4236_v7 = vrot.slane %v4235_v58, 4 }
 0x490   : > { %v4201_v1 = vrot.slane %v4200_v4, 2 }
 0x491   : > { %v4237_v32 = vadd.f32 %v4236_v7, %v4235_v58 }
 0x492   : > { %v4202_v15 = vadd.f32 %v4201_v1, %v4200_v4 }
 0x493   : > { %v4238_v40 = vrot.slane %v4237_v32, 2 }
 0x494   : > { %v4203_v46 = vrot.slane %v4202_v15, 1 }
 0x495   : > { %v4239_v13 = vadd.f32 %v4238_v40, %v4237_v32 }
 0x496   : > { %v4204_v57 = vadd.f32 %v4203_v46, %v4202_v15 }
 0x497   : > { %v4240_v34 = vrot.slane %v4239_v13, 1 }
 0x499   : > { %v4241_v19 = vadd.f32 %v4240_v34, %v4239_v13 }
 0x49b   : > { %v4245_v43 = vsel %vm4244_vm3, %v4241_v19, %v4204_v57 }
 0x49c   : > { %v4247_v18 = vadd.f32 %v4245_v43, %v4166_v36 }
 0x49e   : > { %4249 = vst.msk [vmem:[#allocation3] sm:$0x3] %vm4248_vm4, %v4247_v18 }
 0x542   : > { %v7377_v20 = vpop.f32.mrb[0].mxu0 }
 0x543   : > { %v4159_v54 = vadd.f32 %v7377_v20, %v2723_v60  ;;  %v3432_v59 = vpop.f32.mrb[1].mxu0 }
 0x544   : > { %v4158_v52 = vadd.f32 %v3432_v59, %v2722_v45 }
 0x545   : > { %v7587_v37 = vpop.f32.mrb[0].mxu1  ;;  %4163 = vst [vmem:[#allocation2 + $0x8] sm:$0xff] %v4159_v54 }
 0x546   : > { %v4161_v56 = vadd.f32 %v7587_v37, %v2725_v30  ;;  %v4148_v41 = vpop.f32.mrb[1].mxu1  ;;  %4162 = vst [vmem:[#allocation2] sm:$0xff] %v4158_v52 }
 0x547   : > { %v4160_v24 = vadd.f32 %v4148_v41, %v2724_v63 }
 0x548   : > { %4165 = vst [vmem:[#allocation2 + $0x18] sm:$0xff] %v4161_v56 }
 0x549   : > { %4164 = vst [vmem:[#allocation2 + $0x10] sm:$0xff] %v4160_v24 }
 0x54a PF: > { %p6173_p9 = scmp.ne.s32.totalorder %s9495_s21, 1 }
 0x54b   : > { %v4253_v47 = vlaneseq (!%p6173_p9)  ;;  %s6174_s7 = sshll.u32 (!%p6173_p9), %s9495_s21, 7  ;;  %v12944_v14 = vld [vmem:[#allocation23_spill] sm:$0xff] (!%p6173_p9)  ;;  %v12945_v51 = vld [vmem:[#allocation24_spill] sm:$0xff] (!%p6173_p9)  ;;  %v12947_v33 = vld [vmem:[#allocation78_spill] sm:$0xff] (!%p6173_p9)  ;;  %vm5845_vm5 = vcmask (!%p6173_p9), 130048  }
 0x54c   : > { %4252 = sbr.rel (%p6173_p9) target bundleno = 2231 (0x8b7), region = 56  ;;  %v11661_v38 = vstv (!%p6173_p9), %s6174_s7  ;;  %v11665_v31 = vpack.c.bf16 (!%p6173_p9), %v12945_v51, %v12944_v14  ;;  %v12946_v11 = vld [vmem:[#allocation76_spill] sm:$0xff] (!%p6173_p9)  ;;  %v12948_v3 = vld [vmem:[#allocation26_spill] sm:$0xff] (!%p6173_p9)  ;;  %v12949_v61 = vld [vmem:[#allocation27_spill] sm:$0xff] (!%p6173_p9) }
 0x54d   : > { %v11669_v23 = vpack.c.bf16 (!%p6173_p9), %v12947_v33, %v12946_v11  ;;  %v11673_v44 = vpack.c.bf16 (!%p6173_p9), %v12949_v61, %v12948_v3  ;;  %v11675_v35 = vshrl.u32 (!%p6173_p9), %v4253_v47, 7  ;;  %v12950_v17 = vld [vmem:[#allocation84_spill] sm:$0xff] (!%p6173_p9)  ;;  %v12951_v6 = vld [vmem:[#allocation89_spill] sm:$0xff] (!%p6173_p9)  ;;  %v12952_v5 = vld [vmem:[#allocation30_spill] sm:$0xff] (!%p6173_p9) }
 0x54e   : > { %v11679_v58 = vpack.c.bf16 (!%p6173_p9), %v12951_v6, %v12950_v17  ;;  %8441 = vmatprep.subr.bf16.mxu0 (!%p6173_p9), %v11665_v31  ;;  %v12953_v7 = vld [vmem:[#allocation34_spill] sm:$0xff] (!%p6173_p9)  ;;  %v12954_v32 = vld [vmem:[#allocation93_spill] sm:$0xff] (!%p6173_p9)  ;;  %v12955_v1 = vld [vmem:[#allocation100_spill] sm:$0xff] (!%p6173_p9) }
 0x54f   : > { %8633 = vmatprep.subr.bf16.mxu1 (!%p6173_p9), %v11669_v23  ;;  %v11685_v4 = vpack.c.bf16 (!%p6173_p9), %v12953_v7, %v12952_v5  ;;  %v11689_v40 = vpack.c.bf16 (!%p6173_p9), %v12955_v1, %v12954_v32  ;;  %v12956_v15 = vld [vmem:[#allocation38_spill] sm:$0xff] (!%p6173_p9)  ;;  %v12957_v13 = vld [vmem:[#allocation39_spill] sm:$0xff] (!%p6173_p9)  ;;  %v4272_v34 = vadd.s32 (!%p6173_p9), %v11661_v38, %v11675_v35  ;;  %v4255_v57 = vadd.s32 (!%p6173_p9), 8, %v11675_v35  ;;  %8443 = vmatpush3.bf16.msra.mxu0 (!%p6173_p9), %v11665_v31  ;;  %v12958_v30 = vld [vmem:[#allocation104_spill] sm:$0xff] (!%p6173_p9) }
 0x550   : > { %v11693_v46 = vpack.c.bf16 (!%p6173_p9), %v12957_v13, %v12956_v15  ;;  %v4256_v19 = vadd.s32 (!%p6173_p9), 16, %v11675_v35  ;;  %v4257_v36 = vadd.s32 (!%p6173_p9), 24, %v11675_v35  ;;  %8635 = vmatpush3.bf16.msra.mxu1 (!%p6173_p9), %v11669_v23  ;;  %v4258_v43 = vadd.s32 (!%p6173_p9), 32, %v11675_v35  ;;  %8445 = vmatprep.subr.bf16.mxu0 (!%p6173_p9), %v11673_v44  ;;  %v12959_v45 = vld [vmem:[#allocation106_spill] sm:$0xff] (!%p6173_p9)  ;;  %v12961_v33 = vld [vmem:[#allocation165_spill] sm:$0xff] (!%p6173_p9)  ;;  %v12963_v32 = vld [vmem:[#allocation167_spill] sm:$0xff] (!%p6173_p9) }
 0x551   : > { %v4259_v18 = vadd.s32 (!%p6173_p9), 40, %v11675_v35  ;;  %v11705_v60 = vadd.s32 (!%p6173_p9), 48, %v11675_v35  ;;  %8637 = vmatprep.subr.bf16.mxu1 (!%p6173_p9), %v11679_v58  ;;  %v11711_v20 = vpack.c.bf16 (!%p6173_p9), %v12959_v45, %v12958_v30  ;;  %vm4288_vm6 = vcmp.lt.s32.totalorder (!%p6173_p9), %v4272_v34, 200  ;;  %v12960_v14 = vld [vmem:[#allocation186_spill] sm:$0xff] (!%p6173_p9)  ;;  %v12965_v30 = vld [vmem:[#allocation45_spill] sm:$0xff] (!%p6173_p9) }
 0x552   : > { %v4273_v63 = vadd.s32 (!%p6173_p9), %v11661_v38, %v4255_v57  ;;  %v4274_v54 = vadd.s32 (!%p6173_p9), %v11661_v38, %v4256_v19  ;;  %v4275_v37 = vadd.s32 (!%p6173_p9), %v11661_v38, %v4257_v36  ;;  %v4384_v59 = vsel (!%p6173_p9), %vm4288_vm6, %v11146_v62, 0.0  ;;  %v12962_v17 = vld [vmem:[#allocation94_spill] sm:$0xff] (!%p6173_p9) }
 0x553   : > { %v4336_v56 = vsel %vm4288_vm6, %v11026_v8, 0.0  ;;  %v4352_v52 = vsel %vm4288_vm6, %v11138_v49, 0.0  ;;  %v4368_v41 = vsel %vm4288_vm6, %v11034_v50, 0.0  ;;  %5120 = vxpose.xlu1.b32.start [1/16] (narrow) %v4384_v59, 16  ;;  %8447 = vmatpush3.bf16.msra.mxu0 %v11673_v44  ;;  %v4261_v36 = vadd.s32 56, %v11675_v35 }
 0x554   : > { %v5846_v24 = vsel %vm5845_vm5, %v4336_v56, 0.0  ;;  %v5883_v47 = vsel %vm5845_vm5, %v4352_v52, 0.0  ;;  %4404 = vxpose.xlu0.b32.start [1/16] (narrow) %v4368_v41, 16  ;;  %vm4289_vm7 = vcmp.lt.s32.totalorder %v4273_v63, 200  ;;  %vm4290_vm8 = vcmp.lt.s32.totalorder %v4274_v54, 200  ;;  %8639 = vmatpush3.bf16.msra.mxu1 %v11679_v58  ;;  %v12966_v54 = vld [vmem:[#allocation85_spill] sm:$0xff] }
 0x555   : > { %v4385_v51 = vsel %vm4289_vm7, %v12960_v14, 0.0  ;;  %v4337_v11 = vsel %vm4289_vm7, %v11023_v25, 0.0  ;;  %v4353_v62 = vsel %vm4289_vm7, %v11135_v16, 0.0  ;;  %v4369_v8 = vsel %vm4289_vm7, %v12961_v33, 0.0  ;;  %8449 = vmatprep.subr.bf16.mxu0 %v11685_v4  ;;  %8641 = vmatprep.subr.bf16.mxu1 %v11689_v40  ;;  %v12967_v56 = vld [vmem:[#allocation166_spill] sm:$0xff] }
 0x556   : > { %v5847_v50 = vsel %vm5845_vm5, %v4337_v11, 0.0  ;;  %v5884_v49 = vsel %vm5845_vm5, %v4353_v62, 0.0  ;;  %v4338_v3 = vsel %vm4290_vm8, %v11040_v21, 0.0  ;;  %v4354_v61 = vsel %vm4290_vm8, %v11152_v22, 0.0 }
 0x557   : > { %v5848_v25 = vadd.f32 %v5847_v50, %v5846_v24  ;;  %v5885_v16 = vadd.f32 %v5884_v49, %v5883_v47  ;;  %v4386_v6 = vsel %vm4290_vm8, %v12962_v17, 0.0  ;;  %v5849_v5 = vsel %vm5845_vm5, %v4338_v3, 0.0  ;;  %5121 = vxpose.xlu1.b32.cont [2/16] (narrow) %v4385_v51, 16  ;;  %8451 = vmatpush3.bf16.msra.mxu0 %v11685_v4  ;;  %v12968_v50 = vld [vmem:[#allocation101_spill] sm:$0xff] }
 0x558   : > { %4405 = vxpose.xlu0.b32.cont [2/16] (narrow) %v4369_v8, 16  ;;  %v5886_v7 = vsel %vm5845_vm5, %v4354_v61, 0.0  ;;  %v4370_v21 = vsel %vm4290_vm8, %v12963_v32, 0.0  ;;  %vm4291_vm9 = vcmp.lt.s32.totalorder %v4275_v37, 200  ;;  %v4276_v22 = vadd.s32 %v11661_v38, %v4258_v43  ;;  %8643 = vmatpush3.bf16.msra.mxu1 %v11689_v40  ;;  %v12964_v43 = vld [vmem:[#allocation44_spill] sm:$0xff] }
 0x559   : > { %v5850_v1 = vadd.f32 %v5849_v5, %v5848_v25  ;;  %v5887_v15 = vadd.f32 %v5886_v7, %v5885_v16  ;;  %v4339_v13 = vsel %vm4291_vm9, %v11037_v27, 0.0  ;;  %v4355_v34 = vsel %vm4291_vm9, %v11149_v26, 0.0  ;;  %8453 = vmatprep.subr.bf16.mxu0 %v11693_v46  ;;  %8645 = vmatprep.subr.bf16.mxu1 %v11711_v20 }
 0x55a   : > { %v5851_v57 = vsel %vm5845_vm5, %v4339_v13, 0.0  ;;  %v5888_v19 = vsel %vm5845_vm5, %v4355_v34, 0.0  ;;  %v11756_v27 = vpack.c.bf16 %v12965_v30, %v12964_v43  ;;  %vm4292_vm10 = vcmp.lt.s32.totalorder %v4276_v22, 200  ;;  %v12973_v43 = vld [vmem:[#allocation171_spill] sm:$0xff] }
 0x55b   : > { %v5852_v45 = vadd.f32 %v5851_v57, %v5850_v1  ;;  %v5889_v26 = vadd.f32 %v5888_v19, %v5887_v15  ;;  %v4277_v63 = vadd.s32 %v11661_v38, %v4259_v18  ;;  %5122 = vxpose.xlu1.b32.cont [3/16] (narrow) %v4386_v6, 16  ;;  %v4387_v59 = vsel %vm4291_vm9, %v12966_v54, 0.0  ;;  %8455 = vmatpush3.bf16.msra.mxu0 %v11693_v46  ;;  %v12971_v1 = vld [vmem:[#allocation168_spill] sm:$0xff]  ;;  %v12972_v19 = vld [vmem:[#allocation111_spill] sm:$0xff] }
 0x55c   : > { %4406 = vxpose.xlu0.b32.cont [3/16] (narrow) %v4370_v21, 16  ;;  %v4371_v52 = vsel %vm4291_vm9, %v12967_v56, 0.0  ;;  %v4340_v41 = vsel %vm4292_vm10, %v11054_v10, 0.0  ;;  %v4356_v24 = vsel %vm4292_vm10, %v11166_v55, 0.0  ;;  %v4278_v18 = vadd.s32 %v11661_v38, %v11705_v60  ;;  %8647 = vmatpush3.bf16.msra.mxu1 %v11711_v20  ;;  %v12970_v21 = vld [vmem:[#allocation95_spill] sm:$0xff] }
 0x55d   : > { %v5853_v47 = vsel %vm5845_vm5, %v4340_v41, 0.0  ;;  %v5890_v14 = vsel %vm5845_vm5, %v4356_v24, 0.0  ;;  %vm4293_vm11 = vcmp.lt.s32.totalorder %v4277_v63, 200  ;;  %8457 = vmatprep.subr.bf16.mxu0 %v11756_v27  ;;  %v4279_v8 = vadd.s32 %v11661_v38, %v4261_v36 }
 0x55e   : > { %v5854_v37 = vadd.f32 %v5853_v47, %v5852_v45  ;;  %v5891_v51 = vadd.f32 %v5890_v14, %v5889_v26  ;;  %v4341_v10 = vsel %vm4293_vm11, %v11051_v42, 0.0  ;;  %v4357_v55 = vsel %vm4293_vm11, %v11163_v12, 0.0  ;;  %v12969_v42 = vld [vmem:[#allocation169_spill] sm:$0xff] }
 0x55f   : > { %v5855_v11 = vsel %vm5845_vm5, %v4341_v10, 0.0  ;;  %v5892_v62 = vsel %vm5845_vm5, %v4357_v55, 0.0  ;;  %5123 = vxpose.xlu1.b32.cont [4/16] (narrow) %v4387_v59, 16  ;;  %vm4294_vm12 = vcmp.lt.s32.totalorder %v4278_v18, 200  ;;  %v4388_v49 = vsel %vm4292_vm10, %v12968_v50, 0.0  ;;  %8459 = vmatpush3.bf16.msra.mxu0 %v11756_v27 }
 0x560   : > { %4407 = vxpose.xlu0.b32.cont [4/16] (narrow) %v4371_v52, 16  ;;  %v5856_v60 = vadd.f32 %v5855_v11, %v5854_v37  ;;  %v5893_v33 = vadd.f32 %v5892_v62, %v5891_v51  ;;  %v4372_v3 = vsel %vm4292_vm10, %v12969_v42, 0.0  ;;  %v4342_v12 = vsel %vm4294_vm12, %v11068_v2, 0.0  ;;  %v12975_v37 = vld [vmem:[#allocation170_spill] sm:$0xff] }
 0x561   : > { %v4358_v61 = vsel %vm4294_vm12, %v11180_v9, 0.0  ;;  %v5857_v25 = vsel %vm5845_vm5, %v4342_v12, 0.0  ;;  %vm4295_vm13 = vcmp.lt.s32.totalorder %v4279_v8, 200  ;;  %v4262_v17 = vadd.s32 64, %v11675_v35 }
 0x562   : > { %v5894_v16 = vsel %vm5845_vm5, %v4358_v61, 0.0  ;;  %v5858_v6 = vadd.f32 %v5857_v25, %v5856_v60  ;;  %v4343_v7 = vsel %vm4295_vm13, %v11065_v0, 0.0  ;;  %v4359_v2 = vsel %vm4295_vm13, %v11177_v28, 0.0  ;;  %v12976_v60 = vld [vmem:[#allocation175_spill] sm:$0xff] }
 0x563   : > { %v5895_v5 = vadd.f32 %v5894_v16, %v5893_v33  ;;  %5124 = vxpose.xlu1.b32.cont [5/16] (narrow) %v4388_v49, 16  ;;  %v5859_v9 = vsel %vm5845_vm5, %v4343_v7, 0.0  ;;  %v5896_v32 = vsel %vm5845_vm5, %v4359_v2, 0.0  ;;  %v4389_v22 = vsel %vm4293_vm11, %v12970_v21, 0.0  ;;  %v12977_v33 = vld [vmem:[#allocation188_spill] sm:$0xff]  ;;  %v12978_v16 = vld [vmem:[#allocation174_spill] sm:$0xff] }
 0x564   : > { %4408 = vxpose.xlu0.b32.cont [5/16] (narrow) %v4372_v3, 16  ;;  %v4373_v15 = vsel %vm4293_vm11, %v12971_v1, 0.0  ;;  %v4280_v13 = vadd.s32 %v11661_v38, %v4262_v17  ;;  %v4263_v34 = vadd.s32 72, %v11675_v35  ;;  %v5860_v0 = vadd.f32 %v5859_v9, %v5858_v6  ;;  %v12979_v6 = vld [vmem:[#allocation187_spill] sm:$0xff]  ;;  %v12980_v7 = vld [vmem:[#allocation158_spill] sm:$0xff]  ;;  %v12981_v9 = vld [vmem:[#allocation173_spill] sm:$0xff] }
 0x565   : > { %v5897_v57 = vadd.f32 %v5896_v32, %v5895_v5  ;;  %v4264_v28 = vadd.s32 80, %v11675_v35  ;;  %v4390_v36 = vsel %vm4294_vm12, %v12972_v19, 0.0  ;;  %v4374_v30 = vsel %vm4294_vm12, %v12973_v43, 0.0 }
 0x566   : > { %vm4296_vm14 = vcmp.lt.s32.totalorder %v4280_v13, 200  ;;  %v4281_v45 = vadd.s32 %v11661_v38, %v4263_v34  ;;  %v4265_v54 = vadd.s32 88, %v11675_v35  ;;  %v4266_v59 = vadd.s32 96, %v11675_v35 }
 0x567   : > { %5125 = vxpose.xlu1.b32.cont [6/16] (narrow) %v4389_v22, 16  ;;  %v4344_v26 = vsel %vm4296_vm14, %v11082_v29, 0.0  ;;  %v4360_v63 = vsel %vm4296_vm14, %v11194_v48, 0.0  ;;  %v4282_v41 = vadd.s32 %v11661_v38, %v4264_v28  ;;  %v12974_v48 = vld [vmem:[#allocation105_spill] sm:$0xff]  ;;  %v4375_v51 = vsel %vm4295_vm13, %v12975_v37, 0.0  ;;  %v12983_v28 = vld [vmem:[#allocation190_spill] sm:$0xff] }
 0x568   : > { %4409 = vxpose.xlu0.b32.cont [6/16] (narrow) %v4373_v15, 16  ;;  %v5861_v56 = vsel %vm5845_vm5, %v4344_v26, 0.0  ;;  %v5898_v52 = vsel %vm5845_vm5, %v4360_v63, 0.0  ;;  %vm4297_vm15 = vcmp.lt.s32.totalorder %v4281_v45, 200  ;;  %v4391_v18 = vsel %vm4295_vm13, %v12974_v48, 0.0 }
 0x569   : > { %v5862_v24 = vadd.f32 %v5861_v56, %v5860_v0  ;;  %v5899_v47 = vadd.f32 %v5898_v52, %v5897_v57  ;;  %v4345_v14 = vsel %vm4297_vm15, %v11079_v39, 0.0  ;;  %v4361_v29 = vsel %vm4297_vm15, %v11191_v53, 0.0  ;;  %v12982_v0 = vld [vmem:[#allocation179_spill] sm:$0xff]  ;;  %v12985_v56 = vld [vmem:[#allocation189_spill] sm:$0xff] }
 0x56a   : > { %v5863_v10 = vsel %vm5845_vm5, %v4345_v14, 0.0  ;;  %v5900_v55 = vsel %vm5845_vm5, %v4361_v29, 0.0  ;;  %vm4298_vm0 = vcmp.lt.s32.totalorder %v4282_v41, 200  ;;  %v11831_v39 = vadd.s32 %v11661_v38, %v4265_v54  ;;  %v12984_v54 = vld [vmem:[#allocation178_spill] sm:$0xff]  ;;  %v12987_v14 = vld [vmem:[#allocation172_spill] sm:$0xff] }
 0x56b   : > { %5126 = vxpose.xlu1.b32.cont [7/16] (narrow) %v4390_v36, 16  ;;  %v5864_v11 = vadd.f32 %v5863_v10, %v5862_v24  ;;  %v5901_v62 = vadd.f32 %v5900_v55, %v5899_v47  ;;  %v4346_v53 = vsel %vm4298_vm0, %v12976_v60, 0.0  ;;  %v4362_v50 = vsel %vm4298_vm0, %v12977_v33, 0.0  ;;  %v12986_v24 = vld [vmem:[#allocation115_spill] sm:$0xff]  ;;  %v12988_v55 = vld [vmem:[#allocation160_spill] sm:$0xff] }
 0x56c   : > { %4410 = vxpose.xlu0.b32.cont [7/16] (narrow) %v4374_v30, 16  ;;  %v4267_v8 = vadd.s32 104, %v11675_v35  ;;  %v4268_v49 = vadd.s32 112, %v11675_v35  ;;  %v5865_v42 = vsel %vm5845_vm5, %v4346_v53, 0.0  ;;  %v5902_v3 = vsel %vm5845_vm5, %v4362_v50, 0.0  ;;  %v12990_v53 = vld [vmem:[#allocation183_spill] sm:$0xff] }
 0x56d   : > { %vm4299_vm1 = vcmp.lt.s32.totalorder %v11831_v39, 200  ;;  %v11843_v12 = vadd.s32 %v11661_v38, %v4266_v59  ;;  %v5866_v61 = vadd.f32 %v5865_v42, %v5864_v11  ;;  %v5903_v25 = vadd.f32 %v5902_v3, %v5901_v62  ;;  %v12989_v62 = vld [vmem:[#allocation177_spill] sm:$0xff]  ;;  %v12991_v33 = vld [vmem:[#allocation192_spill] sm:$0xff]  ;;  %v13006_v39 = vld [vmem:[#allocation67_spill] sm:$0xff] }
 0x56e   : > { %v4347_v17 = vsel %vm4299_vm1, %v12978_v16, 0.0  ;;  %v4363_v5 = vsel %vm4299_vm1, %v12979_v6, 0.0  ;;  %v4392_v2 = vsel %vm4296_vm14, %v12980_v7, 0.0  ;;  %v4376_v32 = vsel %vm4296_vm14, %v12981_v9, 0.0  ;;  %v12993_v42 = vld [vmem:[#allocation117_spill] sm:$0xff] }
 0x56f   : > { %5127 = vxpose.xlu1.b32.cont [8/16] (narrow) %v4391_v18, 16  ;;  %v5867_v21 = vsel %vm5845_vm5, %v4347_v17, 0.0  ;;  %v5904_v22 = vsel %vm5845_vm5, %v4363_v5, 0.0  ;;  %vm4300_vm2 = vcmp.lt.s32.totalorder %v11843_v12, 200  ;;  %v11859_v34 = vadd.s32 %v11661_v38, %v4267_v8  ;;  %v12995_v17 = vld [vmem:[#allocation191_spill] sm:$0xff] }
 0x570   : > { %4411 = vxpose.xlu0.b32.cont [8/16] (narrow) %v4375_v51, 16  ;;  %v5868_v1 = vadd.f32 %v5867_v21, %v5866_v61  ;;  %v5905_v15 = vadd.f32 %v5904_v22, %v5903_v25  ;;  %v4348_v57 = vsel %vm4300_vm2, %v12982_v0, 0.0  ;;  %v4364_v13 = vsel %vm4300_vm2, %v12983_v28, 0.0  ;;  %v12994_v25 = vld [vmem:[#allocation182_spill] sm:$0xff] }
 0x571   : > { %v4269_v19 = vadd.s32 120, %v11675_v35  ;;  %v5869_v36 = vsel %vm5845_vm5, %v4348_v57, 0.0  ;;  %v5906_v43 = vsel %vm5845_vm5, %v4364_v13, 0.0  ;;  %vm4301_vm3 = vcmp.lt.s32.totalorder %v11859_v34, 200  ;;  %v12997_v21 = vld [vmem:[#allocation54_spill] sm:$0xff]  ;;  %v13000_v57 = vld [vmem:[#allocation159_spill] sm:$0xff] }
 0x572   : > { %v11872_v30 = vadd.s32 %v11661_v38, %v4268_v49  ;;  %v5870_v26 = vadd.f32 %v5869_v36, %v5868_v1  ;;  %v5907_v63 = vadd.f32 %v5906_v43, %v5905_v15  ;;  %v4349_v59 = vsel %vm4301_vm3, %v12984_v54, 0.0  ;;  %v12992_v49 = vld [vmem:[#allocation110_spill] sm:$0xff]  ;;  %v12998_v1 = vld [vmem:[#allocation123_spill] sm:$0xff]  ;;  %v12999_v15 = vld [vmem:[#allocation128_spill] sm:$0xff] }
 0x573   : > { %5128 = vxpose.xlu1.b32.cont [9/16] (narrow) %v4392_v2, 16  ;;  %v4365_v52 = vsel %vm4301_vm3, %v12985_v56, 0.0  ;;  %v4393_v47 = vsel %vm4297_vm15, %v12986_v24, 0.0  ;;  %v4377_v29 = vsel %vm4297_vm15, %v12987_v14, 0.0  ;;  %v5871_v48 = vsel %vm5845_vm5, %v4349_v59, 0.0  ;;  %v13001_v13 = vld [vmem:[#allocation58_spill] sm:$0xff] }
 0x574   : > { %4412 = vxpose.xlu0.b32.cont [9/16] (narrow) %v4376_v32, 16  ;;  %v5908_v18 = vsel %vm5845_vm5, %v4365_v52, 0.0  ;;  %v5872_v37 = vadd.f32 %v5871_v48, %v5870_v26  ;;  %vm4302_vm4 = vcmp.lt.s32.totalorder %v11872_v30, 200  ;;  %v11888_v10 = vadd.s32 %v11661_v38, %v4269_v19  ;;  %v12996_v32 = vld [vmem:[#allocation49_spill] sm:$0xff]  ;;  %v13002_v19 = vld [vmem:[#allocation63_spill] sm:$0xff]  ;;  %v13003_v43 = vld [vmem:[#allocation176_spill] sm:$0xff] }
 0x575   : > { %v5909_v51 = vadd.f32 %v5908_v18, %v5907_v63  ;;  %v4394_v11 = vsel %vm4298_vm0, %v12988_v55, 0.0  ;;  %v4378_v60 = vsel %vm4298_vm0, %v12989_v62, 0.0  ;;  %v4350_v45 = vsel %vm4302_vm4, %v12990_v53, 0.0  ;;  %v13004_v59 = vld [vmem:[#allocation131_spill] sm:$0xff]  ;;  %v13007_v14 = vld [vmem:[#allocation74_spill] sm:$0xff]  ;;  %v13018_v34 = vld [vmem:[#allocation164_spill] sm:$0xff] }
 0x576   : > { %v4366_v50 = vsel %vm4302_vm4, %v12991_v33, 0.0  ;;  %v5873_v8 = vsel %vm5845_vm5, %v4350_v45, 0.0  ;;  %vm4303_vm6 = vcmp.lt.s32.totalorder %v11888_v10, 200  ;;  %v11905_v41 = vpack.c.bf16 %v12993_v42, %v12992_v49  ;;  %v13005_v56 = vld [vmem:[#allocation135_spill] sm:$0xff]  ;;  %v13008_v48 = vld [vmem:[#allocation162_spill] sm:$0xff]  ;;  %v13015_v42 = vld [vmem:[#allocation180_spill] sm:$0xff] }
 0x577   : > { %5129 = vxpose.xlu1.b32.cont [10/16] (narrow) %v4393_v47, 16  ;;  %v5910_v38 = vsel %vm5845_vm5, %v4366_v50, 0.0  ;;  %v5874_v3 = vadd.f32 %v5873_v8, %v5872_v37  ;;  %v4351_v16 = vsel %vm4303_vm6, %v12994_v25, 0.0  ;;  %v4367_v6 = vsel %vm4303_vm6, %v12995_v17, 0.0  ;;  %v13009_v37 = vld [vmem:[#allocation181_spill] sm:$0xff]  ;;  %v13010_v62 = vld [vmem:[#allocation139_spill] sm:$0xff] }
 0x578   : > { %4413 = vxpose.xlu0.b32.cont [10/16] (narrow) %v4377_v29, 16  ;;  %v5911_v61 = vadd.f32 %v5910_v38, %v5909_v51  ;;  %v5875_v5 = vsel %vm5845_vm5, %v4351_v16, 0.0  ;;  %v5912_v7 = vsel %vm5845_vm5, %v4367_v6, 0.0  ;;  %8649 = vmatprep.subr.bf16.mxu1 %v11905_v41  ;;  %v11919_v22 = vpack.c.bf16 %v12997_v21, %v12996_v32  ;;  %v13012_v50 = vld [vmem:[#allocation35_spill] sm:$0xff]  ;;  %v13014_v38 = vld [vmem:[#allocation161_spill] sm:$0xff]  ;;  %v13016_v16 = vld [vmem:[#allocation112_spill] sm:$0xff] }
 0x579   : > { %v5876_v2 = vadd.f32 %v5875_v5, %v5874_v3  ;;  %8651 = vmatpush3.bf16.msra.mxu1 %v11905_v41  ;;  %v11923_v0 = vpack.c.bf16 %v12999_v15, %v12998_v1  ;;  %v4395_v28 = vsel %vm4299_vm1, %v13000_v57, 0.0  ;;  %v11930_v36 = vpack.c.bf16 %v13002_v19, %v13001_v13  ;;  %v13013_v8 = vld [vmem:[#allocation47_spill] sm:$0xff]  ;;  %v13017_v17 = vld [vmem:[#allocation118_spill] sm:$0xff]  ;;  %v13019_v32 = vld [vmem:[#allocation185_spill] sm:$0xff] }
 0x57a   : > { %v5913_v9 = vadd.f32 %v5912_v7, %v5911_v61  ;;  %v4379_v26 = vsel %vm4299_vm1, %v13003_v43, 0.0  ;;  %8461 = vmatprep.subr.bf16.mxu0 %v11919_v22  ;;  %v11939_v52 = vpack.c.bf16 %v13005_v56, %v13004_v59  ;;  %v11946_v29 = vpack.c.bf16 %v13007_v14, %v13006_v39  ;;  %v5844_v5 = vld [vmem:[#allocation3] sm:$0x3]  ;;  %v13020_v57 = vld [vmem:[#allocation163_spill] sm:$0xff]  ;;  %v13021_v13 = vld [vmem:[#allocation184_spill] sm:$0xff] }
 0x57b   : > { %5130 = vxpose.xlu1.b32.cont [11/16] (narrow) %v4394_v11, 16  ;;  %v5877_v63 = vrot.slane %v5876_v2, 4  ;;  %8653 = vmatprep.subr.bf16.mxu1 %v11923_v0  ;;  %v4396_v18 = vsel %vm4300_vm2, %v13008_v48, 0.0  ;;  %v4380_v51 = vsel %vm4300_vm2, %v13009_v37, 0.0  ;;  %v8472_v12 = vpack.c.bf16 %v13013_v8, %v13012_v50 }
 0x57c   : > { %4414 = vxpose.xlu0.b32.cont [11/16] (narrow) %v4378_v60, 16  ;;  %v5914_v54 = vrot.slane %v5913_v9, 4  ;;  %8463 = vmatpush3.bf16.msra.mxu0 %v11919_v22  ;;  %v13011_v60 = vld [vmem:[#allocation143_spill] sm:$0xff]  ;;  %v4397_v49 = vsel %vm4301_vm3, %v13014_v38, 0.0  ;;  %v4381_v3 = vsel %vm4301_vm3, %v13015_v42, 0.0  ;;  %v8664_v6 = vpack.c.bf16 %v13017_v17, %v13016_v16  ;;  %v13022_v38 = vld [vmem:[#allocation52_spill] sm:$0xff] }
 0x57d   : > { %v5878_v24 = vadd.f32 %v5877_v63, %v5876_v2  ;;  %8655 = vmatpush3.bf16.msra.mxu1 %v11923_v0  ;;  %8465 = vmatprep.subr.bf16.mxu0 %v11930_v36  ;;  %v11957_v53 = vpack.c.bf16 %v13011_v60, %v13010_v62  ;;  %vm5922_vm5 = vcmask 1041409   ;;  %v4382_v21 = vsel %vm4302_vm4, %v13019_v32, 0.0  ;;  %v13026_v16 = vld [vmem:[#allocation59_spill] sm:$0xff]  ;;  %v13027_v17 = vld [vmem:[#allocation64_spill] sm:$0xff] }
 0x57e   : > { %v5915_v47 = vadd.f32 %v5914_v54, %v5913_v9  ;;  %8657 = vmatprep.subr.bf16.mxu1 %v11939_v52  ;;  %v4398_v9 = vsel %vm4302_vm4, %v13018_v34, 0.0  ;;  %vm5926_vm7 = vcmask 123904   ;;  %v4383_v19 = vsel %vm4303_vm6, %v13021_v13, 0.0  ;;  %v13031_v32 = vld [vmem:[#allocation71_spill] sm:$0xff]  ;;  %v13036_v13 = vld [vmem:[#allocation144_spill] sm:$0xff] }
 0x57f   : > { %5131 = vxpose.xlu1.b32.cont [12/16] (narrow) %v4395_v28, 16  ;;  %v5879_v55 = vrot.slane %v5878_v24, 2  ;;  %v4399_v28 = vsel %vm4303_vm6, %v13020_v57, 0.0  ;;  %v13035_v57 = vld [vmem:[#allocation79_spill] sm:$0xff] }
 0x580   : > { %4415 = vxpose.xlu0.b32.cont [12/16] (narrow) %v4379_v26, 16  ;;  %v5916_v11 = vrot.slane %v5915_v47, 2  ;;  %8467 = vmatpush3.bf16.msra.mxu0 %v11930_v36 }
 0x581   : > { %v5880_v45 = vadd.f32 %v5879_v55, %v5878_v24  ;;  %8659 = vmatpush3.bf16.msra.mxu1 %v11939_v52  ;;  %8469 = vmatprep.subr.bf16.mxu0 %v11946_v29 }
 0x582   : > { %v5917_v33 = vadd.f32 %v5916_v11, %v5915_v47  ;;  %8661 = vmatprep.subr.bf16.mxu1 %v11957_v53 }
 0x583   : > { %5132 = vxpose.xlu1.b32.cont [13/16] (narrow) %v4396_v18, 16  ;;  %v5881_v61 = vrot.slane %v5880_v45, 1 }
 0x584   : > { %4416 = vxpose.xlu0.b32.cont [13/16] (narrow) %v4380_v51, 16  ;;  %v5918_v25 = vrot.slane %v5917_v33, 1  ;;  %8471 = vmatpush3.bf16.msra.mxu0 %v11946_v29 }
 0x585   : > { %v5882_v7 = vadd.f32 %v5881_v61, %v5880_v45  ;;  %8663 = vmatpush3.bf16.msra.mxu1 %v11957_v53  ;;  %8473 = vmatprep.subr.bf16.mxu0 %v8472_v12  ;;  %v13025_v61 = vld [vmem:[#allocation126_spill] sm:$0xff] }
 0x586   : > { %v5919_v2 = vadd.f32 %v5918_v25, %v5917_v33  ;;  %8665 = vmatprep.subr.bf16.mxu1 %v8664_v6 }
 0x587   : > { %5133 = vxpose.xlu1.b32.cont [14/16] (narrow) %v4397_v49, 16  ;;  %v13023_v49 = vld [vmem:[#allocation56_spill] sm:$0xff] }
 0x588   : > { %4417 = vxpose.xlu0.b32.cont [14/16] (narrow) %v4381_v3, 16  ;;  %v5923_v1 = vsel %vm5922_vm5, %v5919_v2, %v5882_v7  ;;  %v8476_v42 = vpack.c.bf16 %v13023_v49, %v13022_v38  ;;  %v13024_v3 = vld [vmem:[#allocation121_spill] sm:$0xff]  ;;  %v13046_v49 = vld [vmem:[#allocation98_spill] sm:$0xff] }
 0x589   : > { %v5925_v15 = vadd.f32 %v5923_v1, %v5844_v5  ;;  %v8668_v25 = vpack.c.bf16 %v13025_v61, %v13024_v3  ;;  %v8480_v5 = vpack.c.bf16 %v13027_v17, %v13026_v16  ;;  %v13028_v7 = vld [vmem:[#allocation129_spill] sm:$0xff]  ;;  %v13048_v61 = vld [vmem:[#allocation156_spill] sm:$0xff] }
 0x58a   : > { %v13029_v2 = vld [vmem:[#allocation133_spill] sm:$0xff] }
 0x58b   : > { %5134 = vxpose.xlu1.b32.cont [15/16] (narrow) %v4398_v9, 16  ;;  %5927 = vst.msk [vmem:[#allocation3] sm:$0x3] %vm5926_vm7, %v5925_v15  ;;  %v8672_v34 = vpack.c.bf16 %v13029_v2, %v13028_v7  ;;  %v13030_v9 = vld [vmem:[#allocation68_spill] sm:$0xff]  ;;  %v13034_v15 = vld [vmem:[#allocation75_spill] sm:$0xff]  ;;  %v13050_v17 = vld [vmem:[#allocation25_spill] sm:$0xff] }
 0x58c   : > { %4418 = vxpose.xlu0.b32.cont [15/16] (narrow) %v4382_v21, 16  ;;  %v13033_v21 = vld [vmem:[#allocation140_spill] sm:$0xff]  ;;  %v13052_v2 = vld [vmem:[#allocation83_spill] sm:$0xff] }
 0x58f   : > { %5135 = vxpose.xlu1.b32.end [16/16] (narrow) %v4399_v28, 16  ;;  %v8488_v28 = vpack.c.bf16 %v13035_v57, %v13034_v15 }
 0x590   : > { %4419 = vxpose.xlu0.b32.end [16/16] (narrow) %v4383_v19, 16  ;;  %v13037_v19 = vld [vmem:[#allocation147_spill] sm:$0xff] }
 0x592   : > { %v5934_v57 = vld [vmem:[#allocation3] sm:$0x3] }
 0x5d3   : > { %v5136_v43 = vpop.trf.xlu1 }
 0x5d4   : > { %v4420_v30 = vpop.trf.xlu0  ;;  %v11987_v26 = vand.u32 4294901760, %v5136_v43 }
 0x5d5   : > { %v11989_v63 = vand.u32 4294901760, %v4420_v30 }
 0x5d6   : > { %v11992_v54 = vsub.f32 %v5136_v43, %v11987_v26  ;;  %v8680_v43 = vpack.c.bf16 %v13037_v19, %v13036_v13  ;;  %v5948_v13 = vsub.s32 1, %v11675_v35  ;;  %v13058_v19 = vld [vmem:[#allocation36_spill] sm:$0xff] }
 0x5d7   : > { %v11995_v59 = vsub.f32 %v4420_v30, %v11989_v63  ;;  %v5137_v56 = vpop.trf.xlu1  ;;  %v13038_v30 = vld [vmem:[#allocation82_spill] sm:$0xff] }
 0x5d8   : > { %v4421_v24 = vpop.trf.xlu0  ;;  %v11997_v47 = vand.u32 4294901760, %v5137_v56  ;;  %v5235_v14 = vand.u32 4294901760, %v11992_v54 }
 0x5d9   : > { %v11999_v10 = vand.u32 4294901760, %v4421_v24  ;;  %v4519_v39 = vand.u32 4294901760, %v11995_v59 }
 0x5da   : > { %v12004_v48 = vsub.f32 %v5137_v56, %v11997_v47  ;;  %v5236_v51 = vsub.f32 %v11992_v54, %v5235_v14  ;;  %v13039_v56 = vld [vmem:[#allocation87_spill] sm:$0xff] }
 0x5db   : > { %v12007_v18 = vsub.f32 %v4421_v24, %v11999_v10  ;;  %v4520_v37 = vsub.f32 %v11995_v59, %v4519_v39  ;;  %v8492_v24 = vpack.c.bf16 %v13039_v56, %v13038_v30  ;;  %v13060_v56 = vld [vmem:[#allocation103_spill] sm:$0xff] }
 0x5dc   : > { %v5245_v55 = vand.u32 4294901760, %v12004_v48  ;;  %v5237_v60 = vand.u32 4294901760, %v5236_v51  ;;  %v13041_v51 = vld [vmem:[#allocation152_spill] sm:$0xff] }
 0x5dd   : > { %v4529_v11 = vand.u32 4294901760, %v12007_v18  ;;  %v4521_v62 = vand.u32 4294901760, %v4520_v37  ;;  %v13040_v37 = vld [vmem:[#allocation150_spill] sm:$0xff] }
 0x5de   : > { %7830 = vmatprep.mubr.f32.mxu1 %v5237_v60  ;;  %v5246_v33 = vsub.f32 %v12004_v48, %v5245_v55  ;;  %v13042_v60 = vld [vmem:[#allocation90_spill] sm:$0xff] }
 0x5df   : > { %7620 = vmatprep.mubr.f32.mxu0 %v4521_v62  ;;  %v4530_v45 = vsub.f32 %v12007_v18, %v4529_v11  ;;  %v8684_v62 = vpack.c.bf16 %v13041_v51, %v13040_v37 }
 0x5e0   : > { %v5247_v8 = vand.u32 4294901760, %v5246_v33 }
 0x5e1   : > { %v4531_v50 = vand.u32 4294901760, %v4530_v45  ;;  %v13043_v45 = vld [vmem:[#allocation96_spill] sm:$0xff] }
 0x5e2   : > { %7831 = vmatmul.mubr.f32.vlgmr.msra.gmra.mrb[0].mxu1 %v5247_v8  ;;  %v8496_v33 = vpack.c.bf16 %v13043_v45, %v13042_v60  ;;  %v13045_v8 = vld [vmem:[#allocation155_spill] sm:$0xff]  ;;  %v13063_v45 = vld [vmem:[#allocation46_spill] sm:$0xff] }
 0x5e3   : > { %7621 = vmatmul.mubr.f32.vlgmr.msra.gmra.mrb[0].mxu0 %v4531_v50  ;;  %8667 = vmatpush3.bf16.msra.mxu1 %v8664_v6  ;;  %v13032_v6 = vld [vmem:[#allocation136_spill] sm:$0xff]  ;;  %v13044_v50 = vld [vmem:[#allocation154_spill] sm:$0xff]  ;;  %v13062_v60 = vld [vmem:[#allocation43_spill] sm:$0xff] }
 0x5e4   : > { %8475 = vmatpush3.bf16.msra.mxu0 %v8472_v12  ;;  %7655 = vmatprep.mubr.f32.mxu0 %v11989_v63  ;;  %v8484_v12 = vpack.c.bf16 %v13031_v32, %v13030_v9  ;;  %v8676_v1 = vpack.c.bf16 %v13033_v21, %v13032_v6  ;;  %v8688_v38 = vpack.c.bf16 %v13045_v8, %v13044_v50  ;;  %v13054_v32 = vld [vmem:[#allocation31_spill] sm:$0xff]  ;;  %v13056_v21 = vld [vmem:[#allocation92_spill] sm:$0xff] }
 0x5e5   : > { %7865 = vmatprep.mubr.f32.mxu1 %v11987_v26  ;;  %8477 = vmatprep.subr.bf16.mxu0 %v8476_v42  ;;  %v13065_v50 = vld [vmem:[#allocation116_spill] sm:$0xff] }
 0x5e6   : > { %8669 = vmatprep.subr.bf16.mxu1 %v8668_v25 }
 0x5e7   : > { %8671 = vmatpush3.bf16.msra.mxu1 %v8668_v25  ;;  %v13049_v25 = vld [vmem:[#allocation157_spill] sm:$0xff] }
 0x5e8   : > { %8479 = vmatpush3.bf16.msra.mxu0 %v8476_v42  ;;  %8673 = vmatprep.subr.bf16.mxu1 %v8672_v34  ;;  %v13047_v42 = vld [vmem:[#allocation107_spill] sm:$0xff]  ;;  %v8692_v16 = vpack.c.bf16 %v13049_v25, %v13048_v61  ;;  %v13069_v61 = vld [vmem:[#allocation125_spill] sm:$0xff] }
 0x5e9   : > { %8481 = vmatprep.subr.bf16.mxu0 %v8480_v5  ;;  %v8500_v3 = vpack.c.bf16 %v13047_v42, %v13046_v49  ;;  %v13067_v49 = vld [vmem:[#allocation53_spill] sm:$0xff] }
 0x5eb   : > { %8675 = vmatpush3.bf16.msra.mxu1 %v8672_v34  ;;  %v13053_v34 = vld [vmem:[#allocation86_spill] sm:$0xff] }
 0x5ec   : > { %8483 = vmatpush3.bf16.msra.mxu0 %v8480_v5  ;;  %8677 = vmatprep.subr.bf16.mxu1 %v8676_v1  ;;  %v13051_v5 = vld [vmem:[#allocation28_spill] sm:$0xff]  ;;  %v8696_v9 = vpack.c.bf16 %v13053_v34, %v13052_v2  ;;  %v13073_v2 = vld [vmem:[#allocation134_spill] sm:$0xff] }
 0x5ed   : > { %8485 = vmatprep.subr.bf16.mxu0 %v8484_v12  ;;  %v8504_v7 = vpack.c.bf16 %v13051_v5, %v13050_v17  ;;  %v13071_v17 = vld [vmem:[#allocation62_spill] sm:$0xff] }
 0x5ef   : > { %8679 = vmatpush3.bf16.msra.mxu1 %v8676_v1  ;;  %v13057_v1 = vld [vmem:[#allocation99_spill] sm:$0xff] }
 0x5f0   : > { %8487 = vmatpush3.bf16.msra.mxu0 %v8484_v12  ;;  %8681 = vmatprep.subr.bf16.mxu1 %v8680_v43  ;;  %v13055_v12 = vld [vmem:[#allocation32_spill] sm:$0xff]  ;;  %v8700_v15 = vpack.c.bf16 %v13057_v1, %v13056_v21  ;;  %v13077_v21 = vld [vmem:[#allocation142_spill] sm:$0xff] }
 0x5f1   : > { %8489 = vmatprep.subr.bf16.mxu0 %v8488_v28  ;;  %v8508_v6 = vpack.c.bf16 %v13055_v12, %v13054_v32  ;;  %v13075_v32 = vld [vmem:[#allocation70_spill] sm:$0xff] }
 0x5f3   : > { %8683 = vmatpush3.bf16.msra.mxu1 %v8680_v43  ;;  %v13059_v43 = vld [vmem:[#allocation41_spill] sm:$0xff] }
 0x5f4   : > { %8491 = vmatpush3.bf16.msra.mxu0 %v8488_v28  ;;  %8685 = vmatprep.subr.bf16.mxu1 %v8684_v62  ;;  %v5937_v28 = vsub.s32 0, %v11675_v35  ;;  %v8512_v30 = vpack.c.bf16 %v13059_v43, %v13058_v19  ;;  %v8516_v35 = vpack.c.bf16 %v13063_v45, %v13062_v60  ;;  %v13081_v19 = vld [vmem:[#allocation149_spill] sm:$0xff]  ;;  %v13089_v60 = vld [vmem:[#allocation108_spill] sm:$0xff] }
 0x5f5   : > { %8493 = vmatprep.subr.bf16.mxu0 %v8492_v24 }
 0x5f6   : > { %v5938_v51 = vrot.slane %v5934_v57, %v5937_v28 }
 0x5f7   : > { %8687 = vmatpush3.bf16.msra.mxu1 %v8684_v62  ;;  %v5949_v62 = vrot.slane %v5934_v57, %v5948_v13  ;;  %v13079_v57 = vld [vmem:[#allocation81_spill] sm:$0xff]  ;;  %v13080_v13 = vld [vmem:[#allocation146_spill] sm:$0xff] }
 0x5f8   : > { %8495 = vmatpush3.bf16.msra.mxu0 %v8492_v24  ;;  %8689 = vmatprep.subr.bf16.mxu1 %v8688_v38  ;;  %v13061_v24 = vld [vmem:[#allocation109_spill] sm:$0xff]  ;;  %v8724_v43 = vpack.c.bf16 %v13081_v19, %v13080_v13  ;;  %v13110_v19 = vld [vmem:[#allocation80_spill] sm:$0xff] }
 0x5f9   : > { %8497 = vmatprep.subr.bf16.mxu0 %v8496_v33  ;;  %v8704_v37 = vpack.c.bf16 %v13061_v24, %v13060_v56  ;;  %5944 = vbcast.lane.b32.xlu1 %v5938_v51, 264  ;;  %v13086_v24 = vld [vmem:[#allocation37_spill] sm:$0xff] }
 0x5fa   : > { %5940 = vbcast.lane.b32.xlu0 %v5938_v51, 256 }
 0x5fb   : > { %8691 = vmatpush3.bf16.msra.mxu1 %v8688_v38  ;;  %v13066_v38 = vld [vmem:[#allocation51_spill] sm:$0xff] }
 0x5fc   : > { %8499 = vmatpush3.bf16.msra.mxu0 %v8496_v33  ;;  %8693 = vmatprep.subr.bf16.mxu1 %v8692_v16  ;;  %v13064_v33 = vld [vmem:[#allocation114_spill] sm:$0xff]  ;;  %v8520_v42 = vpack.c.bf16 %v13067_v49, %v13066_v38  ;;  %v13093_v38 = vld [vmem:[#allocation119_spill] sm:$0xff] }
 0x5fd   : > { %8501 = vmatprep.subr.bf16.mxu0 %v8500_v3  ;;  %v8708_v8 = vpack.c.bf16 %v13065_v50, %v13064_v33  ;;  %5951 = vbcast.lane.b32.xlu1 %v5949_v62, 256  ;;  %v13091_v33 = vld [vmem:[#allocation48_spill] sm:$0xff]  ;;  %v13096_v49 = vld [vmem:[#allocation122_spill] sm:$0xff] }
 0x5ff   : > { %8695 = vmatpush3.bf16.msra.mxu1 %v8692_v16  ;;  %v13070_v16 = vld [vmem:[#allocation57_spill] sm:$0xff] }
 0x600   : > { %8503 = vmatpush3.bf16.msra.mxu0 %v8500_v3  ;;  %8697 = vmatprep.subr.bf16.mxu1 %v8696_v9  ;;  %v13068_v3 = vld [vmem:[#allocation120_spill] sm:$0xff]  ;;  %v8524_v5 = vpack.c.bf16 %v13071_v17, %v13070_v16  ;;  %v13100_v17 = vld [vmem:[#allocation127_spill] sm:$0xff] }
 0x601   : > { %8505 = vmatprep.subr.bf16.mxu0 %v8504_v7  ;;  %v8712_v25 = vpack.c.bf16 %v13069_v61, %v13068_v3  ;;  %5955 = vbcast.lane.b32.xlu1 %v5949_v62, 264  ;;  %v13088_v62 = vld [vmem:[#allocation102_spill] sm:$0xff]  ;;  %v13098_v61 = vld [vmem:[#allocation60_spill] sm:$0xff] }
 0x602   : > { %7866 = vmatmul.mubr.f32.vlgmr.msra.gmra.mrb[0].mxu1 %v11997_v47  ;;  %v8764_v45 = vpack.c.bf16 %v13089_v60, %v13088_v62 }
 0x603   : > { %7656 = vmatmul.mubr.f32.vlgmr.msra.gmra.mrb[0].mxu0 %v11999_v10  ;;  %8699 = vmatpush3.bf16.msra.mxu1 %v8696_v9  ;;  %v13074_v9 = vld [vmem:[#allocation66_spill] sm:$0xff] }
 0x604   : > { %8507 = vmatpush3.bf16.msra.mxu0 %v8504_v7  ;;  %7690 = vmatprep.mubr.f32.mxu0 %v11995_v59  ;;  %v13072_v7 = vld [vmem:[#allocation130_spill] sm:$0xff]  ;;  %v8528_v12 = vpack.c.bf16 %v13075_v32, %v13074_v9  ;;  %v13083_v59 = vld [vmem:[#allocation33_spill] sm:$0xff] }
 0x605   : > { %7900 = vmatprep.mubr.f32.mxu1 %v11992_v54  ;;  %8509 = vmatprep.subr.bf16.mxu0 %v8508_v6  ;;  %v8716_v34 = vpack.c.bf16 %v13073_v2, %v13072_v7  ;;  %v13082_v54 = vld [vmem:[#allocation29_spill] sm:$0xff] }
 0x606   : > { %8701 = vmatprep.subr.bf16.mxu1 %v8700_v15  ;;  %v13102_v2 = vld [vmem:[#allocation65_spill] sm:$0xff] }
 0x607   : > { %8703 = vmatpush3.bf16.msra.mxu1 %v8700_v15  ;;  %v13078_v15 = vld [vmem:[#allocation73_spill] sm:$0xff] }
 0x608   : > { %8511 = vmatpush3.bf16.msra.mxu0 %v8508_v6  ;;  %8705 = vmatprep.subr.bf16.mxu1 %v8704_v37  ;;  %v13076_v6 = vld [vmem:[#allocation138_spill] sm:$0xff]  ;;  %v8532_v28 = vpack.c.bf16 %v13079_v57, %v13078_v15  ;;  %v13104_v32 = vld [vmem:[#allocation137_spill] sm:$0xff] }
 0x609   : > { %8513 = vmatprep.subr.bf16.mxu0 %v8512_v30  ;;  %v8720_v1 = vpack.c.bf16 %v13077_v21, %v13076_v6  ;;  %v13106_v21 = vld [vmem:[#allocation72_spill] sm:$0xff]  ;;  %v13108_v57 = vld [vmem:[#allocation145_spill] sm:$0xff] }
 0x60b   : > { %8707 = vmatpush3.bf16.msra.mxu1 %v8704_v37  ;;  %v13087_v37 = vld [vmem:[#allocation40_spill] sm:$0xff] }
 0x60c   : > { %8515 = vmatpush3.bf16.msra.mxu0 %v8512_v30  ;;  %8709 = vmatprep.subr.bf16.mxu1 %v8708_v8  ;;  %v13085_v30 = vld [vmem:[#allocation97_spill] sm:$0xff]  ;;  %v8572_v51 = vpack.c.bf16 %v13087_v37, %v13086_v24 }
 0x60d   : > { %8517 = vmatprep.subr.bf16.mxu0 %v8516_v35 }
 0x60f   : > { %8711 = vmatpush3.bf16.msra.mxu1 %v8708_v8  ;;  %v13092_v8 = vld [vmem:[#allocation113_spill] sm:$0xff] }
 0x610   : > { %8519 = vmatpush3.bf16.msra.mxu0 %v8516_v35  ;;  %8713 = vmatprep.subr.bf16.mxu1 %v8712_v25  ;;  %v13090_v35 = vld [vmem:[#allocation42_spill] sm:$0xff] }
 0x611   : > { %8521 = vmatprep.subr.bf16.mxu0 %v8520_v42  ;;  %v8576_v50 = vpack.c.bf16 %v13091_v33, %v13090_v35 }
 0x613   : > { %8715 = vmatpush3.bf16.msra.mxu1 %v8712_v25  ;;  %v13099_v25 = vld [vmem:[#allocation61_spill] sm:$0xff] }
 0x614   : > { %8523 = vmatpush3.bf16.msra.mxu0 %v8520_v42  ;;  %8717 = vmatprep.subr.bf16.mxu1 %v8716_v34  ;;  %v13097_v42 = vld [vmem:[#allocation124_spill] sm:$0xff]  ;;  %v8584_v16 = vpack.c.bf16 %v13099_v25, %v13098_v61 }
 0x615   : > { %8525 = vmatprep.subr.bf16.mxu0 %v8524_v5  ;;  %v8772_v3 = vpack.c.bf16 %v13097_v42, %v13096_v49 }
 0x617   : > { %8719 = vmatpush3.bf16.msra.mxu1 %v8716_v34  ;;  %v13103_v34 = vld [vmem:[#allocation69_spill] sm:$0xff] }
 0x618   : > { %8527 = vmatpush3.bf16.msra.mxu0 %v8524_v5  ;;  %8721 = vmatprep.subr.bf16.mxu1 %v8720_v1  ;;  %v13101_v5 = vld [vmem:[#allocation132_spill] sm:$0xff]  ;;  %v8588_v9 = vpack.c.bf16 %v13103_v34, %v13102_v2 }
 0x619   : > { %8529 = vmatprep.subr.bf16.mxu0 %v8528_v12  ;;  %v8776_v7 = vpack.c.bf16 %v13101_v5, %v13100_v17 }
 0x61b   : > { %8723 = vmatpush3.bf16.msra.mxu1 %v8720_v1  ;;  %v13107_v1 = vld [vmem:[#allocation77_spill] sm:$0xff] }
 0x61c   : > { %8531 = vmatpush3.bf16.msra.mxu0 %v8528_v12  ;;  %8725 = vmatprep.subr.bf16.mxu1 %v8724_v43  ;;  %v13105_v12 = vld [vmem:[#allocation141_spill] sm:$0xff]  ;;  %v8592_v15 = vpack.c.bf16 %v13107_v1, %v13106_v21 }
 0x61d   : > { %8533 = vmatprep.subr.bf16.mxu0 %v8532_v28  ;;  %v8780_v6 = vpack.c.bf16 %v13105_v12, %v13104_v32 }
 0x61f   : > { %8727 = vmatpush3.bf16.msra.mxu1 %v8724_v43  ;;  %v13111_v43 = vld [vmem:[#allocation88_spill] sm:$0xff] }
 0x620   : > { %8535 = vmatpush3.bf16.msra.mxu0 %v8532_v28  ;;  %8729 = vmatprep.subr.bf16.mxu1 %v11669_v23  ;;  %v13109_v28 = vld [vmem:[#allocation148_spill] sm:$0xff] }
 0x621   : > { %8537 = vmatprep.subr.bf16.mxu0 %v11665_v31  ;;  %v8784_v13 = vpack.c.bf16 %v13109_v28, %v13108_v57 }
 0x622   : > { %7901 = vmatmul.mubr.f32.vlgmr.msra.gmra.mrb[0].mxu1 %v12004_v48  ;;  %v13095_v48 = vld [vmem:[#allocation55_spill] sm:$0xff] }
 0x623   : > { %7691 = vmatmul.mubr.f32.vlgmr.msra.gmra.mrb[0].mxu0 %v12007_v18  ;;  %8731 = vmatpush3.bf16.msra.mxu1 %v11669_v23  ;;  %v8768_v18 = vpack.c.bf16 %v13093_v38, %v13092_v8  ;;  %v5990_v8 = vld [vmem:[%s12296_s3 + $0x8] sm:$0xff]  ;;  %v5989_v38 = vld [vmem:[%s12296_s3] sm:$0xff] }
 0x624   : > { %8539 = vmatpush3.bf16.msra.mxu0 %v11665_v31  ;;  %7725 = vmatprep.mubr.f32.mxu0 %v4519_v39  ;;  %v8568_v39 = vpack.c.bf16 %v13083_v59, %v13082_v54  ;;  %v8596_v54 = vpack.c.bf16 %v13111_v43, %v13110_v19  ;;  %v13112_v59 = vld [vmem:[#allocation151_spill] sm:$0xff] }
 0x625   : > { %7935 = vmatprep.mubr.f32.mxu1 %v5235_v14  ;;  %8541 = vmatprep.subr.bf16.mxu0 %v11673_v44  ;;  %v13084_v14 = vld [vmem:[#allocation91_spill] sm:$0xff] }
 0x626   : > { %8733 = vmatprep.subr.bf16.mxu1 %v11679_v58  ;;  %v8760_v56 = vpack.c.bf16 %v13085_v30, %v13084_v14 }
 0x627   : > { %8735 = vmatpush3.bf16.msra.mxu1 %v11679_v58 }
 0x628   : > { %8543 = vmatpush3.bf16.msra.mxu0 %v11673_v44  ;;  %8737 = vmatprep.subr.bf16.mxu1 %v11689_v40 }
 0x629   : > { %8545 = vmatprep.subr.bf16.mxu0 %v11685_v4 }
 0x62b   : > { %8739 = vmatpush3.bf16.msra.mxu1 %v11689_v40 }
 0x62c   : > { %8547 = vmatpush3.bf16.msra.mxu0 %v11685_v4  ;;  %8741 = vmatprep.subr.bf16.mxu1 %v11711_v20 }
 0x62d   : > { %8549 = vmatprep.subr.bf16.mxu0 %v11693_v46 }
 0x62f   : > { %8743 = vmatpush3.bf16.msra.mxu1 %v11711_v20 }
 0x630   : > { %8551 = vmatpush3.bf16.msra.mxu0 %v11693_v46  ;;  %8745 = vmatprep.subr.bf16.mxu1 %v11905_v41 }
 0x631   : > { %8553 = vmatprep.subr.bf16.mxu0 %v11756_v27 }
 0x633   : > { %8747 = vmatpush3.bf16.msra.mxu1 %v11905_v41 }
 0x634   : > { %8555 = vmatpush3.bf16.msra.mxu0 %v11756_v27  ;;  %8749 = vmatprep.subr.bf16.mxu1 %v11923_v0 }
 0x635   : > { %8557 = vmatprep.subr.bf16.mxu0 %v11919_v22 }
 0x637   : > { %8751 = vmatpush3.bf16.msra.mxu1 %v11923_v0 }
 0x638   : > { %8559 = vmatpush3.bf16.msra.mxu0 %v11919_v22  ;;  %8753 = vmatprep.subr.bf16.mxu1 %v11939_v52 }
 0x639   : > { %8561 = vmatprep.subr.bf16.mxu0 %v11930_v36 }
 0x63b   : > { %8755 = vmatpush3.bf16.msra.mxu1 %v11939_v52 }
 0x63c   : > { %8563 = vmatpush3.bf16.msra.mxu0 %v11930_v36  ;;  %8757 = vmatprep.subr.bf16.mxu1 %v11957_v53 }
 0x63d   : > { %8565 = vmatprep.subr.bf16.mxu0 %v11946_v29 }
 0x63f   : > { %8759 = vmatpush3.bf16.msra.mxu1 %v11957_v53 }
 0x640   : > { %8567 = vmatpush3.bf16.msra.mxu0 %v11946_v29  ;;  %8761 = vmatprep.subr.bf16.mxu1 %v8760_v56 }
 0x641   : > { %8569 = vmatprep.subr.bf16.mxu0 %v8568_v39 }
 0x642   : > { %7936 = vmatmul.mubr.f32.vlgmr.msra.gmra.mrb[0].mxu1 %v5245_v55 }
 0x643   : > { %7726 = vmatmul.mubr.f32.vlgmr.msra.gmra.mrb[0].mxu0 %v4529_v11  ;;  %8763 = vmatpush3.bf16.msra.mxu1 %v8760_v56  ;;  %v13094_v11 = vld [vmem:[#allocation50_spill] sm:$0xff] }
 0x644   : > { %8571 = vmatpush3.bf16.msra.mxu0 %v8568_v39  ;;  %7760 = vmatprep.mubr.f32.mxu0 %v11989_v63  ;;  %v8580_v55 = vpack.c.bf16 %v13095_v48, %v13094_v11  ;;  %v13113_v39 = vld [vmem:[#allocation153_spill] sm:$0xff] }
 0x645   : > { %7970 = vmatprep.mubr.f32.mxu1 %v11987_v26  ;;  %8573 = vmatprep.subr.bf16.mxu0 %v8572_v51  ;;  %v8788_v14 = vpack.c.bf16 %v13113_v39, %v13112_v59 }
 0x646   : > { %8765 = vmatprep.subr.bf16.mxu1 %v8764_v45 }
 0x647   : > { %8767 = vmatpush3.bf16.msra.mxu1 %v8764_v45 }
 0x648   : > { %8575 = vmatpush3.bf16.msra.mxu0 %v8572_v51  ;;  %8769 = vmatprep.subr.bf16.mxu1 %v8768_v18 }
 0x649   : > { %8577 = vmatprep.subr.bf16.mxu0 %v8576_v50 }
 0x64b   : > { %8771 = vmatpush3.bf16.msra.mxu1 %v8768_v18 }
 0x64c   : > { %8579 = vmatpush3.bf16.msra.mxu0 %v8576_v50  ;;  %8773 = vmatprep.subr.bf16.mxu1 %v8772_v3 }
 0x64d   : > { %8581 = vmatprep.subr.bf16.mxu0 %v8580_v55 }
 0x64f   : > { %8775 = vmatpush3.bf16.msra.mxu1 %v8772_v3 }
 0x650   : > { %8583 = vmatpush3.bf16.msra.mxu0 %v8580_v55  ;;  %8777 = vmatprep.subr.bf16.mxu1 %v8776_v7 }
 0x651   : > { %8585 = vmatprep.subr.bf16.mxu0 %v8584_v16 }
 0x653   : > { %8779 = vmatpush3.bf16.msra.mxu1 %v8776_v7 }
 0x654   : > { %8587 = vmatpush3.bf16.msra.mxu0 %v8584_v16  ;;  %8781 = vmatprep.subr.bf16.mxu1 %v8780_v6 }
 0x655   : > { %8589 = vmatprep.subr.bf16.mxu0 %v8588_v9 }
 0x657   : > { %8783 = vmatpush3.bf16.msra.mxu1 %v8780_v6 }
 0x658   : > { %8591 = vmatpush3.bf16.msra.mxu0 %v8588_v9  ;;  %8785 = vmatprep.subr.bf16.mxu1 %v8784_v13 }
 0x659   : > { %8593 = vmatprep.subr.bf16.mxu0 %v8592_v15 }
 0x65b   : > { %8787 = vmatpush3.bf16.msra.mxu1 %v8784_v13 }
 0x65c   : > { %8595 = vmatpush3.bf16.msra.mxu0 %v8592_v15  ;;  %8789 = vmatprep.subr.bf16.mxu1 %v8788_v14 }
 0x65d   : > { %8597 = vmatprep.subr.bf16.mxu0 %v8596_v54 }
 0x65f   : > { %8791 = vmatpush3.bf16.msra.mxu1 %v8788_v14 }
 0x660   : > { %8599 = vmatpush3.bf16.msra.mxu0 %v8596_v54  ;;  %8793 = vmatprep.subr.bf16.mxu1 %v11669_v23 }
 0x661   : > { %8601 = vmatprep.subr.bf16.mxu0 %v11665_v31 }
 0x662   : > { %7971 = vmatmul.mubr.f32.vlgmr.msra.gmra.mrb[0].mxu1 %v11997_v47 }
 0x663   : > { %7761 = vmatmul.mubr.f32.vlgmr.msra.gmra.mrb[0].mxu0 %v11999_v10  ;;  %8795 = vmatpush3.bf16.msra.mxu1 %v11669_v23 }
 0x664   : > { %8603 = vmatpush3.bf16.msra.mxu0 %v11665_v31  ;;  %7795 = vmatprep.mubr.f32.mxu0 %v11989_v63  ;;  %v9523_v31 = vmov 0  }
 0x665   : > { %8005 = vmatprep.mubr.f32.mxu1 %v11987_v26  ;;  %8605 = vmatprep.subr.bf16.mxu0 %v11673_v44 }
 0x666   : > { %8797 = vmatprep.subr.bf16.mxu1 %v11679_v58  ;;  %9344 = vset.pattern.permute.xlu1 %v9523_v31 }
 0x667   : > { %8799 = vmatpush3.bf16.msra.mxu1 %v11679_v58  ;;  %9343 = vset.pattern.permute.xlu0 %v9523_v31 }
 0x668   : > { %8607 = vmatpush3.bf16.msra.mxu0 %v11673_v44  ;;  %8801 = vmatprep.subr.bf16.mxu1 %v11689_v40 }
 0x669   : > { %8609 = vmatprep.subr.bf16.mxu0 %v11685_v4 }
 0x66b   : > { %8803 = vmatpush3.bf16.msra.mxu1 %v11689_v40  ;;  %v5945_v23 = vpop.permute.xlu1 %5944  ;;  %v5929_v40 = vld [vmem:[%s12295_s2 + $0x8] sm:$0xff] }
 0x66c   : > { %8611 = vmatpush3.bf16.msra.mxu0 %v11685_v4  ;;  %8805 = vmatprep.subr.bf16.mxu1 %v11711_v20  ;;  %v4401_v4 = vld [vmem:[#allocation2 + $0x8] sm:$0xff] }
 0x66d   : > { %8613 = vmatprep.subr.bf16.mxu0 %v11693_v46 }
 0x66f   : > { %8807 = vmatpush3.bf16.msra.mxu1 %v11711_v20  ;;  %v5952_v44 = vpop.permute.xlu1 %5951  ;;  %v4400_v20 = vld [vmem:[#allocation2] sm:$0xff] }
 0x670   : > { %8615 = vmatpush3.bf16.msra.mxu0 %v11693_v46  ;;  %8809 = vmatprep.subr.bf16.mxu1 %v11905_v41  ;;  %v4403_v46 = vld [vmem:[#allocation2 + $0x18] sm:$0xff] }
 0x671   : > { %8617 = vmatprep.subr.bf16.mxu0 %v11756_v27 }
 0x673   : > { %8811 = vmatpush3.bf16.msra.mxu1 %v11905_v41  ;;  %v5956_v58 = vpop.permute.xlu1 %5955 }
 0x674   : > { %8619 = vmatpush3.bf16.msra.mxu0 %v11756_v27  ;;  %8813 = vmatprep.subr.bf16.mxu1 %v11923_v0  ;;  %v5941_v27 = vpop.permute.xlu0 %5940 }
 0x675   : > { %8621 = vmatprep.subr.bf16.mxu0 %v11919_v22 }
 0x677   : > { %8815 = vmatpush3.bf16.msra.mxu1 %v11923_v0  ;;  %v5928_v0 = vld [vmem:[%s12295_s2] sm:$0xff] }
 0x678   : > { %8623 = vmatpush3.bf16.msra.mxu0 %v11919_v22  ;;  %8817 = vmatprep.subr.bf16.mxu1 %v11939_v52  ;;  %v4402_v22 = vld [vmem:[#allocation2 + $0x10] sm:$0xff]  ;;  %v5957_v30 = vmul.f32 %v5941_v27, %v5928_v0  ;;  %v5959_v37 = vmul.f32 %v5952_v44, %v5928_v0 }
 0x679   : > { %8625 = vmatprep.subr.bf16.mxu0 %v11930_v36 }
 0x67b   : > { %8819 = vmatpush3.bf16.msra.mxu1 %v11939_v52 }
 0x67c   : > { %8627 = vmatpush3.bf16.msra.mxu0 %v11930_v36  ;;  %8821 = vmatprep.subr.bf16.mxu1 %v11957_v53  ;;  %v5960_v36 = vmul.f32 %v5956_v58, %v5929_v40 }
 0x67d   : > { %8629 = vmatprep.subr.bf16.mxu0 %v11946_v29 }
 0x67f   : > { %8823 = vmatpush3.bf16.msra.mxu1 %v11957_v53  ;;  %v5958_v53 = vmul.f32 %v5945_v23, %v5929_v40 }
 0x680   : > { %8631 = vmatpush3.bf16.msra.mxu0 %v11946_v29 }
 0x682   : > { %8006 = vmatmul.mubr.f32.vlgmr.msra.gmra.mrb[0].mxu1 %v11997_v47 }
 0x683   : > { %7796 = vmatmul.mubr.f32.vlgmr.msra.gmra.mrb[0].mxu0 %v11999_v10 }
 0x755   : > { %v8007_v29 = vpop.f32.mrb[0].mxu1 }
 0x756   : > { %v7797_v41 = vpop.f32.mrb[0].mxu0  ;;  %v5839_v63 = vadd.f32 %v8007_v29, %v4403_v46  ;;  %v5826_v10 = vpop.f32.mrb[1].mxu1 }
 0x757   : > { %v5837_v52 = vadd.f32 %v7797_v41, %v4401_v4  ;;  %v5110_v26 = vpop.f32.mrb[1].mxu0  ;;  %v5838_v24 = vadd.f32 %v5826_v10, %v4402_v22 }
 0x758   : > { %v5836_v47 = vadd.f32 %v5110_v26, %v4400_v20  ;;  %5843 = vst [vmem:[#allocation2 + $0x18] sm:$0xff] %v5839_v63  ;;  %v5964_v51 = vsub.f32 %v5839_v63, %v5960_v36 }
 0x759   : > { %5841 = vst [vmem:[#allocation2 + $0x8] sm:$0xff] %v5837_v52  ;;  %v5962_v56 = vsub.f32 %v5837_v52, %v5958_v53  ;;  %5842 = vst [vmem:[#allocation2 + $0x10] sm:$0xff] %v5838_v24  ;;  %v5963_v62 = vsub.f32 %v5838_v24, %v5959_v37 }
 0x75a   : > { %5840 = vst [vmem:[#allocation2] sm:$0xff] %v5836_v47  ;;  %v5961_v45 = vsub.f32 %v5836_v47, %v5957_v30  ;;  %v5968_v35 = vmul.f32 %v5964_v51, %v5964_v51 }
 0x75b   : > { %v5966_v60 = vmul.f32 %v5962_v56, %v5962_v56  ;;  %v5967_v33 = vmul.f32 %v5963_v62, %v5963_v62 }
 0x75c   : > { %5975 = vadd.xlane.f32.xlu1 %v5968_v35  ;;  %v5965_v50 = vmul.f32 %v5961_v45, %v5961_v45 }
 0x75d   : > { %5971 = vadd.xlane.f32.xlu0 %v5966_v60 }
 0x760   : > { %5969 = vadd.xlane.f32.xlu1 %v5965_v50 }
 0x761   : > { %5973 = vadd.xlane.f32.xlu0 %v5967_v33 }
 0x771   : > { %5998 = vperm.xlu1 %9344, %v5990_v8  }
 0x777   : > { %5993 = vperm.xlu0 %9343, %v5989_v38  }
 0x7e9   : > { %v5976_v11 = vpop.xlane.xlu1 %5975 }
 0x7ea   : > { %v5972_v18 = vpop.xlane.xlu0 %5971  ;;  %v5980_v3 = vmax.f32 %v5976_v11, 1e-24 }
 0x7eb   : > { %v5978_v48 = vmax.f32 %v5972_v18, 1e-24 }
 0x7ed   : > { %9345 = vrsqrt.f32 %v5978_v48  ;;  %v5970_v49 = vpop.xlane.xlu1 %5969 }
 0x7ee   : > { %v5974_v55 = vpop.xlane.xlu0 %5973  ;;  %v5977_v61 = vmax.f32 %v5970_v49, 1e-24 }
 0x7ef   : > { %v5979_v42 = vmax.f32 %v5974_v55, 1e-24 }
 0x7f1   : > { %9347 = vrsqrt.f32 %v5979_v42  ;;  %v5999_v16 = vpop.permute.xlu1 %5998 }
 0x7f2   : > { %9349 = vrsqrt.f32 %v5977_v61 }
 0x7f3   : > { %9351 = vrsqrt.f32 %v5980_v3 }
 0x7f6   : > { %v5994_v34 = vpop.permute.xlu0 %5993 }
 0x7f7   : > { %v9346_v25 = vpop.eup %9345 }
 0x7f8   : > { %v5986_v17 = vmul.f32 %v9346_v25, %v5962_v56 }
 0x7fa   : > { %v6002_v5 = vmul.f32 %v5999_v16, %v5986_v17 }
 0x7fb   : > { %v9348_v7 = vpop.eup %9347 }
 0x7fc   : > { %v9350_v2 = vpop.eup %9349  ;;  %v6006_v9 = vmul.f32 %v6002_v5, %v6002_v5  ;;  %v5987_v12 = vmul.f32 %v9348_v7, %v5963_v62 }
 0x7fd   : > { %v5985_v32 = vmul.f32 %v9350_v2, %v5961_v45  ;;  %v9352_v6 = vpop.eup %9351 }
 0x7fe   : > { %6011 = vadd.xlane.f32.xlu0 %v6006_v9  ;;  %v5988_v1 = vmul.f32 %v9352_v6, %v5964_v51  ;;  %v6003_v15 = vmul.f32 %v5994_v34, %v5987_v12 }
 0x7ff   : > { %v6001_v21 = vmul.f32 %v5994_v34, %v5985_v32 }
 0x800   : > { %v6004_v28 = vmul.f32 %v5999_v16, %v5988_v1  ;;  %v6007_v13 = vmul.f32 %v6003_v15, %v6003_v15 }
 0x801   : > { %v6005_v57 = vmul.f32 %v6001_v21, %v6001_v21 }
 0x802   : > { %v6008_v19 = vmul.f32 %v6004_v28, %v6004_v28 }
 0x803   : > { %6009 = vadd.xlane.f32.xlu1 %v6005_v57 }
 0x807   : > { %6013 = vadd.xlane.f32.xlu1 %v6007_v13 }
 0x80b   : > { %6015 = vadd.xlane.f32.xlu1 %v6008_v19 }
 0x88b   : > { %v6012_v43 = vpop.xlane.xlu0 %6011 }
 0x890   : > { %v6010_v54 = vpop.xlane.xlu1 %6009 }
 0x891   : > { %v6017_v59 = vadd.f32 %v6012_v43, %v6010_v54 }
 0x893   : > { %v6018_v39 = vrot.slane %v6017_v59, 4 }
 0x894   : > { %v6014_v14 = vpop.xlane.xlu1 %6013 }
 0x895   : > { %v6019_v31 = vadd.f32 %v6018_v39, %v6017_v59 }
 0x897   : > { %v6020_v23 = vrot.slane %v6019_v31, 2 }
 0x898   : > { %v6016_v44 = vpop.xlane.xlu1 %6015 }
 0x899   : > { %v6021_v58 = vadd.f32 %v6020_v23, %v6019_v31  ;;  %v6024_v4 = vadd.f32 %v6016_v44, %v6014_v14 }
 0x89b   : > { %v6022_v40 = vrot.slane %v6021_v58, 1  ;;  %v6025_v46 = vrot.slane %v6024_v4, 4 }
 0x89d   : > { %v6023_v20 = vadd.f32 %v6022_v40, %v6021_v58  ;;  %v6026_v27 = vadd.f32 %v6025_v46, %v6024_v4 }
 0x89f   : > { %v6031_v41 = vmax.f32 %v6023_v20, 1e-24  ;;  %v6027_v22 = vrot.slane %v6026_v27, 2 }
 0x8a1   : > { %9353 = vrsqrt.f32 %v6031_v41  ;;  %v6028_v0 = vadd.f32 %v6027_v22, %v6026_v27 }
 0x8a3   : > { %v6029_v36 = vrot.slane %v6028_v0, 1 }
 0x8a5   : > { %v6030_v52 = vadd.f32 %v6029_v36, %v6028_v0 }
 0x8a7   : > { %v6032_v29 = vmax.f32 %v6030_v52, 1e-24 }
 0x8a9   : > { %9355 = vrsqrt.f32 %v6032_v29 }
 0x8ab   : > { %v9354_v53 = vpop.eup %9353 }
 0x8ac   : > { %v6035_v26 = vmul.f32 %v9354_v53, %v6001_v21  ;;  %v6036_v63 = vmul.f32 %v9354_v53, %v6002_v5 }
 0x8ae   : > { %6039 = vst [vmem:[%s9725_s26] sm:$0xff] %v6035_v26  ;;  %6040 = vst [vmem:[%s9725_s26 + $0x8] sm:$0xff] %v6036_v63 }
 0x8b3   : > { %v9356_v47 = vpop.eup %9355 }
 0x8b4   : > { %v6037_v10 = vmul.f32 %v9356_v47, %v6003_v15  ;;  %v6038_v30 = vmul.f32 %v9356_v47, %v6004_v28 }
 0x8b6   : > { %6041 = vst [vmem:[%s9725_s26 + $0x10] sm:$0xff] %v6037_v10  ;;  %6042 = vst [vmem:[%s9725_s26 + $0x18] sm:$0xff] %v6038_v30 }
 0x8b7 PF: > { %s6183_s28 = sshll.u32 %s9499_s22, 9  ;;  %s6058_s17 = sshll.u32 %s9725_s26, 4  ;;  %s12228_s17 = int_to_ptr.vmem [resolvable:$true] %s6058_s17 }
 0x8b8   : > { %s12225_s23 = scalar_lea.hbm %s12297_s4, %s6183_s28  ;;  %s12232_s10 = scalar_lea.sflag [#allocation6], %s270_s24 }
 0x8b9   : > { %s9385_s11 = scalar_lea.vmem %s12228_s17, 512  ;;  %p13114_p13 = scmp.ne.s32.totalorder %s12531_s12, 0 }
 0x8ba   : > { %p9386_p11 = scmp.ne.s32.totalorder %s12228_s17, %s9385_s11  ;;  %s9524_s22 = smov [#allocation9]  }
 0x8bb   : > { %s9389_s6 = sshll.u32 %s9524_s22, 4  ;;  %s9390_s6 = int_to_ptr.vmem [resolvable:$false] %s9389_s6 }
 0x8bc   : > { %p9387_p0 = pnand %p9386_p11, %p13114_p13  ;;  %s9391_s7 = scalar_lea.vmem %s9390_s6, 1024 }
 0x8bd   : > { %p9392_p2 = scmp.lt.s32.totalorder %s12228_s17, %s9390_s6  ;;  %p9393_p8 = scmp.lt.s32.totalorder %s9391_s7, %s9385_s11 }
 0x8be   : > { %p9388_p1 = pneg %p9387_p0 }
 0x8bf   : > { %p9394_p10 = por %p9393_p8, %p9392_p2 }
 0x8c1   : > { %p9395_p3 = pnand %p9394_p10, %p9388_p1 }
 0x8c3   : > { %9398 = shalt.err (!%p9395_p3)
}
 0x8c4   : > { %s9399_s24 = scalar_lea.hbm %s12225_s23, 512  ;;  %s9403_s9 = scalar_lea.hbm %s12297_s4, 1024 }
 0x8c5   : > { %p9400_p6 = scmp.ne.s32.totalorder %s12225_s23, %s9399_s24  ;;  %p9404_p4 = scmp.lt.u32.totalorder %s12225_s23, %s12297_s4 }
 0x8c6   : > { %p9405_p5 = scmp.lt.u32.totalorder %s9403_s9, %s9399_s24  ;;  %p9407_p11 = scmp.lt.u32.totalorder %s9399_s24, %s12225_s23 }
 0x8c7   : > { %p9401_p7 = pnand %p9400_p6, %p13114_p13 }
 0x8c8   : > { %p9406_p9 = por %p9405_p5, %p9404_p4 }
 0x8c9   : > { %p9402_p12 = pneg %p9401_p7 }
 0x8ca   : > { %p9408_p0 = por %p9407_p11, %p9406_p9 }
 0x8cc   : > { %p9409_p1 = pnand %p9408_p0, %p9402_p12 }
 0x8ce   : > { %9412 = shalt.err (!%p9409_p1)
}
 0x8cf   : > { %s9525_s8 = smov 128   ;;  %s9526_s14 = smov 8  }
 0x8d0   : > { %9037 = dma.vmem_to_hbm [thread:$0]  (%p13114_p13), %s12228_s17, 512, %s12225_s23, %s12232_s10, %s9525_s8, %s9525_s8, %s9526_s14  }
 0x8d1 PF: > { %p9049_p2 = scmp.ge.s32.totalorder %s9511_s25, 2  ;;  %s6073_s5 = sand.u32 1, %s9471_s15  }
 0x8d2   : > { %p13115_p8 = scmp.ne.s32.totalorder %s12534_s18, 0  ;;  %s6074_s30 = scalar_lea.sflag [#allocation6], %s6073_s5 }
 0x8d4   : > { %p9044_p10 = pnand %p9049_p2, %p13115_p8 }
 0x8d6   : > { %9466 = dma.done.wait (!%p9044_p10), %s6074_s30, 512  }
 0x8d7   : > { %9468 = vsyncadd (!%p9044_p10), %s6074_s30, 4294966784  ;;  %s21_s25 = sadd.s32 1, %s9511_s25   ;;  %s13116_s28 = sld [smem:[#allocation16_spill]] }
 0x8d8   : > { %p18_p3 = scmp.ge.s32.totalorder %s21_s25, 6   ;;  %s13117_s17 = sld [smem:[#allocation21_spill]] }
 0x8d9   : > { %s13118_s12 = sld [smem:[#allocation22_spill]]  ;;  %s13119_s21 = sld [smem:[#allocation17_spill]] }
 0x8da   : > { %s13120_s22 = sld [smem:[#allocation18_spill]]  ;;  %s13121_s23 = sld [smem:[#allocation19_spill]] }
 0x8db   : > { %s13122_s24 = sld [smem:[#allocation20_spill]]  ;;  %s13123_s15 = smov %s9475_s16 }
 0x8dc   : > { %s13125_s18 = smov %s9487_s19  ;;  %s13126_s19 = smov %s9491_s20 }
 0x8dd   : > { %s13124_s16 = smov %s13116_s28  ;;  %20 = sbr.rel (!%p18_p3) target bundleno = 12 (0xc), region = 102 }
 0x8df   : > { %s13127_s20 = smov %s13118_s12 }
 0x8e4   :  { %6079 = vsyncpa [#allocation5], 1 }
 0x8e5   :  { %6081 = vsyncpa [#allocation5 + $0x1], 1 }
 0x8e6   :  { %6082 = vsyncpa [#allocation8], 1 }
 0x8e7   :  { %6083 = vsyncpa [#allocation6], 1 }
 0x8e8   :  { %6085 = vsyncpa [#allocation6 + $0x1], 1 }

</bundles_post_ra>
